<compile_context>
chip_gen: v5e
topology: v5e:2x2
jax: 0.10.0
libtpu: 0.0.40
codegen_flags: <defaults>
</compile_context>

<pallas_src>
import functools

import numpy as np
import jax
import jax.numpy as jnp
from jax import lax
from jax.experimental import pallas as pl
from jax.experimental.pallas import tpu as pltpu


# ------------------------------ Pallas kernels -------------------------------

def _conv_pool_kernel(p_ref, w_ref, b_ref, o_ref, *, scale, channels):
    """(patches @ W + b) * scale, MaxMin, 2x2 avg-pool.

    p_ref : (4, R, F) bf16 im2col patches.  The leading axis holds the 4
            members of each 2x2 pooling window, so pooling = mean over axis 0.
    w_ref : (F, C) bf16 weight, output channels ordered [even | odd].
    b_ref : (1, C) f32 bias, same ordering.
    o_ref : (R, C) bf16 pooled activations, channels in de-interleaved
            MaxMin order ([max-of-pairs | min-of-pairs]).
    """
    half = channels // 2
    acc_mx = acc_mn = None
    for q in range(4):                                    # unrolled pool window
        y = jnp.dot(p_ref[q], w_ref[...], preferred_element_type=jnp.float32)
        y = (y + b_ref[...]) * scale
        mx = jnp.maximum(y[:, :half], y[:, half:])
        mn = jnp.minimum(y[:, :half], y[:, half:])
        acc_mx = mx if acc_mx is None else acc_mx + mx
        acc_mn = mn if acc_mn is None else acc_mn + mn
    o_ref[:, :half] = (0.25 * acc_mx).astype(o_ref.dtype)
    o_ref[:, half:] = (0.25 * acc_mn).astype(o_ref.dtype)


def _tail_kernel(p2_ref, w2_ref, b2_ref, wf1_ref, bf1_ref, wf2t_ref, wf2b_ref,
                 bf2_ref, wlt_ref, wlb_ref, bl_ref, o_ref, z2_ref, flat_ref, *,
                 batch, lin_scale):
    """conv2 + MaxMin + pool + Flatten + fc1 + MaxMin + fc2 + MaxMin + lin."""
    # ---- conv2 (im2col matmul) + MaxMin + 2x2 avg-pool -----------------------
    c = w2_ref.shape[-1]
    half = c // 2
    acc_mx = acc_mn = None
    for q in range(4):
        y = jnp.dot(p2_ref[q], w2_ref[...], preferred_element_type=jnp.float32)
        y = y + b2_ref[...]
        mx = jnp.maximum(y[:, :half], y[:, half:])
        mn = jnp.minimum(y[:, :half], y[:, half:])
        acc_mx = mx if acc_mx is None else acc_mx + mx
        acc_mn = mn if acc_mn is None else acc_mn + mn
    z2_ref[:, :half] = 0.25 * acc_mx        # rows ordered (h, w, n), n fastest
    z2_ref[:, half:] = 0.25 * acc_mn

    # ---- nn.Flatten(): gather (spatial, batch) rows into a (batch, S*C) slab -
    n_spatial = z2_ref.shape[0] // batch
    for s in range(n_spatial):
        flat_ref[:, s * c:(s + 1) * c] = z2_ref[s * batch:(s + 1) * batch, :]

    # ---- fc1 + MaxMin ---------------------------------------------------------
    y = jnp.dot(flat_ref[...].astype(jnp.bfloat16), wf1_ref[...],
                preferred_element_type=jnp.float32) + bf1_ref[...]
    h = y.shape[-1] // 2
    mx = jnp.maximum(y[:, :h], y[:, h:]).astype(jnp.bfloat16)
    mn = jnp.minimum(y[:, :h], y[:, h:]).astype(jnp.bfloat16)

    # ---- fc2 + MaxMin (next weight pre-split on host: no lane concatenation) -
    y = (jnp.dot(mx, wf2t_ref[...], preferred_element_type=jnp.float32)
         + jnp.dot(mn, wf2b_ref[...], preferred_element_type=jnp.float32)
         + bf2_ref[...])
    h = y.shape[-1] // 2
    mx = jnp.maximum(y[:, :h], y[:, h:]).astype(jnp.bfloat16)
    mn = jnp.minimum(y[:, :h], y[:, h:]).astype(jnp.bfloat16)

    # ---- final AolLin: scale, no activation -----------------------------------
    y = (jnp.dot(mx, wlt_ref[...], preferred_element_type=jnp.float32)
         + jnp.dot(mn, wlb_ref[...], preferred_element_type=jnp.float32)
         + bl_ref[...]) * lin_scale
    o_ref[...] = y.astype(o_ref.dtype)


# --------------------------- pallas_call wrappers -----------------------------

def _fs(shape):
    nd = len(shape)
    return pl.BlockSpec(shape, lambda i, nd=nd: (0,) * nd)


def conv_maxmin_pool(patches, w, b, *, scale):
    """Stage-1 kernel: conv1 + MaxMin + pool.  Row axis tiled when large."""
    _, r, f = patches.shape
    c = w.shape[-1]
    tile = r
    for cand in (1024, 512):                 # megacore-friendly tiling for big batches
        if r > cand and r % cand == 0:
            tile = cand
            break
    kern = functools.partial(_conv_pool_kernel, scale=scale, channels=c)
    return pl.pallas_call(
        kern,
        out_shape=jax.ShapeDtypeStruct((r, c), jnp.bfloat16),
        grid=(r // tile,),
        in_specs=[pl.BlockSpec((4, tile, f), lambda i: (0, i, 0)),
                  pl.BlockSpec((f, c), lambda i: (0, 0)),
                  pl.BlockSpec((1, c), lambda i: (0, 0))],
        out_specs=pl.BlockSpec((tile, c), lambda i: (i, 0)),
        compiler_params=pltpu.CompilerParams(
            dimension_semantics=("parallel",)),
    )(patches, w, b)


def conv_fc_tail(patches, w2, b2, wf1, bf1, wf2_t, wf2_b, bf2, wl_t, wl_b, bl,
                 *, batch, lin_scale):
    """Stage-2 kernel: conv2+MaxMin+pool+Flatten+fc1+fc2+lin fused in VMEM."""
    num_classes = wl_t.shape[-1]
    c2 = w2.shape[-1]
    s_spatial = patches.shape[1] // batch
    args = (patches, w2, b2, wf1, bf1, wf2_t, wf2_b, bf2, wl_t, wl_b, bl)
    kern = functools.partial(_tail_kernel, batch=batch, lin_scale=lin_scale)
    return pl.pallas_call(
        kern,
        out_shape=jax.ShapeDtypeStruct((batch, num_classes), jnp.float32),
        grid=(1,),
        in_specs=[_fs(a.shape) for a in args],
        out_specs=_fs((batch, num_classes)),
        scratch_shapes=[pltpu.VMEM((s_spatial * batch, c2), jnp.float32),
                        pltpu.VMEM((batch, s_spatial * c2), jnp.float32)],
        compiler_params=pltpu.CompilerParams(
            dimension_semantics=("arbitrary",)),
    )(*args)


# ------------------------------ host-side glue --------------------------------

def _deint_idx(c):
    """[0,2,4,...,1,3,5,...]: maps de-interleaved lane q -> interleaved channel."""
    assert c % 2 == 0, "MaxMin requires an even channel count"
    return np.concatenate([np.arange(0, c, 2), np.arange(1, c, 2)])


def aol_linear_rescale(w, eps=1e-6):
    # AOL rescaling (Prach & Lampert 2022): per input feature 1/sqrt(sum|W^T W|).
    d = 1.0 / jnp.sqrt(jnp.sum(jnp.abs(w.T @ w), axis=1) + eps)
    return w * d[None, :]


def aol_conv_rescale(w, eps=1e-6):
    # AOL conv rescaling: per input channel i, 1/sqrt(sum_j,dy,dx |V_ij|).
    co, ci, k, _ = w.shape
    wt = jnp.transpose(w, (1, 0, 2, 3))                           # (ci, co, k, k)
    kkt = lax.conv_general_dilated(
        wt, wt, window_strides=(1, 1),
        padding=[(k - 1, k - 1), (k - 1, k - 1)],
        dimension_numbers=("NCHW", "OIHW", "NCHW"))
    d = 1.0 / jnp.sqrt(jnp.sum(jnp.abs(kkt), axis=(1, 2, 3)) + eps)
    return w * d[None, :, None, None]


def _prep_conv(w, b, in_perm):
    """AOL-rescaled conv weight as an im2col matmul matrix, bf16.

    Rows ordered (dy, dx, ci); output channels reordered [even | odd] for the
    in-kernel MaxMin-by-halves; `in_perm` matches a de-interleaved producer.
    """
    co, ci, k, _ = w.shape
    wr = aol_conv_rescale(w)
    if in_perm is not None:
        wr = wr[:, in_perm, :, :]
    wmat = jnp.transpose(wr, (2, 3, 1, 0)).reshape(k * k * ci, co)
    op = _deint_idx(co)
    return (wmat[:, op].astype(jnp.bfloat16),
            b[op].reshape(1, co).astype(jnp.float32))


def _prep_fc(w, b, in_perm, *, maxmin):
    wr = aol_linear_rescale(w)              # (out, in)
    wmat = wr.T                             # (in, out)
    if in_perm is not None:
        wmat = wmat[in_perm, :]
    if maxmin:
        op = _deint_idx(w.shape[0])
        wmat = wmat[:, op]
        b = b[op]
    return wmat.astype(jnp.bfloat16), b.reshape(1, -1).astype(jnp.float32)


def _patches_nhwc(x, k):
    """im2col patches in NHWC; feature order (dy, dx, ci), ci fastest."""
    n, h, w, c = x.shape
    ho, wo = h - k + 1, w - k + 1
    cols = [x[:, dy:dy + ho, dx:dx + wo, :] for dy in range(k) for dx in range(k)]
    return jnp.concatenate(cols, axis=-1), (ho, wo)


def _group_pool_windows(p, *, batch_fastest):
    """Reorder patch rows so the 4 members of each 2x2 pool window form the 4
    leading blocks: output (4, rows, features)."""
    n, ho, wo, f = p.shape
    assert ho % 2 == 0 and wo % 2 == 0
    p = p.reshape(n, ho // 2, 2, wo // 2, 2, f)
    if batch_fastest:                        # rows ordered (oi, oj, n)
        p = p.transpose(2, 4, 1, 3, 0, 5)
    else:                                    # rows ordered (n, oi, oj)
        p = p.transpose(2, 4, 0, 1, 3, 5)
    return p.reshape(4, n * (ho // 2) * (wo // 2), f)


# ---------------------------------- model -------------------------------------

def init_params(key, in_channels, num_classes):
    ks = jax.random.split(key, 10)

    def u(k, shape, fan_in):
        bound = 1.0 / jnp.sqrt(jnp.float32(fan_in))
        return jax.random.uniform(k, shape, jnp.float32, -bound, bound)

    return {
        "conv1_w": u(ks[0], (6, in_channels, 5, 5), in_channels * 25),
        "conv1_b": u(ks[1], (6,), in_channels * 25),
        "conv2_w": u(ks[2], (16, 6, 5, 5), 6 * 25),
        "conv2_b": u(ks[3], (16,), 6 * 25),
        "fc1_w": u(ks[4], (120, 16 * 5 * 5), 16 * 5 * 5),
        "fc1_b": u(ks[5], (120,), 16 * 5 * 5),
        "fc2_w": u(ks[6], (84, 120), 120),
        "fc2_b": u(ks[7], (84,), 120),
        "lin_w": u(ks[8], (num_classes, 84), 84),
        "lin_b": u(ks[9], (num_classes,), 84),
    }


def all_lenet5_forward(params, x, gamma):
    # TODO(synk): AolConv/AolFc/AolLin definitions were not provided with the
    # module; implemented as AOL-rescaled conv/linear layers (Prach & Lampert
    # 2022) with MaxMin activation in Conv/Fc and none in the final Lin,
    # matching the previously accepted semantics.
    g = float(gamma) ** 0.5
    n = x.shape[0]
    co1 = params["conv1_w"].shape[0]
    co2 = params["conv2_w"].shape[0]
    k1 = params["conv1_w"].shape[-1]
    k2 = params["conv2_w"].shape[-1]

    xh = jnp.transpose(x, (0, 2, 3, 1)).astype(jnp.bfloat16)   # NCHW -> NHWC once

    # ---- stage 1: AolConv(in, 6, 5, scale=g) + MaxMin + AvgPool2d(2) ---------
    w1, b1 = _prep_conv(params["conv1_w"], params["conv1_b"], None)
    p1, (ho1, wo1) = _patches_nhwc(xh, k1)
    p1g = _group_pool_windows(p1, batch_fastest=False)         # (4, n*14*14, 25*ci)
    h1 = conv_maxmin_pool(p1g, w1, b1, scale=g)                # (n*14*14, 6) bf16
    h1 = h1.reshape(n, ho1 // 2, wo1 // 2, co1)                # NHWC, deint channels

    # ---- stage 2: conv2+MaxMin+pool+Flatten+fc1+fc2+lin, one fused kernel ----
    p2, (ho2, wo2) = _patches_nhwc(h1, k2)
    p2g = _group_pool_windows(p2, batch_fastest=True)          # (4, 25*n, 150)
    s_spatial = (ho2 // 2) * (wo2 // 2)
    assert params["fc1_w"].shape[1] == co2 * s_spatial

    w2, b2 = _prep_conv(params["conv2_w"], params["conv2_b"], _deint_idx(co1))

    # fc1 consumes the in-kernel flatten whose feature order is
    # (spatial s = h*5+w, de-interleaved channel q); remap its input rows.
    dco2 = _deint_idx(co2)
    fc1_perm = np.array([dco2[f % co2] * s_spatial + f // co2
                         for f in range(co2 * s_spatial)])
    wf1, bf1 = _prep_fc(params["fc1_w"], params["fc1_b"], fc1_perm, maxmin=True)
    wf2, bf2 = _prep_fc(params["fc2_w"], params["fc2_b"],
                        _deint_idx(params["fc2_w"].shape[1]), maxmin=True)
    wl, bl = _prep_fc(params["lin_w"], params["lin_b"],
                      _deint_idx(params["lin_w"].shape[1]), maxmin=False)

    hf2 = wf2.shape[0] // 2                  # pre-split halves: MaxMin feeds two
    hl = wl.shape[0] // 2                    # half-dots, no lane shuffling needed
    return conv_fc_tail(p2g, w2, b2, wf1, bf1, wf2[:hf2], wf2[hf2:], bf2,
                        wl[:hl], wl[hl:], bl, batch=n, lin_scale=g)


if __name__ == "__main__":
    # config: in_channels=1, img_size=32 (so the 16*5*5 FC input matches),
    # num_classes=10, gamma=2.0, layer='Aol'; batch=2.
    in_channels, img_size, num_classes, gamma = 1, 32, 10, 2.0

    key = jax.random.PRNGKey(0)
    kx, kp = jax.random.split(key)
    x = jax.random.normal(kx, (2, in_channels, img_size, img_size), jnp.float32)
    params = init_params(kp, in_channels, num_classes)

    fwd = jax.jit(functools.partial(all_lenet5_forward, gamma=gamma))
    out = fwd(params, x)
    jax.block_until_ready(out)
    assert out.shape == (2, num_classes) and out.dtype == jnp.float32
    assert bool(jnp.all(jnp.isfinite(out)))
    print("KERNEL_OK")
</pallas_src>

<mosaic_0001>
module attributes {stable_mosaic.version = 11 : i64} {
  func.func @_conv_pool_kernel(%arg0: i32, %arg1: memref<4x392x25xbf16, #tpu.memory_space<vmem>>, %arg2: memref<25x6xbf16, #tpu.memory_space<vmem>>, %arg3: memref<1x6xf32, #tpu.memory_space<vmem>>, %arg4: memref<392x6xbf16, #tpu.memory_space<vmem>>) attributes {dimension_semantics = [#tpu.dimension_semantics<parallel>], iteration_bounds = array<i64: 1>, scalar_prefetch = 0 : i64, scratch_operands = 0 : i64, tpu.core_type = #tpu.core_type<tc>, window_params = [{transform_indices = @transform_0, window_bounds = array<i64: 4, 392, 25>}, {pipeline_mode = #tpu.pipeline_mode<synchronous>, transform_indices = @transform_1, window_bounds = array<i64: 25, 6>}, {pipeline_mode = #tpu.pipeline_mode<synchronous>, transform_indices = @transform_2, window_bounds = array<i64: 1, 6>}, {transform_indices = @transform_3, window_bounds = array<i64: 392, 6>}]} {
    %c0 = arith.constant 0 : index
    %c0_0 = arith.constant 0 : index
    %c0_1 = arith.constant 0 : index
    %0 = vector.load %arg1[%c0, %c0_0, %c0_1] : memref<4x392x25xbf16, #tpu.memory_space<vmem>>, vector<1x392x25xbf16>
    %1 = vector.shape_cast %0 : vector<1x392x25xbf16> to vector<392x25xbf16>
    %c0_2 = arith.constant 0 : index
    %c0_3 = arith.constant 0 : index
    %2 = vector.load %arg2[%c0_2, %c0_3] : memref<25x6xbf16, #tpu.memory_space<vmem>>, vector<25x6xbf16>
    %cst = arith.constant dense<0.000000e+00> : vector<392x6xf32>
    %3 = tpu.matmul %1, %2, %cst {dimension_numbers = #tpu.dot_dimension_numbers<[1], [0], [0], [1], [0, 0, 1, 1], [], []>} : vector<392x25xbf16>, vector<25x6xbf16>, vector<392x6xf32> -> vector<392x6xf32>
    %c0_4 = arith.constant 0 : index
    %c0_5 = arith.constant 0 : index
    %4 = vector.load %arg3[%c0_4, %c0_5] : memref<1x6xf32, #tpu.memory_space<vmem>>, vector<1x6xf32>
    %5 = vector.broadcast %4 : vector<1x6xf32> to vector<392x6xf32>
    %6 = arith.addf %3, %5 : vector<392x6xf32>
    %cst_6 = arith.constant 1.41421354 : f32
    %7 = vector.broadcast %cst_6 : f32 to vector<392x6xf32>
    %8 = arith.mulf %6, %7 : vector<392x6xf32>
    %9 = vector.extract_strided_slice %8 {offsets = [0, 0], sizes = [392, 3], strides = [1, 1]} : vector<392x6xf32> to vector<392x3xf32>
    %10 = vector.extract_strided_slice %8 {offsets = [0, 3], sizes = [392, 3], strides = [1, 1]} : vector<392x6xf32> to vector<392x3xf32>
    %11 = arith.maximumf %9, %10 : vector<392x3xf32>
    %12 = vector.extract_strided_slice %8 {offsets = [0, 0], sizes = [392, 3], strides = [1, 1]} : vector<392x6xf32> to vector<392x3xf32>
    %13 = vector.extract_strided_slice %8 {offsets = [0, 3], sizes = [392, 3], strides = [1, 1]} : vector<392x6xf32> to vector<392x3xf32>
    %14 = arith.minimumf %12, %13 : vector<392x3xf32>
    %c1 = arith.constant 1 : index
    %c0_7 = arith.constant 0 : index
    %c0_8 = arith.constant 0 : index
    %15 = vector.load %arg1[%c1, %c0_7, %c0_8] : memref<4x392x25xbf16, #tpu.memory_space<vmem>>, vector<1x392x25xbf16>
    %16 = vector.shape_cast %15 : vector<1x392x25xbf16> to vector<392x25xbf16>
    %c0_9 = arith.constant 0 : index
    %c0_10 = arith.constant 0 : index
    %17 = vector.load %arg2[%c0_9, %c0_10] : memref<25x6xbf16, #tpu.memory_space<vmem>>, vector<25x6xbf16>
    %cst_11 = arith.constant dense<0.000000e+00> : vector<392x6xf32>
    %18 = tpu.matmul %16, %17, %cst_11 {dimension_numbers = #tpu.dot_dimension_numbers<[1], [0], [0], [1], [0, 0, 1, 1], [], []>} : vector<392x25xbf16>, vector<25x6xbf16>, vector<392x6xf32> -> vector<392x6xf32>
    %c0_12 = arith.constant 0 : index
    %c0_13 = arith.constant 0 : index
    %19 = vector.load %arg3[%c0_12, %c0_13] : memref<1x6xf32, #tpu.memory_space<vmem>>, vector<1x6xf32>
    %20 = vector.broadcast %19 : vector<1x6xf32> to vector<392x6xf32>
    %21 = arith.addf %18, %20 : vector<392x6xf32>
    %cst_14 = arith.constant 1.41421354 : f32
    %22 = vector.broadcast %cst_14 : f32 to vector<392x6xf32>
    %23 = arith.mulf %21, %22 : vector<392x6xf32>
    %24 = vector.extract_strided_slice %23 {offsets = [0, 0], sizes = [392, 3], strides = [1, 1]} : vector<392x6xf32> to vector<392x3xf32>
    %25 = vector.extract_strided_slice %23 {offsets = [0, 3], sizes = [392, 3], strides = [1, 1]} : vector<392x6xf32> to vector<392x3xf32>
    %26 = arith.maximumf %24, %25 : vector<392x3xf32>
    %27 = vector.extract_strided_slice %23 {offsets = [0, 0], sizes = [392, 3], strides = [1, 1]} : vector<392x6xf32> to vector<392x3xf32>
    %28 = vector.extract_strided_slice %23 {offsets = [0, 3], sizes = [392, 3], strides = [1, 1]} : vector<392x6xf32> to vector<392x3xf32>
    %29 = arith.minimumf %27, %28 : vector<392x3xf32>
    %30 = arith.addf %11, %26 : vector<392x3xf32>
    %31 = arith.addf %14, %29 : vector<392x3xf32>
    %c2 = arith.constant 2 : index
    %c0_15 = arith.constant 0 : index
    %c0_16 = arith.constant 0 : index
    %32 = vector.load %arg1[%c2, %c0_15, %c0_16] : memref<4x392x25xbf16, #tpu.memory_space<vmem>>, vector<1x392x25xbf16>
    %33 = vector.shape_cast %32 : vector<1x392x25xbf16> to vector<392x25xbf16>
    %c0_17 = arith.constant 0 : index
    %c0_18 = arith.constant 0 : index
    %34 = vector.load %arg2[%c0_17, %c0_18] : memref<25x6xbf16, #tpu.memory_space<vmem>>, vector<25x6xbf16>
    %cst_19 = arith.constant dense<0.000000e+00> : vector<392x6xf32>
    %35 = tpu.matmul %33, %34, %cst_19 {dimension_numbers = #tpu.dot_dimension_numbers<[1], [0], [0], [1], [0, 0, 1, 1], [], []>} : vector<392x25xbf16>, vector<25x6xbf16>, vector<392x6xf32> -> vector<392x6xf32>
    %c0_20 = arith.constant 0 : index
    %c0_21 = arith.constant 0 : index
    %36 = vector.load %arg3[%c0_20, %c0_21] : memref<1x6xf32, #tpu.memory_space<vmem>>, vector<1x6xf32>
    %37 = vector.broadcast %36 : vector<1x6xf32> to vector<392x6xf32>
    %38 = arith.addf %35, %37 : vector<392x6xf32>
    %cst_22 = arith.constant 1.41421354 : f32
    %39 = vector.broadcast %cst_22 : f32 to vector<392x6xf32>
    %40 = arith.mulf %38, %39 : vector<392x6xf32>
    %41 = vector.extract_strided_slice %40 {offsets = [0, 0], sizes = [392, 3], strides = [1, 1]} : vector<392x6xf32> to vector<392x3xf32>
    %42 = vector.extract_strided_slice %40 {offsets = [0, 3], sizes = [392, 3], strides = [1, 1]} : vector<392x6xf32> to vector<392x3xf32>
    %43 = arith.maximumf %41, %42 : vector<392x3xf32>
    %44 = vector.extract_strided_slice %40 {offsets = [0, 0], sizes = [392, 3], strides = [1, 1]} : vector<392x6xf32> to vector<392x3xf32>
    %45 = vector.extract_strided_slice %40 {offsets = [0, 3], sizes = [392, 3], strides = [1, 1]} : vector<392x6xf32> to vector<392x3xf32>
    %46 = arith.minimumf %44, %45 : vector<392x3xf32>
    %47 = arith.addf %30, %43 : vector<392x3xf32>
    %48 = arith.addf %31, %46 : vector<392x3xf32>
    %c3 = arith.constant 3 : index
    %c0_23 = arith.constant 0 : index
    %c0_24 = arith.constant 0 : index
    %49 = vector.load %arg1[%c3, %c0_23, %c0_24] : memref<4x392x25xbf16, #tpu.memory_space<vmem>>, vector<1x392x25xbf16>
    %50 = vector.shape_cast %49 : vector<1x392x25xbf16> to vector<392x25xbf16>
    %c0_25 = arith.constant 0 : index
    %c0_26 = arith.constant 0 : index
    %51 = vector.load %arg2[%c0_25, %c0_26] : memref<25x6xbf16, #tpu.memory_space<vmem>>, vector<25x6xbf16>
    %cst_27 = arith.constant dense<0.000000e+00> : vector<392x6xf32>
    %52 = tpu.matmul %50, %51, %cst_27 {dimension_numbers = #tpu.dot_dimension_numbers<[1], [0], [0], [1], [0, 0, 1, 1], [], []>} : vector<392x25xbf16>, vector<25x6xbf16>, vector<392x6xf32> -> vector<392x6xf32>
    %c0_28 = arith.constant 0 : index
    %c0_29 = arith.constant 0 : index
    %53 = vector.load %arg3[%c0_28, %c0_29] : memref<1x6xf32, #tpu.memory_space<vmem>>, vector<1x6xf32>
    %54 = vector.broadcast %53 : vector<1x6xf32> to vector<392x6xf32>
    %55 = arith.addf %52, %54 : vector<392x6xf32>
    %cst_30 = arith.constant 1.41421354 : f32
    %56 = vector.broadcast %cst_30 : f32 to vector<392x6xf32>
    %57 = arith.mulf %55, %56 : vector<392x6xf32>
    %58 = vector.extract_strided_slice %57 {offsets = [0, 0], sizes = [392, 3], strides = [1, 1]} : vector<392x6xf32> to vector<392x3xf32>
    %59 = vector.extract_strided_slice %57 {offsets = [0, 3], sizes = [392, 3], strides = [1, 1]} : vector<392x6xf32> to vector<392x3xf32>
    %60 = arith.maximumf %58, %59 : vector<392x3xf32>
    %61 = vector.extract_strided_slice %57 {offsets = [0, 0], sizes = [392, 3], strides = [1, 1]} : vector<392x6xf32> to vector<392x3xf32>
    %62 = vector.extract_strided_slice %57 {offsets = [0, 3], sizes = [392, 3], strides = [1, 1]} : vector<392x6xf32> to vector<392x3xf32>
    %63 = arith.minimumf %61, %62 : vector<392x3xf32>
    %64 = arith.addf %47, %60 : vector<392x3xf32>
    %65 = arith.addf %48, %63 : vector<392x3xf32>
    %cst_31 = arith.constant 2.500000e-01 : f32
    %66 = vector.broadcast %cst_31 : f32 to vector<392x3xf32>
    %67 = arith.mulf %66, %64 : vector<392x3xf32>
    %68 = arith.truncf %67 : vector<392x3xf32> to vector<392x3xbf16>
    %c0_32 = arith.constant 0 : index
    %c0_33 = arith.constant 0 : index
    %69 = vector.load %arg4[%c0_32, %c0_33] : memref<392x6xbf16, #tpu.memory_space<vmem>>, vector<392x3xbf16>
    tpu.vector_store %arg4[%c0_32, %c0_33], %68 {strides = array<i32>} : memref<392x6xbf16, #tpu.memory_space<vmem>>, vector<392x3xbf16>,
    %cst_34 = arith.constant 2.500000e-01 : f32
    %70 = vector.broadcast %cst_34 : f32 to vector<392x3xf32>
    %71 = arith.mulf %70, %65 : vector<392x3xf32>
    %72 = arith.truncf %71 : vector<392x3xf32> to vector<392x3xbf16>
    %c0_35 = arith.constant 0 : index
    %c3_36 = arith.constant 3 : index
    %73 = vector.load %arg4[%c0_35, %c3_36] : memref<392x6xbf16, #tpu.memory_space<vmem>>, vector<392x3xbf16>
    tpu.vector_store %arg4[%c0_35, %c3_36], %72 {strides = array<i32>} : memref<392x6xbf16, #tpu.memory_space<vmem>>, vector<392x3xbf16>,
    return
  }
  func.func @transform_0(%arg0: i32) -> (i32, i32, i32) {
    %c0_i32 = arith.constant 0 : i32
    %c0_i32_0 = arith.constant 0 : i32
    %c0_i32_1 = arith.constant 0 : i32
    return %c0_i32, %arg0, %c0_i32_0 : i32, i32, i32
  }
  func.func @transform_1(%arg0: i32) -> (i32, i32) {
    %c0_i32 = arith.constant 0 : i32
    %c0_i32_0 = arith.constant 0 : i32
    %c0_i32_1 = arith.constant 0 : i32
    return %c0_i32, %c0_i32_0 : i32, i32
  }
  func.func @transform_2(%arg0: i32) -> (i32, i32) {
    %c0_i32 = arith.constant 0 : i32
    %c0_i32_0 = arith.constant 0 : i32
    %c0_i32_1 = arith.constant 0 : i32
    return %c0_i32, %c0_i32_0 : i32, i32
  }
  func.func @transform_3(%arg0: i32) -> (i32, i32) {
    %c0_i32 = arith.constant 0 : i32
    %c0_i32_0 = arith.constant 0 : i32
    return %arg0, %c0_i32 : i32, i32
  }
}

module attributes {stable_mosaic.version = 11 : i64} {
  func.func @_tail_kernel(%arg0: i32, %arg1: memref<4x50x150xbf16, #tpu.memory_space<vmem>>, %arg2: memref<150x16xbf16, #tpu.memory_space<vmem>>, %arg3: memref<1x16xf32, #tpu.memory_space<vmem>>, %arg4: memref<400x120xbf16, #tpu.memory_space<vmem>>, %arg5: memref<1x120xf32, #tpu.memory_space<vmem>>, %arg6: memref<60x84xbf16, #tpu.memory_space<vmem>>, %arg7: memref<60x84xbf16, #tpu.memory_space<vmem>>, %arg8: memref<1x84xf32, #tpu.memory_space<vmem>>, %arg9: memref<42x10xbf16, #tpu.memory_space<vmem>>, %arg10: memref<42x10xbf16, #tpu.memory_space<vmem>>, %arg11: memref<1x10xf32, #tpu.memory_space<vmem>>, %arg12: memref<2x10xf32, #tpu.memory_space<vmem>>, %arg13: memref<50x16xf32, #tpu.memory_space<vmem>>, %arg14: memref<2x400xf32, #tpu.memory_space<vmem>>) attributes {dimension_semantics = [#tpu.dimension_semantics<arbitrary>], iteration_bounds = array<i64: 1>, scalar_prefetch = 0 : i64, scratch_operands = 2 : i64, tpu.core_type = #tpu.core_type<tc>, window_params = [{pipeline_mode = #tpu.pipeline_mode<synchronous>, transform_indices = @transform_0, window_bounds = array<i64: 4, 50, 150>}, {pipeline_mode = #tpu.pipeline_mode<synchronous>, transform_indices = @transform_1, window_bounds = array<i64: 150, 16>}, {pipeline_mode = #tpu.pipeline_mode<synchronous>, transform_indices = @transform_2, window_bounds = array<i64: 1, 16>}, {pipeline_mode = #tpu.pipeline_mode<synchronous>, transform_indices = @transform_3, window_bounds = array<i64: 400, 120>}, {pipeline_mode = #tpu.pipeline_mode<synchronous>, transform_indices = @transform_4, window_bounds = array<i64: 1, 120>}, {pipeline_mode = #tpu.pipeline_mode<synchronous>, transform_indices = @transform_5, window_bounds = array<i64: 60, 84>}, {pipeline_mode = #tpu.pipeline_mode<synchronous>, transform_indices = @transform_6, window_bounds = array<i64: 60, 84>}, {pipeline_mode = #tpu.pipeline_mode<synchronous>, transform_indices = @transform_7, window_bounds = array<i64: 1, 84>}, {pipeline_mode = #tpu.pipeline_mode<synchronous>, transform_indices = @transform_8, window_bounds = array<i64: 42, 10>}, {pipeline_mode = #tpu.pipeline_mode<synchronous>, transform_indices = @transform_9, window_bounds = array<i64: 42, 10>}, {pipeline_mode = #tpu.pipeline_mode<synchronous>, transform_indices = @transform_10, window_bounds = array<i64: 1, 10>}, {pipeline_mode = #tpu.pipeline_mode<synchronous>, transform_indices = @transform_11, window_bounds = array<i64: 2, 10>}]} {
    %c0 = arith.constant 0 : index
    %c0_0 = arith.constant 0 : index
    %c0_1 = arith.constant 0 : index
    %0 = vector.load %arg1[%c0, %c0_0, %c0_1] : memref<4x50x150xbf16, #tpu.memory_space<vmem>>, vector<1x50x150xbf16>
    %1 = vector.shape_cast %0 : vector<1x50x150xbf16> to vector<50x150xbf16>
    %c0_2 = arith.constant 0 : index
    %c0_3 = arith.constant 0 : index
    %2 = vector.load %arg2[%c0_2, %c0_3] : memref<150x16xbf16, #tpu.memory_space<vmem>>, vector<150x16xbf16>
    %cst = arith.constant dense<0.000000e+00> : vector<50x16xf32>
    %3 = tpu.matmul %1, %2, %cst {dimension_numbers = #tpu.dot_dimension_numbers<[1], [0], [0], [1], [0, 0, 1, 1], [], []>} : vector<50x150xbf16>, vector<150x16xbf16>, vector<50x16xf32> -> vector<50x16xf32>
    %c0_4 = arith.constant 0 : index
    %c0_5 = arith.constant 0 : index
    %4 = vector.load %arg3[%c0_4, %c0_5] : memref<1x16xf32, #tpu.memory_space<vmem>>, vector<1x16xf32>
    %5 = vector.broadcast %4 : vector<1x16xf32> to vector<50x16xf32>
    %6 = arith.addf %3, %5 : vector<50x16xf32>
    %7 = vector.extract_strided_slice %6 {offsets = [0, 0], sizes = [50, 8], strides = [1, 1]} : vector<50x16xf32> to vector<50x8xf32>
    %8 = vector.extract_strided_slice %6 {offsets = [0, 8], sizes = [50, 8], strides = [1, 1]} : vector<50x16xf32> to vector<50x8xf32>
    %9 = arith.maximumf %7, %8 : vector<50x8xf32>
    %10 = vector.extract_strided_slice %6 {offsets = [0, 0], sizes = [50, 8], strides = [1, 1]} : vector<50x16xf32> to vector<50x8xf32>
    %11 = vector.extract_strided_slice %6 {offsets = [0, 8], sizes = [50, 8], strides = [1, 1]} : vector<50x16xf32> to vector<50x8xf32>
    %12 = arith.minimumf %10, %11 : vector<50x8xf32>
    %c1 = arith.constant 1 : index
    %c0_6 = arith.constant 0 : index
    %c0_7 = arith.constant 0 : index
    %13 = vector.load %arg1[%c1, %c0_6, %c0_7] : memref<4x50x150xbf16, #tpu.memory_space<vmem>>, vector<1x50x150xbf16>
    %14 = vector.shape_cast %13 : vector<1x50x150xbf16> to vector<50x150xbf16>
    %c0_8 = arith.constant 0 : index
    %c0_9 = arith.constant 0 : index
    %15 = vector.load %arg2[%c0_8, %c0_9] : memref<150x16xbf16, #tpu.memory_space<vmem>>, vector<150x16xbf16>
    %cst_10 = arith.constant dense<0.000000e+00> : vector<50x16xf32>
    %16 = tpu.matmul %14, %15, %cst_10 {dimension_numbers = #tpu.dot_dimension_numbers<[1], [0], [0], [1], [0, 0, 1, 1], [], []>} : vector<50x150xbf16>, vector<150x16xbf16>, vector<50x16xf32> -> vector<50x16xf32>
    %c0_11 = arith.constant 0 : index
    %c0_12 = arith.constant 0 : index
    %17 = vector.load %arg3[%c0_11, %c0_12] : memref<1x16xf32, #tpu.memory_space<vmem>>, vector<1x16xf32>
    %18 = vector.broadcast %17 : vector<1x16xf32> to vector<50x16xf32>
    %19 = arith.addf %16, %18 : vector<50x16xf32>
    %20 = vector.extract_strided_slice %19 {offsets = [0, 0], sizes = [50, 8], strides = [1, 1]} : vector<50x16xf32> to vector<50x8xf32>
    %21 = vector.extract_strided_slice %19 {offsets = [0, 8], sizes = [50, 8], strides = [1, 1]} : vector<50x16xf32> to vector<50x8xf32>
    %22 = arith.maximumf %20, %21 : vector<50x8xf32>
    %23 = vector.extract_strided_slice %19 {offsets = [0, 0], sizes = [50, 8], strides = [1, 1]} : vector<50x16xf32> to vector<50x8xf32>
    %24 = vector.extract_strided_slice %19 {offsets = [0, 8], sizes = [50, 8], strides = [1, 1]} : vector<50x16xf32> to vector<50x8xf32>
    %25 = arith.minimumf %23, %24 : vector<50x8xf32>
    %26 = arith.addf %9, %22 : vector<50x8xf32>
    %27 = arith.addf %12, %25 : vector<50x8xf32>
    %c2 = arith.constant 2 : index
    %c0_13 = arith.constant 0 : index
    %c0_14 = arith.constant 0 : index
    %28 = vector.load %arg1[%c2, %c0_13, %c0_14] : memref<4x50x150xbf16, #tpu.memory_space<vmem>>, vector<1x50x150xbf16>
    %29 = vector.shape_cast %28 : vector<1x50x150xbf16> to vector<50x150xbf16>
    %c0_15 = arith.constant 0 : index
    %c0_16 = arith.constant 0 : index
    %30 = vector.load %arg2[%c0_15, %c0_16] : memref<150x16xbf16, #tpu.memory_space<vmem>>, vector<150x16xbf16>
    %cst_17 = arith.constant dense<0.000000e+00> : vector<50x16xf32>
    %31 = tpu.matmul %29, %30, %cst_17 {dimension_numbers = #tpu.dot_dimension_numbers<[1], [0], [0], [1], [0, 0, 1, 1], [], []>} : vector<50x150xbf16>, vector<150x16xbf16>, vector<50x16xf32> -> vector<50x16xf32>
    %c0_18 = arith.constant 0 : index
    %c0_19 = arith.constant 0 : index
    %32 = vector.load %arg3[%c0_18, %c0_19] : memref<1x16xf32, #tpu.memory_space<vmem>>, vector<1x16xf32>
    %33 = vector.broadcast %32 : vector<1x16xf32> to vector<50x16xf32>
    %34 = arith.addf %31, %33 : vector<50x16xf32>
    %35 = vector.extract_strided_slice %34 {offsets = [0, 0], sizes = [50, 8], strides = [1, 1]} : vector<50x16xf32> to vector<50x8xf32>
    %36 = vector.extract_strided_slice %34 {offsets = [0, 8], sizes = [50, 8], strides = [1, 1]} : vector<50x16xf32> to vector<50x8xf32>
    %37 = arith.maximumf %35, %36 : vector<50x8xf32>
    %38 = vector.extract_strided_slice %34 {offsets = [0, 0], sizes = [50, 8], strides = [1, 1]} : vector<50x16xf32> to vector<50x8xf32>
    %39 = vector.extract_strided_slice %34 {offsets = [0, 8], sizes = [50, 8], strides = [1, 1]} : vector<50x16xf32> to vector<50x8xf32>
    %40 = arith.minimumf %38, %39 : vector<50x8xf32>
    %41 = arith.addf %26, %37 : vector<50x8xf32>
    %42 = arith.addf %27, %40 : vector<50x8xf32>
    %c3 = arith.constant 3 : index
    %c0_20 = arith.constant 0 : index
    %c0_21 = arith.constant 0 : index
    %43 = vector.load %arg1[%c3, %c0_20, %c0_21] : memref<4x50x150xbf16, #tpu.memory_space<vmem>>, vector<1x50x150xbf16>
    %44 = vector.shape_cast %43 : vector<1x50x150xbf16> to vector<50x150xbf16>
    %c0_22 = arith.constant 0 : index
    %c0_23 = arith.constant 0 : index
    %45 = vector.load %arg2[%c0_22, %c0_23] : memref<150x16xbf16, #tpu.memory_space<vmem>>, vector<150x16xbf16>
    %cst_24 = arith.constant dense<0.000000e+00> : vector<50x16xf32>
    %46 = tpu.matmul %44, %45, %cst_24 {dimension_numbers = #tpu.dot_dimension_numbers<[1], [0], [0], [1], [0, 0, 1, 1], [], []>} : vector<50x150xbf16>, vector<150x16xbf16>, vector<50x16xf32> -> vector<50x16xf32>
    %c0_25 = arith.constant 0 : index
    %c0_26 = arith.constant 0 : index
    %47 = vector.load %arg3[%c0_25, %c0_26] : memref<1x16xf32, #tpu.memory_space<vmem>>, vector<1x16xf32>
    %48 = vector.broadcast %47 : vector<1x16xf32> to vector<50x16xf32>
    %49 = arith.addf %46, %48 : vector<50x16xf32>
    %50 = vector.extract_strided_slice %49 {offsets = [0, 0], sizes = [50, 8], strides = [1, 1]} : vector<50x16xf32> to vector<50x8xf32>
    %51 = vector.extract_strided_slice %49 {offsets = [0, 8], sizes = [50, 8], strides = [1, 1]} : vector<50x16xf32> to vector<50x8xf32>
    %52 = arith.maximumf %50, %51 : vector<50x8xf32>
    %53 = vector.extract_strided_slice %49 {offsets = [0, 0], sizes = [50, 8], strides = [1, 1]} : vector<50x16xf32> to vector<50x8xf32>
    %54 = vector.extract_strided_slice %49 {offsets = [0, 8], sizes = [50, 8], strides = [1, 1]} : vector<50x16xf32> to vector<50x8xf32>
    %55 = arith.minimumf %53, %54 : vector<50x8xf32>
    %56 = arith.addf %41, %52 : vector<50x8xf32>
    %57 = arith.addf %42, %55 : vector<50x8xf32>
    %cst_27 = arith.constant 2.500000e-01 : f32
    %58 = vector.broadcast %cst_27 : f32 to vector<50x8xf32>
    %59 = arith.mulf %58, %56 : vector<50x8xf32>
    %c0_28 = arith.constant 0 : index
    %c0_29 = arith.constant 0 : index
    %60 = vector.load %arg13[%c0_28, %c0_29] : memref<50x16xf32, #tpu.memory_space<vmem>>, vector<50x8xf32>
    tpu.vector_store %arg13[%c0_28, %c0_29], %59 {strides = array<i32>} : memref<50x16xf32, #tpu.memory_space<vmem>>, vector<50x8xf32>,
    %cst_30 = arith.constant 2.500000e-01 : f32
    %61 = vector.broadcast %cst_30 : f32 to vector<50x8xf32>
    %62 = arith.mulf %61, %57 : vector<50x8xf32>
    %c0_31 = arith.constant 0 : index
    %c8 = arith.constant 8 : index
    %63 = vector.load %arg13[%c0_31, %c8] : memref<50x16xf32, #tpu.memory_space<vmem>>, vector<50x8xf32>
    tpu.vector_store %arg13[%c0_31, %c8], %62 {strides = array<i32>} : memref<50x16xf32, #tpu.memory_space<vmem>>, vector<50x8xf32>,
    %c0_32 = arith.constant 0 : index
    %c0_33 = arith.constant 0 : index
    %64 = vector.load %arg13[%c0_32, %c0_33] : memref<50x16xf32, #tpu.memory_space<vmem>>, vector<2x16xf32>
    %c0_34 = arith.constant 0 : index
    %c0_35 = arith.constant 0 : index
    %65 = vector.load %arg14[%c0_34, %c0_35] : memref<2x400xf32, #tpu.memory_space<vmem>>, vector<2x16xf32>
    tpu.vector_store %arg14[%c0_34, %c0_35], %64 {strides = array<i32>} : memref<2x400xf32, #tpu.memory_space<vmem>>, vector<2x16xf32>,
    %c2_36 = arith.constant 2 : index
    %c0_37 = arith.constant 0 : index
    %66 = vector.load %arg13[%c2_36, %c0_37] : memref<50x16xf32, #tpu.memory_space<vmem>>, vector<2x16xf32>
    %c0_38 = arith.constant 0 : index
    %c16 = arith.constant 16 : index
    %67 = vector.load %arg14[%c0_38, %c16] : memref<2x400xf32, #tpu.memory_space<vmem>>, vector<2x16xf32>
    tpu.vector_store %arg14[%c0_38, %c16], %66 {strides = array<i32>} : memref<2x400xf32, #tpu.memory_space<vmem>>, vector<2x16xf32>,
    %c4 = arith.constant 4 : index
    %c0_39 = arith.constant 0 : index
    %68 = vector.load %arg13[%c4, %c0_39] : memref<50x16xf32, #tpu.memory_space<vmem>>, vector<2x16xf32>
    %c0_40 = arith.constant 0 : index
    %c32 = arith.constant 32 : index
    %69 = vector.load %arg14[%c0_40, %c32] : memref<2x400xf32, #tpu.memory_space<vmem>>, vector<2x16xf32>
    tpu.vector_store %arg14[%c0_40, %c32], %68 {strides = array<i32>} : memref<2x400xf32, #tpu.memory_space<vmem>>, vector<2x16xf32>,
    %c6 = arith.constant 6 : index
    %c0_41 = arith.constant 0 : index
    %70 = vector.load %arg13[%c6, %c0_41] : memref<50x16xf32, #tpu.memory_space<vmem>>, vector<2x16xf32>
    %c0_42 = arith.constant 0 : index
    %c48 = arith.constant 48 : index
    %71 = vector.load %arg14[%c0_42, %c48] : memref<2x400xf32, #tpu.memory_space<vmem>>, vector<2x16xf32>
    tpu.vector_store %arg14[%c0_42, %c48], %70 {strides = array<i32>} : memref<2x400xf32, #tpu.memory_space<vmem>>, vector<2x16xf32>,
    %c8_43 = arith.constant 8 : index
    %c0_44 = arith.constant 0 : index
    %72 = vector.load %arg13[%c8_43, %c0_44] : memref<50x16xf32, #tpu.memory_space<vmem>>, vector<2x16xf32>
    %c0_45 = arith.constant 0 : index
    %c64 = arith.constant 64 : index
    %73 = vector.load %arg14[%c0_45, %c64] : memref<2x400xf32, #tpu.memory_space<vmem>>, vector<2x16xf32>
    tpu.vector_store %arg14[%c0_45, %c64], %72 {strides = array<i32>} : memref<2x400xf32, #tpu.memory_space<vmem>>, vector<2x16xf32>,
    %c10 = arith.constant 10 : index
    %c0_46 = arith.constant 0 : index
    %74 = vector.load %arg13[%c10, %c0_46] : memref<50x16xf32, #tpu.memory_space<vmem>>, vector<2x16xf32>
    %c0_47 = arith.constant 0 : index
    %c80 = arith.constant 80 : index
    %75 = vector.load %arg14[%c0_47, %c80] : memref<2x400xf32, #tpu.memory_space<vmem>>, vector<2x16xf32>
    tpu.vector_store %arg14[%c0_47, %c80], %74 {strides = array<i32>} : memref<2x400xf32, #tpu.memory_space<vmem>>, vector<2x16xf32>,
    %c12 = arith.constant 12 : index
    %c0_48 = arith.constant 0 : index
    %76 = vector.load %arg13[%c12, %c0_48] : memref<50x16xf32, #tpu.memory_space<vmem>>, vector<2x16xf32>
    %c0_49 = arith.constant 0 : index
    %c96 = arith.constant 96 : index
    %77 = vector.load %arg14[%c0_49, %c96] : memref<2x400xf32, #tpu.memory_space<vmem>>, vector<2x16xf32>
    tpu.vector_store %arg14[%c0_49, %c96], %76 {strides = array<i32>} : memref<2x400xf32, #tpu.memory_space<vmem>>, vector<2x16xf32>,
    %c14 = arith.constant 14 : index
    %c0_50 = arith.constant 0 : index
    %78 = vector.load %arg13[%c14, %c0_50] : memref<50x16xf32, #tpu.memory_space<vmem>>, vector<2x16xf32>
    %c0_51 = arith.constant 0 : index
    %c112 = arith.constant 112 : index
    %79 = vector.load %arg14[%c0_51, %c112] : memref<2x400xf32, #tpu.memory_space<vmem>>, vector<2x16xf32>
    tpu.vector_store %arg14[%c0_51, %c112], %78 {strides = array<i32>} : memref<2x400xf32, #tpu.memory_space<vmem>>, vector<2x16xf32>,
    %c16_52 = arith.constant 16 : index
    %c0_53 = arith.constant 0 : index
    %80 = vector.load %arg13[%c16_52, %c0_53] : memref<50x16xf32, #tpu.memory_space<vmem>>, vector<2x16xf32>
    %c0_54 = arith.constant 0 : index
    %c128 = arith.constant 128 : index
    %81 = vector.load %arg14[%c0_54, %c128] : memref<2x400xf32, #tpu.memory_space<vmem>>, vector<2x16xf32>
    tpu.vector_store %arg14[%c0_54, %c128], %80 {strides = array<i32>} : memref<2x400xf32, #tpu.memory_space<vmem>>, vector<2x16xf32>,
    %c18 = arith.constant 18 : index
    %c0_55 = arith.constant 0 : index
    %82 = vector.load %arg13[%c18, %c0_55] : memref<50x16xf32, #tpu.memory_space<vmem>>, vector<2x16xf32>
    %c0_56 = arith.constant 0 : index
    %c144 = arith.constant 144 : index
    %83 = vector.load %arg14[%c0_56, %c144] : memref<2x400xf32, #tpu.memory_space<vmem>>, vector<2x16xf32>
    tpu.vector_store %arg14[%c0_56, %c144], %82 {strides = array<i32>} : memref<2x400xf32, #tpu.memory_space<vmem>>, vector<2x16xf32>,
    %c20 = arith.constant 20 : index
    %c0_57 = arith.constant 0 : index
    %84 = vector.load %arg13[%c20, %c0_57] : memref<50x16xf32, #tpu.memory_space<vmem>>, vector<2x16xf32>
    %c0_58 = arith.constant 0 : index
    %c160 = arith.constant 160 : index
    %85 = vector.load %arg14[%c0_58, %c160] : memref<2x400xf32, #tpu.memory_space<vmem>>, vector<2x16xf32>
    tpu.vector_store %arg14[%c0_58, %c160], %84 {strides = array<i32>} : memref<2x400xf32, #tpu.memory_space<vmem>>, vector<2x16xf32>,
    %c22 = arith.constant 22 : index
    %c0_59 = arith.constant 0 : index
    %86 = vector.load %arg13[%c22, %c0_59] : memref<50x16xf32, #tpu.memory_space<vmem>>, vector<2x16xf32>
    %c0_60 = arith.constant 0 : index
    %c176 = arith.constant 176 : index
    %87 = vector.load %arg14[%c0_60, %c176] : memref<2x400xf32, #tpu.memory_space<vmem>>, vector<2x16xf32>
    tpu.vector_store %arg14[%c0_60, %c176], %86 {strides = array<i32>} : memref<2x400xf32, #tpu.memory_space<vmem>>, vector<2x16xf32>,
    %c24 = arith.constant 24 : index
    %c0_61 = arith.constant 0 : index
    %88 = vector.load %arg13[%c24, %c0_61] : memref<50x16xf32, #tpu.memory_space<vmem>>, vector<2x16xf32>
    %c0_62 = arith.constant 0 : index
    %c192 = arith.constant 192 : index
    %89 = vector.load %arg14[%c0_62, %c192] : memref<2x400xf32, #tpu.memory_space<vmem>>, vector<2x16xf32>
    tpu.vector_store %arg14[%c0_62, %c192], %88 {strides = array<i32>} : memref<2x400xf32, #tpu.memory_space<vmem>>, vector<2x16xf32>,
    %c26 = arith.constant 26 : index
    %c0_63 = arith.constant 0 : index
    %90 = vector.load %arg13[%c26, %c0_63] : memref<50x16xf32, #tpu.memory_space<vmem>>, vector<2x16xf32>
    %c0_64 = arith.constant 0 : index
    %c208 = arith.constant 208 : index
    %91 = vector.load %arg14[%c0_64, %c208] : memref<2x400xf32, #tpu.memory_space<vmem>>, vector<2x16xf32>
    tpu.vector_store %arg14[%c0_64, %c208], %90 {strides = array<i32>} : memref<2x400xf32, #tpu.memory_space<vmem>>, vector<2x16xf32>,
    %c28 = arith.constant 28 : index
    %c0_65 = arith.constant 0 : index
    %92 = vector.load %arg13[%c28, %c0_65] : memref<50x16xf32, #tpu.memory_space<vmem>>, vector<2x16xf32>
    %c0_66 = arith.constant 0 : index
    %c224 = arith.constant 224 : index
    %93 = vector.load %arg14[%c0_66, %c224] : memref<2x400xf32, #tpu.memory_space<vmem>>, vector<2x16xf32>
    tpu.vector_store %arg14[%c0_66, %c224], %92 {strides = array<i32>} : memref<2x400xf32, #tpu.memory_space<vmem>>, vector<2x16xf32>,
    %c30 = arith.constant 30 : index
    %c0_67 = arith.constant 0 : index
    %94 = vector.load %arg13[%c30, %c0_67] : memref<50x16xf32, #tpu.memory_space<vmem>>, vector<2x16xf32>
    %c0_68 = arith.constant 0 : index
    %c240 = arith.constant 240 : index
    %95 = vector.load %arg14[%c0_68, %c240] : memref<2x400xf32, #tpu.memory_space<vmem>>, vector<2x16xf32>
    tpu.vector_store %arg14[%c0_68, %c240], %94 {strides = array<i32>} : memref<2x400xf32, #tpu.memory_space<vmem>>, vector<2x16xf32>,
    %c32_69 = arith.constant 32 : index
    %c0_70 = arith.constant 0 : index
    %96 = vector.load %arg13[%c32_69, %c0_70] : memref<50x16xf32, #tpu.memory_space<vmem>>, vector<2x16xf32>
    %c0_71 = arith.constant 0 : index
    %c256 = arith.constant 256 : index
    %97 = vector.load %arg14[%c0_71, %c256] : memref<2x400xf32, #tpu.memory_space<vmem>>, vector<2x16xf32>
    tpu.vector_store %arg14[%c0_71, %c256], %96 {strides = array<i32>} : memref<2x400xf32, #tpu.memory_space<vmem>>, vector<2x16xf32>,
    %c34 = arith.constant 34 : index
    %c0_72 = arith.constant 0 : index
    %98 = vector.load %arg13[%c34, %c0_72] : memref<50x16xf32, #tpu.memory_space<vmem>>, vector<2x16xf32>
    %c0_73 = arith.constant 0 : index
    %c272 = arith.constant 272 : index
    %99 = vector.load %arg14[%c0_73, %c272] : memref<2x400xf32, #tpu.memory_space<vmem>>, vector<2x16xf32>
    tpu.vector_store %arg14[%c0_73, %c272], %98 {strides = array<i32>} : memref<2x400xf32, #tpu.memory_space<vmem>>, vector<2x16xf32>,
    %c36 = arith.constant 36 : index
    %c0_74 = arith.constant 0 : index
    %100 = vector.load %arg13[%c36, %c0_74] : memref<50x16xf32, #tpu.memory_space<vmem>>, vector<2x16xf32>
    %c0_75 = arith.constant 0 : index
    %c288 = arith.constant 288 : index
    %101 = vector.load %arg14[%c0_75, %c288] : memref<2x400xf32, #tpu.memory_space<vmem>>, vector<2x16xf32>
    tpu.vector_store %arg14[%c0_75, %c288], %100 {strides = array<i32>} : memref<2x400xf32, #tpu.memory_space<vmem>>, vector<2x16xf32>,
    %c38 = arith.constant 38 : index
    %c0_76 = arith.constant 0 : index
    %102 = vector.load %arg13[%c38, %c0_76] : memref<50x16xf32, #tpu.memory_space<vmem>>, vector<2x16xf32>
    %c0_77 = arith.constant 0 : index
    %c304 = arith.constant 304 : index
    %103 = vector.load %arg14[%c0_77, %c304] : memref<2x400xf32, #tpu.memory_space<vmem>>, vector<2x16xf32>
    tpu.vector_store %arg14[%c0_77, %c304], %102 {strides = array<i32>} : memref<2x400xf32, #tpu.memory_space<vmem>>, vector<2x16xf32>,
    %c40 = arith.constant 40 : index
    %c0_78 = arith.constant 0 : index
    %104 = vector.load %arg13[%c40, %c0_78] : memref<50x16xf32, #tpu.memory_space<vmem>>, vector<2x16xf32>
    %c0_79 = arith.constant 0 : index
    %c320 = arith.constant 320 : index
    %105 = vector.load %arg14[%c0_79, %c320] : memref<2x400xf32, #tpu.memory_space<vmem>>, vector<2x16xf32>
    tpu.vector_store %arg14[%c0_79, %c320], %104 {strides = array<i32>} : memref<2x400xf32, #tpu.memory_space<vmem>>, vector<2x16xf32>,
    %c42 = arith.constant 42 : index
    %c0_80 = arith.constant 0 : index
    %106 = vector.load %arg13[%c42, %c0_80] : memref<50x16xf32, #tpu.memory_space<vmem>>, vector<2x16xf32>
    %c0_81 = arith.constant 0 : index
    %c336 = arith.constant 336 : index
    %107 = vector.load %arg14[%c0_81, %c336] : memref<2x400xf32, #tpu.memory_space<vmem>>, vector<2x16xf32>
    tpu.vector_store %arg14[%c0_81, %c336], %106 {strides = array<i32>} : memref<2x400xf32, #tpu.memory_space<vmem>>, vector<2x16xf32>,
    %c44 = arith.constant 44 : index
    %c0_82 = arith.constant 0 : index
    %108 = vector.load %arg13[%c44, %c0_82] : memref<50x16xf32, #tpu.memory_space<vmem>>, vector<2x16xf32>
    %c0_83 = arith.constant 0 : index
    %c352 = arith.constant 352 : index
    %109 = vector.load %arg14[%c0_83, %c352] : memref<2x400xf32, #tpu.memory_space<vmem>>, vector<2x16xf32>
    tpu.vector_store %arg14[%c0_83, %c352], %108 {strides = array<i32>} : memref<2x400xf32, #tpu.memory_space<vmem>>, vector<2x16xf32>,
    %c46 = arith.constant 46 : index
    %c0_84 = arith.constant 0 : index
    %110 = vector.load %arg13[%c46, %c0_84] : memref<50x16xf32, #tpu.memory_space<vmem>>, vector<2x16xf32>
    %c0_85 = arith.constant 0 : index
    %c368 = arith.constant 368 : index
    %111 = vector.load %arg14[%c0_85, %c368] : memref<2x400xf32, #tpu.memory_space<vmem>>, vector<2x16xf32>
    tpu.vector_store %arg14[%c0_85, %c368], %110 {strides = array<i32>} : memref<2x400xf32, #tpu.memory_space<vmem>>, vector<2x16xf32>,
    %c48_86 = arith.constant 48 : index
    %c0_87 = arith.constant 0 : index
    %112 = vector.load %arg13[%c48_86, %c0_87] : memref<50x16xf32, #tpu.memory_space<vmem>>, vector<2x16xf32>
    %c0_88 = arith.constant 0 : index
    %c384 = arith.constant 384 : index
    %113 = vector.load %arg14[%c0_88, %c384] : memref<2x400xf32, #tpu.memory_space<vmem>>, vector<2x16xf32>
    tpu.vector_store %arg14[%c0_88, %c384], %112 {strides = array<i32>} : memref<2x400xf32, #tpu.memory_space<vmem>>, vector<2x16xf32>,
    %c0_89 = arith.constant 0 : index
    %c0_90 = arith.constant 0 : index
    %114 = vector.load %arg14[%c0_89, %c0_90] : memref<2x400xf32, #tpu.memory_space<vmem>>, vector<2x400xf32>
    %115 = arith.truncf %114 : vector<2x400xf32> to vector<2x400xbf16>
    %c0_91 = arith.constant 0 : index
    %c0_92 = arith.constant 0 : index
    %116 = vector.load %arg4[%c0_91, %c0_92] : memref<400x120xbf16, #tpu.memory_space<vmem>>, vector<400x120xbf16>
    %cst_93 = arith.constant dense<0.000000e+00> : vector<2x120xf32>
    %117 = tpu.matmul %115, %116, %cst_93 {dimension_numbers = #tpu.dot_dimension_numbers<[1], [0], [0], [1], [0, 0, 1, 1], [], []>} : vector<2x400xbf16>, vector<400x120xbf16>, vector<2x120xf32> -> vector<2x120xf32>
    %c0_94 = arith.constant 0 : index
    %c0_95 = arith.constant 0 : index
    %118 = vector.load %arg5[%c0_94, %c0_95] : memref<1x120xf32, #tpu.memory_space<vmem>>, vector<1x120xf32>
    %119 = vector.broadcast %118 : vector<1x120xf32> to vector<2x120xf32>
    %120 = arith.addf %117, %119 : vector<2x120xf32>
    %121 = vector.extract_strided_slice %120 {offsets = [0, 0], sizes = [2, 60], strides = [1, 1]} : vector<2x120xf32> to vector<2x60xf32>
    %122 = vector.extract_strided_slice %120 {offsets = [0, 60], sizes = [2, 60], strides = [1, 1]} : vector<2x120xf32> to vector<2x60xf32>
    %123 = arith.maximumf %121, %122 : vector<2x60xf32>
    %124 = arith.truncf %123 : vector<2x60xf32> to vector<2x60xbf16>
    %125 = vector.extract_strided_slice %120 {offsets = [0, 0], sizes = [2, 60], strides = [1, 1]} : vector<2x120xf32> to vector<2x60xf32>
    %126 = vector.extract_strided_slice %120 {offsets = [0, 60], sizes = [2, 60], strides = [1, 1]} : vector<2x120xf32> to vector<2x60xf32>
    %127 = arith.minimumf %125, %126 : vector<2x60xf32>
    %128 = arith.truncf %127 : vector<2x60xf32> to vector<2x60xbf16>
    %c0_96 = arith.constant 0 : index
    %c0_97 = arith.constant 0 : index
    %129 = vector.load %arg6[%c0_96, %c0_97] : memref<60x84xbf16, #tpu.memory_space<vmem>>, vector<60x84xbf16>
    %cst_98 = arith.constant dense<0.000000e+00> : vector<2x84xf32>
    %130 = tpu.matmul %124, %129, %cst_98 {dimension_numbers = #tpu.dot_dimension_numbers<[1], [0], [0], [1], [0, 0, 1, 1], [], []>} : vector<2x60xbf16>, vector<60x84xbf16>, vector<2x84xf32> -> vector<2x84xf32>
    %c0_99 = arith.constant 0 : index
    %c0_100 = arith.constant 0 : index
    %131 = vector.load %arg7[%c0_99, %c0_100] : memref<60x84xbf16, #tpu.memory_space<vmem>>, vector<60x84xbf16>
    %cst_101 = arith.constant dense<0.000000e+00> : vector<2x84xf32>
    %132 = tpu.matmul %128, %131, %cst_101 {dimension_numbers = #tpu.dot_dimension_numbers<[1], [0], [0], [1], [0, 0, 1, 1], [], []>} : vector<2x60xbf16>, vector<60x84xbf16>, vector<2x84xf32> -> vector<2x84xf32>
    %133 = arith.addf %130, %132 : vector<2x84xf32>
    %c0_102 = arith.constant 0 : index
    %c0_103 = arith.constant 0 : index
    %134 = vector.load %arg8[%c0_102, %c0_103] : memref<1x84xf32, #tpu.memory_space<vmem>>, vector<1x84xf32>
    %135 = vector.broadcast %134 : vector<1x84xf32> to vector<2x84xf32>
    %136 = arith.addf %133, %135 : vector<2x84xf32>
    %137 = vector.extract_strided_slice %136 {offsets = [0, 0], sizes = [2, 42], strides = [1, 1]} : vector<2x84xf32> to vector<2x42xf32>
    %138 = vector.extract_strided_slice %136 {offsets = [0, 42], sizes = [2, 42], strides = [1, 1]} : vector<2x84xf32> to vector<2x42xf32>
    %139 = arith.maximumf %137, %138 : vector<2x42xf32>
    %140 = arith.truncf %139 : vector<2x42xf32> to vector<2x42xbf16>
    %141 = vector.extract_strided_slice %136 {offsets = [0, 0], sizes = [2, 42], strides = [1, 1]} : vector<2x84xf32> to vector<2x42xf32>
    %142 = vector.extract_strided_slice %136 {offsets = [0, 42], sizes = [2, 42], strides = [1, 1]} : vector<2x84xf32> to vector<2x42xf32>
    %143 = arith.minimumf %141, %142 : vector<2x42xf32>
    %144 = arith.truncf %143 : vector<2x42xf32> to vector<2x42xbf16>
    %c0_104 = arith.constant 0 : index
    %c0_105 = arith.constant 0 : index
    %145 = vector.load %arg9[%c0_104, %c0_105] : memref<42x10xbf16, #tpu.memory_space<vmem>>, vector<42x10xbf16>
    %cst_106 = arith.constant dense<0.000000e+00> : vector<2x10xf32>
    %146 = tpu.matmul %140, %145, %cst_106 {dimension_numbers = #tpu.dot_dimension_numbers<[1], [0], [0], [1], [0, 0, 1, 1], [], []>} : vector<2x42xbf16>, vector<42x10xbf16>, vector<2x10xf32> -> vector<2x10xf32>
    %c0_107 = arith.constant 0 : index
    %c0_108 = arith.constant 0 : index
    %147 = vector.load %arg10[%c0_107, %c0_108] : memref<42x10xbf16, #tpu.memory_space<vmem>>, vector<42x10xbf16>
    %cst_109 = arith.constant dense<0.000000e+00> : vector<2x10xf32>
    %148 = tpu.matmul %144, %147, %cst_109 {dimension_numbers = #tpu.dot_dimension_numbers<[1], [0], [0], [1], [0, 0, 1, 1], [], []>} : vector<2x42xbf16>, vector<42x10xbf16>, vector<2x10xf32> -> vector<2x10xf32>
    %149 = arith.addf %146, %148 : vector<2x10xf32>
    %c0_110 = arith.constant 0 : index
    %c0_111 = arith.constant 0 : index
    %150 = vector.load %arg11[%c0_110, %c0_111] : memref<1x10xf32, #tpu.memory_space<vmem>>, vector<1x10xf32>
    %151 = vector.broadcast %150 : vector<1x10xf32> to vector<2x10xf32>
    %152 = arith.addf %149, %151 : vector<2x10xf32>
    %cst_112 = arith.constant 1.41421354 : f32
    %153 = vector.broadcast %cst_112 : f32 to vector<2x10xf32>
    %154 = arith.mulf %152, %153 : vector<2x10xf32>
    %c0_113 = arith.constant 0 : index
    %c0_114 = arith.constant 0 : index
    %155 = vector.load %arg12[%c0_113, %c0_114] : memref<2x10xf32, #tpu.memory_space<vmem>>, vector<2x10xf32>
    tpu.vector_store %arg12[%c0_113, %c0_114], %154 {strides = array<i32>} : memref<2x10xf32, #tpu.memory_space<vmem>>, vector<2x10xf32>,
    return
  }
  func.func @transform_0(%arg0: i32) -> (i32, i32, i32) {
    %c0_i32 = arith.constant 0 : i32
    %c0_i32_0 = arith.constant 0 : i32
    %c0_i32_1 = arith.constant 0 : i32
    %c0_i32_2 = arith.constant 0 : i32
    return %c0_i32, %c0_i32_0, %c0_i32_1 : i32, i32, i32
  }
  func.func @transform_1(%arg0: i32) -> (i32, i32) {
    %c0_i32 = arith.constant 0 : i32
    %c0_i32_0 = arith.constant 0 : i32
    %c0_i32_1 = arith.constant 0 : i32
    return %c0_i32, %c0_i32_0 : i32, i32
  }
  func.func @transform_2(%arg0: i32) -> (i32, i32) {
    %c0_i32 = arith.constant 0 : i32
    %c0_i32_0 = arith.constant 0 : i32
    %c0_i32_1 = arith.constant 0 : i32
    return %c0_i32, %c0_i32_0 : i32, i32
  }
  func.func @transform_3(%arg0: i32) -> (i32, i32) {
    %c0_i32 = arith.constant 0 : i32
    %c0_i32_0 = arith.constant 0 : i32
    %c0_i32_1 = arith.constant 0 : i32
    return %c0_i32, %c0_i32_0 : i32, i32
  }
  func.func @transform_4(%arg0: i32) -> (i32, i32) {
    %c0_i32 = arith.constant 0 : i32
    %c0_i32_0 = arith.constant 0 : i32
    %c0_i32_1 = arith.constant 0 : i32
    return %c0_i32, %c0_i32_0 : i32, i32
  }
  func.func @transform_5(%arg0: i32) -> (i32, i32) {
    %c0_i32 = arith.constant 0 : i32
    %c0_i32_0 = arith.constant 0 : i32
    %c0_i32_1 = arith.constant 0 : i32
    return %c0_i32, %c0_i32_0 : i32, i32
  }
  func.func @transform_6(%arg0: i32) -> (i32, i32) {
    %c0_i32 = arith.constant 0 : i32
    %c0_i32_0 = arith.constant 0 : i32
    %c0_i32_1 = arith.constant 0 : i32
    return %c0_i32, %c0_i32_0 : i32, i32
  }
  func.func @transform_7(%arg0: i32) -> (i32, i32) {
    %c0_i32 = arith.constant 0 : i32
    %c0_i32_0 = arith.constant 0 : i32
    %c0_i32_1 = arith.constant 0 : i32
    return %c0_i32, %c0_i32_0 : i32, i32
  }
  func.func @transform_8(%arg0: i32) -> (i32, i32) {
    %c0_i32 = arith.constant 0 : i32
    %c0_i32_0 = arith.constant 0 : i32
    %c0_i32_1 = arith.constant 0 : i32
    return %c0_i32, %c0_i32_0 : i32, i32
  }
  func.func @transform_9(%arg0: i32) -> (i32, i32) {
    %c0_i32 = arith.constant 0 : i32
    %c0_i32_0 = arith.constant 0 : i32
    %c0_i32_1 = arith.constant 0 : i32
    return %c0_i32, %c0_i32_0 : i32, i32
  }
  func.func @transform_10(%arg0: i32) -> (i32, i32) {
    %c0_i32 = arith.constant 0 : i32
    %c0_i32_0 = arith.constant 0 : i32
    %c0_i32_1 = arith.constant 0 : i32
    return %c0_i32, %c0_i32_0 : i32, i32
  }
  func.func @transform_11(%arg0: i32) -> (i32, i32) {
    %c0_i32 = arith.constant 0 : i32
    %c0_i32_0 = arith.constant 0 : i32
    %c0_i32_1 = arith.constant 0 : i32
    return %c0_i32, %c0_i32_0 : i32, i32
  }
}

</mosaic_0001>

<bundles_post_ra>
// kernel: all_lenet5_forward.2
= control target key start
LH: loop header
LB: loop body
LE: loop exit
PB: predicated region body
PF: predicated region fallthrough
CT: control target
= control target key end

     0   :  { %vm282_vm0 = vcmask 1043456   ;;  %vm283_vm1 = vcmask 1044480   ;;  %v4471_v2 = vmov 65535   ;;  %vm206_vm2 = vcmask 203776   ;;  %s4472_s27 = smov 125   ;;  %s4473_s23 = smov 3   ;;  %s7517_s1 = inlined_call_operand.vmem [shape: bf16[25,6], index: 1, kind: input, shape index: {}]   ;;  %s7518_s2 = inlined_call_operand.vmem [shape: f32[1,6], index: 2, kind: input, shape index: {}]   ;;  %s7519_s0 = inlined_call_operand.vmem [shape: bf16[4,392,25], index: 0, kind: input, shape index: {}]   ;;  %s7520_s3 = inlined_call_operand.vmem [shape: bf16[392,6], index: 3, kind: output, shape index: {}]  }
   0x1   :  { %v3829_v0 = vld [vmem:[%s7517_s1 + $0x8] sm:$0xf]  ;;  %v4391_v1 = vld [vmem:[%s7517_s1 + $0x8] sm:$0x10]  ;;  %v284_v3 = vsel %vm282_vm0, 4294967295, %v4471_v2  ;;  %v4390_v7 = vld [vmem:[%s7517_s1] sm:$0xff] }
   0x2   :  { %v3830_v4 = vor.u32 %v4391_v1, %v3829_v0  ;;  %v285_v5 = vsel %vm283_vm1, %v284_v3, 0  ;;  %v4366_v8 = vld [vmem:[%s7519_s0] sm:$0xff]  ;;  %v4416_v10 = vld [vmem:[%s7519_s0 + $0x188] sm:$0xff]  ;;  %v4417_v14 = vld [vmem:[%s7519_s0 + $0x190] sm:$0xff]  ;;  %vm3329_vm3 = vcmask 19456   ;;  %vm3673_vm4 = vcmask 44056  }
   0x3   :  { %v4392_v9 = vld [vmem:[%s7519_s0 + $0xc4] sm:$0xff]  ;;  %v4440_v11 = vld [vmem:[%s7519_s0 + $0x24c] sm:$0xff]  ;;  %v4441_v15 = vld [vmem:[%s7519_s0 + $0x254] sm:$0xff] }
   0x4   :  { %v287_v6 = vand.u32 %v3830_v4, %v285_v5  ;;  %v4367_v12 = vld [vmem:[%s7519_s0 + $0x8] sm:$0xff]  ;;  %v4368_v16 = vld [vmem:[%s7519_s0 + $0x10] sm:$0xff]  ;;  %v4418_v18 = vld [vmem:[%s7519_s0 + $0x198] sm:$0xff] }
   0x5   :  { %v4393_v13 = vld [vmem:[%s7519_s0 + $0xcc] sm:$0xff]  ;;  %v4394_v17 = vld [vmem:[%s7519_s0 + $0xd4] sm:$0xff]  ;;  %v4442_v19 = vld [vmem:[%s7519_s0 + $0x25c] sm:$0xff] }
   0x6   :  { %295 = vmatpush.bf16.msra.mxu0 %v287_v6  ;;  %1019 = vmatpush.bf16.msra.mxu1 %v287_v6  ;;  %v4369_v20 = vld [vmem:[%s7519_s0 + $0x18] sm:$0xff]  ;;  %v4419_v22 = vld [vmem:[%s7519_s0 + $0x1a0] sm:$0xff]  ;;  %v4420_v26 = vld [vmem:[%s7519_s0 + $0x1a8] sm:$0xff] }
   0x7   :  { %1841 = vmatpush.bf16.msra.mxu2 %v287_v6  ;;  %2663 = vmatpush.bf16.msra.mxu3 %v287_v6  ;;  %v4395_v21 = vld [vmem:[%s7519_s0 + $0xdc] sm:$0xff]  ;;  %v4443_v23 = vld [vmem:[%s7519_s0 + $0x264] sm:$0xff]  ;;  %v4444_v27 = vld [vmem:[%s7519_s0 + $0x26c] sm:$0xff] }
   0x8   :  { %v4370_v24 = vld [vmem:[%s7519_s0 + $0x20] sm:$0xff]  ;;  %v4371_v28 = vld [vmem:[%s7519_s0 + $0x28] sm:$0xff]  ;;  %v4421_v30 = vld [vmem:[%s7519_s0 + $0x1b0] sm:$0xff] }
   0x9   :  { %v4396_v25 = vld [vmem:[%s7519_s0 + $0xe4] sm:$0xff]  ;;  %v4397_v29 = vld [vmem:[%s7519_s0 + $0xec] sm:$0xff]  ;;  %v4445_v31 = vld [vmem:[%s7519_s0 + $0x274] sm:$0xff] }
   0xa   :  { %296 = vmatpush.bf16.msra.mxu0 %v4390_v7  ;;  %1020 = vmatpush.bf16.msra.mxu1 %v4390_v7  ;;  %v4372_v32 = vld [vmem:[%s7519_s0 + $0x30] sm:$0xff]  ;;  %v4422_v33 = vld [vmem:[%s7519_s0 + $0x1b8] sm:$0xff]  ;;  %v4423_v36 = vld [vmem:[%s7519_s0 + $0x1c0] sm:$0xff] }
   0xb   :  { %1842 = vmatpush.bf16.msra.mxu2 %v4390_v7  ;;  %2664 = vmatpush.bf16.msra.mxu3 %v4390_v7  ;;  %v4446_v34 = vld [vmem:[%s7519_s0 + $0x27c] sm:$0xff]  ;;  %v4398_v35 = vld [vmem:[%s7519_s0 + $0xf4] sm:$0xff]  ;;  %v4447_v39 = vld [vmem:[%s7519_s0 + $0x284] sm:$0xff] }
   0xc   :  { %v4373_v37 = vld [vmem:[%s7519_s0 + $0x38] sm:$0xff]  ;;  %v4634_v40 = vld [vmem:[%s7518_s2] ss:$0 sm:$0xff]  ;;  %v4424_v47 = vld [vmem:[%s7519_s0 + $0x1c8] sm:$0xff] }
   0xd   :  { %3831 = vmatmul.msk.bf16.vlgmr.msra.gmra.mxu0 %vm206_vm2, %v4366_v8  ;;  %4001 = vmatmul.msk.bf16.vlgmr.msra.gmra.mxu1 %vm206_vm2, %v4392_v9  ;;  %v4399_v38 = vld [vmem:[%s7519_s0 + $0xfc] sm:$0xff]  ;;  %v4400_v57 = vld [vmem:[%s7519_s0 + $0x104] sm:$0xff]  ;;  %v4448_v2 = vld [vmem:[%s7519_s0 + $0x28c] sm:$0xff] }
   0xe   :  { %4171 = vmatmul.msk.bf16.vlgmr.msra.gmra.mxu2 %vm206_vm2, %v4416_v10  ;;  %4341 = vmatmul.msk.bf16.vlgmr.msra.gmra.mxu3 %vm206_vm2, %v4440_v11  ;;  %v4374_v48 = vld [vmem:[%s7519_s0 + $0x40] sm:$0xff] }
  0x1d   :  { %3832 = vmatmul.msk.bf16.gmra.mxu0 %vm206_vm2, %v4367_v12  ;;  %4002 = vmatmul.msk.bf16.gmra.mxu1 %vm206_vm2, %v4393_v13 }
  0x1e   :  { %4172 = vmatmul.msk.bf16.gmra.mxu2 %vm206_vm2, %v4417_v14  ;;  %4342 = vmatmul.msk.bf16.gmra.mxu3 %vm206_vm2, %v4441_v15 }
  0x2d   :  { %3833 = vmatmul.msk.bf16.gmra.mxu0 %vm206_vm2, %v4368_v16  ;;  %4003 = vmatmul.msk.bf16.gmra.mxu1 %vm206_vm2, %v4394_v17  ;;  %v4375_v16 = vld [vmem:[%s7519_s0 + $0x48] sm:$0xff] }
  0x2e   :  { %4173 = vmatmul.msk.bf16.gmra.mxu2 %vm206_vm2, %v4418_v18  ;;  %4343 = vmatmul.msk.bf16.gmra.mxu3 %vm206_vm2, %v4442_v19 }
  0x3d   :  { %3834 = vmatmul.msk.bf16.gmra.mxu0 %vm206_vm2, %v4369_v20  ;;  %4004 = vmatmul.msk.bf16.gmra.mxu1 %vm206_vm2, %v4395_v21 }
  0x3e   :  { %4174 = vmatmul.msk.bf16.gmra.mxu2 %vm206_vm2, %v4419_v22  ;;  %4344 = vmatmul.msk.bf16.gmra.mxu3 %vm206_vm2, %v4443_v23 }
  0x4d   :  { %3835 = vmatmul.msk.bf16.gmra.mxu0 %vm206_vm2, %v4370_v24  ;;  %4005 = vmatmul.msk.bf16.gmra.mxu1 %vm206_vm2, %v4396_v25 }
  0x4e   :  { %4175 = vmatmul.msk.bf16.gmra.mxu2 %vm206_vm2, %v4420_v26  ;;  %4345 = vmatmul.msk.bf16.gmra.mxu3 %vm206_vm2, %v4444_v27  ;;  %v4425_v26 = vld [vmem:[%s7519_s0 + $0x1d0] sm:$0xff] }
  0x4f   :  { %v4449_v27 = vld [vmem:[%s7519_s0 + $0x294] sm:$0xff] }
  0x5d   :  { %3836 = vmatmul.msk.bf16.gmra.mxu0 %vm206_vm2, %v4371_v28  ;;  %4006 = vmatmul.msk.bf16.gmra.mxu1 %vm206_vm2, %v4397_v29  ;;  %v4401_v28 = vld [vmem:[%s7519_s0 + $0x10c] sm:$0xff] }
  0x5e   :  { %4176 = vmatmul.msk.bf16.gmra.mxu2 %vm206_vm2, %v4421_v30  ;;  %4346 = vmatmul.msk.bf16.gmra.mxu3 %vm206_vm2, %v4445_v31 }
  0x6d   :  { %3837 = vmatmul.msk.bf16.gmra.mxu0 %vm206_vm2, %v4372_v32  ;;  %4007 = vmatmul.msk.bf16.gmra.mxu1 %vm206_vm2, %v4398_v35 }
  0x6e   :  { %4177 = vmatmul.msk.bf16.gmra.mxu2 %vm206_vm2, %v4422_v33  ;;  %4347 = vmatmul.msk.bf16.gmra.mxu3 %vm206_vm2, %v4446_v34 }
  0x7d   :  { %3838 = vmatmul.msk.bf16.gmra.mxu0 %vm206_vm2, %v4373_v37  ;;  %4008 = vmatmul.msk.bf16.gmra.mxu1 %vm206_vm2, %v4399_v38 }
  0x7e   :  { %4178 = vmatmul.msk.bf16.gmra.mxu2 %vm206_vm2, %v4423_v36  ;;  %4348 = vmatmul.msk.bf16.gmra.mxu3 %vm206_vm2, %v4447_v39 }
  0x8a   :  { %v298_v41 = vpop.f32.mrf.mxu0  ;;  %v1022_v42 = vpop.f32.mrf.mxu1 }
  0x8b   :  { %v299_v43 = vadd.f32 %v4634_v40, %v298_v41  ;;  %v1023_v44 = vadd.f32 %v4634_v40, %v1022_v42 }
  0x8d   :  { %v4638_v45 = vmul.f32 1.4142135, %v299_v43  ;;  %v4640_v46 = vmul.f32 1.4142135, %v1023_v44  ;;  %3839 = vmatmul.msk.bf16.gmra.mxu0 %vm206_vm2, %v4374_v48  ;;  %4009 = vmatmul.msk.bf16.gmra.mxu1 %vm206_vm2, %v4400_v57 }
  0x8e   :  { %4179 = vmatmul.msk.bf16.gmra.mxu2 %vm206_vm2, %v4424_v47  ;;  %4349 = vmatmul.msk.bf16.gmra.mxu3 %vm206_vm2, %v4448_v2 }
  0x8f   :  { %1244 = vrot.lane.b32.xlu1 %v4640_v46, %s4472_s27  ;;  %520 = vrot.lane.b32.xlu0 %v4638_v45, %s4472_s27 }
  0x91   :  { %v1844_v49 = vpop.f32.mrf.mxu2  ;;  %v2666_v50 = vpop.f32.mrf.mxu3 }
  0x92   :  { %v1845_v51 = vadd.f32 %v4634_v40, %v1844_v49  ;;  %v2667_v52 = vadd.f32 %v4634_v40, %v2666_v50  ;;  %v300_v53 = vpop.f32.mrf.mxu0  ;;  %v1024_v56 = vpop.f32.mrf.mxu1  ;;  %v4426_v49 = vld [vmem:[%s7519_s0 + $0x1d8] sm:$0xff] }
  0x93   :  { %v1025_v58 = vadd.f32 %v4634_v40, %v1024_v56  ;;  %v301_v59 = vadd.f32 %v4634_v40, %v300_v53 }
  0x94   :  { %v4656_v54 = vmul.f32 1.4142135, %v1845_v51  ;;  %v4658_v55 = vmul.f32 1.4142135, %v2667_v52 }
  0x95   :  { %v4671_v0 = vmul.f32 1.4142135, %v1025_v58  ;;  %v4678_v3 = vmul.f32 1.4142135, %v301_v59 }
  0x96   :  { %2066 = vrot.lane.b32.xlu2 %v4656_v54, %s4472_s27 }
  0x97   :  { %2888 = vrot.lane.b32.xlu0 %v4658_v55, %s4472_s27 }
  0x99   :  { %v1846_v60 = vpop.f32.mrf.mxu2  ;;  %v2668_v61 = vpop.f32.mrf.mxu3 }
  0x9a   :  { %v2669_v62 = vadd.f32 %v4634_v40, %v2668_v61  ;;  %v303_v63 = vpop.f32.mrf.mxu0  ;;  %v1027_v5 = vpop.f32.mrf.mxu1  ;;  %v1847_v6 = vadd.f32 %v4634_v40, %v1846_v60  ;;  %v4376_v61 = vld [vmem:[%s7519_s0 + $0x50] sm:$0xff] }
  0x9b   :  { %v304_v4 = vadd.f32 %v4634_v40, %v303_v63  ;;  %v1028_v15 = vadd.f32 %v4634_v40, %v1027_v5  ;;  %v4450_v63 = vld [vmem:[%s7519_s0 + $0x29c] sm:$0xff] }
  0x9c   :  { %v4673_v1 = vmul.f32 1.4142135, %v2669_v62  ;;  %v4694_v13 = vmul.f32 1.4142135, %v1847_v6  ;;  %v4402_v62 = vld [vmem:[%s7519_s0 + $0x114] sm:$0xff] }
  0x9d   :  { %v4689_v9 = vmul.f32 1.4142135, %v304_v4  ;;  %3840 = vmatmul.msk.bf16.gmra.mxu0 %vm206_vm2, %v4375_v16  ;;  %v4711_v21 = vmul.f32 1.4142135, %v1028_v15  ;;  %4010 = vmatmul.msk.bf16.gmra.mxu1 %vm206_vm2, %v4401_v28 }
  0x9e   :  { %1246 = vrot.lane.b32.xlu2 %v4671_v0, %s4472_s27  ;;  %2890 = vrot.lane.b32.xlu1 %v4673_v1, %s4472_s27 }
  0x9f   :  { %522 = vrot.lane.b32.xlu0 %v4678_v3, %s4472_s27  ;;  %4180 = vmatmul.msk.bf16.gmra.mxu2 %vm206_vm2, %v4425_v26 }
  0xa0   :  { %4350 = vmatmul.msk.bf16.gmra.mxu3 %vm206_vm2, %v4449_v27 }
  0xa1   :  { %v1849_v7 = vpop.f32.mrf.mxu2  ;;  %v2671_v8 = vpop.f32.mrf.mxu3 }
  0xa2   :  { %v2672_v10 = vadd.f32 %v4634_v40, %v2671_v8  ;;  %v305_v11 = vpop.f32.mrf.mxu0  ;;  %v1850_v14 = vadd.f32 %v4634_v40, %v1849_v7  ;;  %v1029_v20 = vpop.f32.mrf.mxu1 }
  0xa3   :  { %v306_v29 = vadd.f32 %v4634_v40, %v305_v11  ;;  %v1030_v38 = vadd.f32 %v4634_v40, %v1029_v20 }
  0xa4   :  { %v4692_v12 = vmul.f32 1.4142135, %v2672_v10  ;;  %v4708_v18 = vmul.f32 1.4142135, %v1850_v14 }
  0xa5   :  { %v4738_v32 = vmul.f32 1.4142135, %v306_v29  ;;  %v4755_v43 = vmul.f32 1.4142135, %v1030_v38  ;;  %v4427_v29 = vld [vmem:[%s7519_s0 + $0x1e0] sm:$0xff] }
  0xa6   :  { %2892 = vrot.lane.b32.xlu2 %v4692_v12, %s4472_s27  ;;  %524 = vrot.lane.b32.xlu1 %v4689_v9, %s4472_s27 }
  0xa7   :  { %2068 = vrot.lane.b32.xlu0 %v4694_v13, %s4472_s27  ;;  %7805 = vst [vmem:[#allocation4_spill] sm:$0xff] %v4738_v32 }
  0xa8   :  { %7809 = vst [vmem:[#allocation8_spill] sm:$0xff] %v4755_v43 }
  0xa9   :  { %v1851_v17 = vpop.f32.mrf.mxu2  ;;  %v2673_v24 = vpop.f32.mrf.mxu3 }
  0xaa   :  { %v1852_v19 = vadd.f32 %v4634_v40, %v1851_v17  ;;  %v308_v22 = vpop.f32.mrf.mxu0  ;;  %v2674_v30 = vadd.f32 %v4634_v40, %v2673_v24  ;;  %v1032_v33 = vpop.f32.mrf.mxu1 }
  0xab   :  { %v309_v25 = vadd.f32 %v4634_v40, %v308_v22  ;;  %v1033_v35 = vadd.f32 %v4634_v40, %v1032_v33  ;;  %v4451_v33 = vld [vmem:[%s7519_s0 + $0x2a4] sm:$0xff] }
  0xac   :  { %v4713_v23 = vmul.f32 1.4142135, %v1852_v19  ;;  %v4740_v34 = vmul.f32 1.4142135, %v2674_v30  ;;  %v4377_v30 = vld [vmem:[%s7519_s0 + $0x58] sm:$0xff] }
  0xad   :  { %v4735_v31 = vmul.f32 1.4142135, %v309_v25  ;;  %v4751_v39 = vmul.f32 1.4142135, %v1033_v35  ;;  %3841 = vmatmul.msk.bf16.gmra.mxu0 %vm206_vm2, %v4376_v61  ;;  %4011 = vmatmul.msk.bf16.gmra.mxu1 %vm206_vm2, %v4402_v62 }
  0xae   :  { %7803 = vst [vmem:[#allocation2_spill] sm:$0xff] %v4713_v23  ;;  %2072 = vrot.lane.b32.xlu2 %v4713_v23, %s4472_s27  ;;  %2070 = vrot.lane.b32.xlu1 %v4708_v18, %s4472_s27 }
  0xaf   :  { %1248 = vrot.lane.b32.xlu0 %v4711_v21, %s4472_s27  ;;  %7804 = vst [vmem:[#allocation3_spill] sm:$0xff] %v4735_v31  ;;  %4181 = vmatmul.msk.bf16.gmra.mxu2 %vm206_vm2, %v4426_v49  ;;  %v4403_v49 = vld [vmem:[%s7519_s0 + $0x11c] sm:$0xff] }
  0xb0   :  { %7806 = vst [vmem:[#allocation5_spill] sm:$0xff] %v4740_v34  ;;  %4351 = vmatmul.msk.bf16.gmra.mxu3 %vm206_vm2, %v4450_v63 }
  0xb1   :  { %v1854_v36 = vpop.f32.mrf.mxu2  ;;  %7807 = vst [vmem:[#allocation6_spill] sm:$0xff] %v4751_v39  ;;  %v2676_v42 = vpop.f32.mrf.mxu3 }
  0xb2   :  { %v1855_v37 = vadd.f32 %v4634_v40, %v1854_v36  ;;  %v310_v44 = vpop.f32.mrf.mxu0  ;;  %v2677_v47 = vadd.f32 %v4634_v40, %v2676_v42  ;;  %v1034_v48 = vpop.f32.mrf.mxu1 }
  0xb3   :  { %v311_v50 = vadd.f32 %v4634_v40, %v310_v44  ;;  %v1035_v51 = vadd.f32 %v4634_v40, %v1034_v48 }
  0xb4   :  { %v4753_v41 = vmul.f32 1.4142135, %v1855_v37  ;;  %v4770_v52 = vmul.f32 1.4142135, %v2677_v47 }
  0xb5   :  { %v4772_v53 = vmul.f32 1.4142135, %v311_v50  ;;  %v4774_v57 = vmul.f32 1.4142135, %v1035_v51 }
  0xb6   :  { %528 = vrot.lane.b32.xlu2 %v4735_v31, %s4472_s27  ;;  %526 = vrot.lane.b32.xlu1 %v4738_v32, %s4472_s27  ;;  %7808 = vst [vmem:[#allocation7_spill] sm:$0xff] %v4753_v41 }
  0xb7   :  { %2894 = vrot.lane.b32.xlu0 %v4740_v34, %s4472_s27  ;;  %7810 = vst [vmem:[#allocation9_spill] sm:$0xff] %v4770_v52 }
  0xb8   :  { %7811 = vst [vmem:[#allocation10_spill] sm:$0xff] %v4772_v53 }
  0xb9   :  { %v1856_v56 = vpop.f32.mrf.mxu2  ;;  %7812 = vst [vmem:[#allocation11_spill] sm:$0xff] %v4774_v57  ;;  %v2678_v58 = vpop.f32.mrf.mxu3 }
  0xba   :  { %v313_v59 = vpop.f32.mrf.mxu0  ;;  %v1857_v2 = vadd.f32 %v4634_v40, %v1856_v56  ;;  %v2679_v4 = vadd.f32 %v4634_v40, %v2678_v58  ;;  %v1037_v6 = vpop.f32.mrf.mxu1 }
  0xbb   :  { %v314_v60 = vadd.f32 %v4634_v40, %v313_v59  ;;  %v1038_v11 = vadd.f32 %v4634_v40, %v1037_v6 }
  0xbc   :  { %v4799_v7 = vmul.f32 1.4142135, %v1857_v2  ;;  %v4801_v8 = vmul.f32 1.4142135, %v2679_v4 }
  0xbd   :  { %v4797_v5 = vmul.f32 1.4142135, %v314_v60  ;;  %v4812_v17 = vmul.f32 1.4142135, %v1038_v11  ;;  %3842 = vmatmul.msk.bf16.gmra.mxu0 %vm206_vm2, %v4377_v30  ;;  %4012 = vmatmul.msk.bf16.gmra.mxu1 %vm206_vm2, %v4403_v49 }
  0xbe   :  { %1252 = vrot.lane.b32.xlu2 %v4751_v39, %s4472_s27  ;;  %1250 = vrot.lane.b32.xlu1 %v4755_v43, %s4472_s27  ;;  %7814 = vst [vmem:[#allocation13_spill] sm:$0xff] %v4799_v7 }
  0xbf   :  { %2074 = vrot.lane.b32.xlu0 %v4753_v41, %s4472_s27  ;;  %7813 = vst [vmem:[#allocation12_spill] sm:$0xff] %v4797_v5  ;;  %4182 = vmatmul.msk.bf16.gmra.mxu2 %vm206_vm2, %v4427_v29  ;;  %v4404_v29 = vld [vmem:[%s7519_s0 + $0x124] sm:$0xff] }
  0xc0   :  { %7815 = vst [vmem:[#allocation14_spill] sm:$0xff] %v4801_v8  ;;  %4352 = vmatmul.msk.bf16.gmra.mxu3 %vm206_vm2, %v4451_v33 }
  0xc1   :  { %v1859_v10 = vpop.f32.mrf.mxu2  ;;  %v2681_v15 = vpop.f32.mrf.mxu3  ;;  %7816 = vst [vmem:[#allocation15_spill] sm:$0xff] %v4812_v17 }
  0xc2   :  { %v1860_v14 = vadd.f32 %v4634_v40, %v1859_v10  ;;  %v2682_v16 = vadd.f32 %v4634_v40, %v2681_v15  ;;  %v315_v22 = vpop.f32.mrf.mxu0  ;;  %v1039_v24 = vpop.f32.mrf.mxu1 }
  0xc3   :  { %v316_v26 = vadd.f32 %v4634_v40, %v315_v22  ;;  %v1040_v27 = vadd.f32 %v4634_v40, %v1039_v24 }
  0xc4   :  { %v4814_v19 = vmul.f32 1.4142135, %v1860_v14  ;;  %v4816_v20 = vmul.f32 1.4142135, %v2682_v16  ;;  %v4378_v16 = vld [vmem:[%s7519_s0 + $0x60] sm:$0xff] }
  0xc5   :  { %v4838_v35 = vmul.f32 1.4142135, %v316_v26  ;;  %v4840_v36 = vmul.f32 1.4142135, %v1040_v27  ;;  %v4428_v27 = vld [vmem:[%s7519_s0 + $0x1e8] sm:$0xff] }
  0xc6   :  { %530 = vrot.lane.b32.xlu2 %v4772_v53, %s4472_s27  ;;  %2896 = vrot.lane.b32.xlu1 %v4770_v52, %s4472_s27  ;;  %7817 = vst [vmem:[#allocation16_spill] sm:$0xff] %v4814_v19 }
  0xc7   :  { %1254 = vrot.lane.b32.xlu0 %v4774_v57, %s4472_s27  ;;  %7818 = vst [vmem:[#allocation17_spill] sm:$0xff] %v4816_v20 }
  0xc8   :  { %7819 = vst [vmem:[#allocation18_spill] sm:$0xff] %v4838_v35 }
  0xc9   :  { %v1861_v25 = vpop.f32.mrf.mxu2  ;;  %7820 = vst [vmem:[#allocation19_spill] sm:$0xff] %v4840_v36  ;;  %v2683_v37 = vpop.f32.mrf.mxu3 }
  0xca   :  { %v1862_v28 = vadd.f32 %v4634_v40, %v1861_v25  ;;  %v318_v38 = vpop.f32.mrf.mxu0  ;;  %v1042_v47 = vpop.f32.mrf.mxu1  ;;  %v2684_v50 = vadd.f32 %v4634_v40, %v2683_v37 }
  0xcb   :  { %v319_v44 = vadd.f32 %v4634_v40, %v318_v38  ;;  %v1043_v48 = vadd.f32 %v4634_v40, %v1042_v47 }
  0xcc   :  { %v4843_v42 = vmul.f32 1.4142135, %v1862_v28  ;;  %v4862_v59 = vmul.f32 1.4142135, %v2684_v50  ;;  %v4452_v28 = vld [vmem:[%s7519_s0 + $0x2ac] sm:$0xff] }
  0xcd   :  { %v4858_v51 = vmul.f32 1.4142135, %v319_v44  ;;  %v4860_v56 = vmul.f32 1.4142135, %v1043_v48  ;;  %3843 = vmatmul.msk.bf16.gmra.mxu0 %vm206_vm2, %v4378_v16  ;;  %4013 = vmatmul.msk.bf16.gmra.mxu1 %vm206_vm2, %v4404_v29 }
  0xce   :  { %2898 = vrot.lane.b32.xlu2 %v4801_v8, %s4472_s27  ;;  %2076 = vrot.lane.b32.xlu1 %v4799_v7, %s4472_s27  ;;  %7821 = vst [vmem:[#allocation20_spill] sm:$0xff] %v4843_v42 }
  0xcf   :  { %532 = vrot.lane.b32.xlu0 %v4797_v5, %s4472_s27  ;;  %7822 = vst [vmem:[#allocation21_spill] sm:$0xff] %v4858_v51  ;;  %4183 = vmatmul.msk.bf16.gmra.mxu2 %vm206_vm2, %v4428_v27 }
  0xd0   :  { %7823 = vst [vmem:[#allocation22_spill] sm:$0xff] %v4860_v56  ;;  %4353 = vmatmul.msk.bf16.gmra.mxu3 %vm206_vm2, %v4452_v28 }
  0xd1   :  { %v1864_v58 = vpop.f32.mrf.mxu2  ;;  %7824 = vst [vmem:[#allocation23_spill] sm:$0xff] %v4862_v59  ;;  %v2686_v60 = vpop.f32.mrf.mxu3 }
  0xd2   :  { %v1865_v61 = vadd.f32 %v4634_v40, %v1864_v58  ;;  %v320_v62 = vpop.f32.mrf.mxu0  ;;  %v2687_v63 = vadd.f32 %v4634_v40, %v2686_v60  ;;  %v1044_v10 = vpop.f32.mrf.mxu1 }
  0xd3   :  { %v321_v2 = vadd.f32 %v4634_v40, %v320_v62  ;;  %v1045_v22 = vadd.f32 %v4634_v40, %v1044_v10 }
  0xd4   :  { %v4873_v4 = vmul.f32 1.4142135, %v1865_v61  ;;  %v4875_v6 = vmul.f32 1.4142135, %v2687_v63 }
  0xd5   :  { %v4877_v11 = vmul.f32 1.4142135, %v321_v2  ;;  %v4905_v33 = vmul.f32 1.4142135, %v1045_v22 }
  0xd6   :  { %2078 = vrot.lane.b32.xlu2 %v4814_v19, %s4472_s27  ;;  %1256 = vrot.lane.b32.xlu1 %v4812_v17, %s4472_s27  ;;  %7825 = vst [vmem:[#allocation24_spill] sm:$0xff] %v4873_v4 }
  0xd7   :  { %2900 = vrot.lane.b32.xlu0 %v4816_v20, %s4472_s27  ;;  %7826 = vst [vmem:[#allocation25_spill] sm:$0xff] %v4875_v6 }
  0xd8   :  { %7827 = vst [vmem:[#allocation26_spill] sm:$0xff] %v4877_v11 }
  0xd9   :  { %v1866_v14 = vpop.f32.mrf.mxu2  ;;  %v2688_v15 = vpop.f32.mrf.mxu3  ;;  %7828 = vst [vmem:[#allocation27_spill] sm:$0xff] %v4905_v33 }
  0xda   :  { %v1867_v24 = vadd.f32 %v4634_v40, %v1866_v14  ;;  %v2689_v26 = vadd.f32 %v4634_v40, %v2688_v15  ;;  %v323_v30 = vpop.f32.mrf.mxu0  ;;  %v1047_v38 = vpop.f32.mrf.mxu1 }
  0xdb   :  { %v324_v47 = vadd.f32 %v4634_v40, %v323_v30  ;;  %v1048_v48 = vadd.f32 %v4634_v40, %v1047_v38 }
  0xdc   :  { %v4907_v37 = vmul.f32 1.4142135, %v1867_v24  ;;  %v4910_v44 = vmul.f32 1.4142135, %v2689_v26 }
  0xdd   :  { %v4923_v60 = vmul.f32 1.4142135, %v324_v47  ;;  %v4925_v61 = vmul.f32 1.4142135, %v1048_v48  ;;  %v4429_v47 = vld [vmem:[%s7519_s0 + $0x1f0] sm:$0xff] }
  0xde   :  { %1258 = vrot.lane.b32.xlu2 %v4840_v36, %s4472_s27  ;;  %534 = vrot.lane.b32.xlu1 %v4838_v35, %s4472_s27  ;;  %7829 = vst [vmem:[#allocation28_spill] sm:$0xff] %v4907_v37 }
  0xdf   :  { %2080 = vrot.lane.b32.xlu0 %v4843_v42, %s4472_s27  ;;  %7830 = vst [vmem:[#allocation29_spill] sm:$0xff] %v4910_v44  ;;  %4184 = vmatmul.msk.bf16.gmra.mxu2 %vm206_vm2, %v4429_v47  ;;  %v4453_v47 = vld [vmem:[%s7519_s0 + $0x2b4] sm:$0xff] }
  0xe0   :  { %7831 = vst [vmem:[#allocation30_spill] sm:$0xff] %v4923_v60  ;;  %4354 = vmatmul.msk.bf16.gmra.mxu3 %vm206_vm2, %v4453_v47 }
  0xe1   :  { %v1869_v49 = vpop.f32.mrf.mxu2  ;;  %7832 = vst [vmem:[#allocation31_spill] sm:$0xff] %v4925_v61  ;;  %v2691_v63 = vpop.f32.mrf.mxu3 }
  0xe2   :  { %v1870_v50 = vadd.f32 %v4634_v40, %v1869_v49  ;;  %v325_v2 = vpop.f32.mrf.mxu0  ;;  %v2692_v10 = vadd.f32 %v4634_v40, %v2691_v63  ;;  %v1049_v14 = vpop.f32.mrf.mxu1 }
  0xe3   :  { %v326_v15 = vadd.f32 %v4634_v40, %v325_v2  ;;  %v1050_v22 = vadd.f32 %v4634_v40, %v1049_v14  ;;  %v4405_v14 = vld [vmem:[%s7519_s0 + $0x12c] sm:$0xff] }
  0xe4   :  { %v4927_v62 = vmul.f32 1.4142135, %v1870_v50  ;;  %v4944_v27 = vmul.f32 1.4142135, %v2692_v10  ;;  %v4379_v10 = vld [vmem:[%s7519_s0 + $0x68] sm:$0xff]  ;;  %4014 = vmatmul.msk.bf16.gmra.mxu1 %vm206_vm2, %v4405_v14 }
  0xe5   :  { %v4950_v30 = vmul.f32 1.4142135, %v326_v15  ;;  %v4955_v48 = vmul.f32 1.4142135, %v1050_v22  ;;  %3844 = vmatmul.msk.bf16.gmra.mxu0 %vm206_vm2, %v4379_v10 }
  0xe6   :  { %536 = vrot.lane.b32.xlu2 %v4858_v51, %s4472_s27  ;;  %2902 = vrot.lane.b32.xlu1 %v4862_v59, %s4472_s27  ;;  %7833 = vst [vmem:[#allocation32_spill] sm:$0xff] %v4927_v62 }
  0xe7   :  { %1260 = vrot.lane.b32.xlu0 %v4860_v56, %s4472_s27  ;;  %7834 = vst [vmem:[#allocation33_spill] sm:$0xff] %v4944_v27 }
  0xe8   :  { %7835 = vst [vmem:[#allocation34_spill] sm:$0xff] %v4950_v30 }
  0xe9   :  { %v1871_v38 = vpop.f32.mrf.mxu2  ;;  %7836 = vst [vmem:[#allocation35_spill] sm:$0xff] %v4955_v48  ;;  %v2693_v49 = vpop.f32.mrf.mxu3 }
  0xea   :  { %v328_v63 = vpop.f32.mrf.mxu0  ;;  %v1872_v22 = vadd.f32 %v4634_v40, %v1871_v38  ;;  %v1052_v38 = vpop.f32.mrf.mxu1 }
  0xeb   :  { %v329_v2 = vadd.f32 %v4634_v40, %v328_v63  ;;  %v1053_v14 = vadd.f32 %v4634_v40, %v1052_v38 }
  0xee   :  { %2904 = vrot.lane.b32.xlu2 %v4875_v6, %s4472_s27  ;;  %2082 = vrot.lane.b32.xlu1 %v4873_v4, %s4472_s27  ;;  %v4454_v6 = vld [vmem:[%s7519_s0 + $0x2bc] sm:$0xff] }
  0xef   :  { %538 = vrot.lane.b32.xlu0 %v4877_v11, %s4472_s27 }
  0xf0   :  { %v4890_v25 = vpop.permute.xlu2 %2066  ;;  %4355 = vmatmul.msk.bf16.gmra.mxu3 %vm206_vm2, %v4454_v6 }
  0xf1   :  { %v2213_v15 = vmax.f32 %v4656_v54, %v4890_v25 }
  0xf2   :  { %v330_v38 = vpop.f32.mrf.mxu0 }
  0xf6   :  { %2084 = vrot.lane.b32.xlu2 %v4907_v37, %s4472_s27  ;;  %1262 = vrot.lane.b32.xlu1 %v4905_v33, %s4472_s27 }
  0xf7   :  { %2906 = vrot.lane.b32.xlu0 %v4910_v44, %s4472_s27 }
  0xf8   :  { %v4921_v58 = vpop.permute.xlu2 %1246 }
  0xfe   :  { %1264 = vrot.lane.b32.xlu2 %v4925_v61, %s4472_s27  ;;  %540 = vrot.lane.b32.xlu1 %v4923_v60, %s4472_s27  ;;  %v1874_v61 = vpop.f32.mrf.mxu2 }
  0xff   :  { %2086 = vrot.lane.b32.xlu0 %v4927_v62, %s4472_s27  ;;  %v1875_v44 = vadd.f32 %v4634_v40, %v1874_v61  ;;  %v5008_v61 = vmul.f32 1.4142135, %v1053_v14  ;;  %v331_v14 = vadd.f32 %v4634_v40, %v330_v38  ;;  %v4380_v38 = vld [vmem:[%s7519_s0 + $0x70] sm:$0xff] }
 0x100   :  { %v4937_v16 = vpop.permute.xlu2 %2892  ;;  %3845 = vmatmul.msk.bf16.gmra.mxu0 %vm206_vm2, %v4380_v38 }
 0x101   :  { %v4940_v24 = vpop.permute.xlu1 %1244  ;;  %v4942_v26 = vpop.permute.xlu0 %520  ;;  %7842 = vst [vmem:[#allocation41_spill] sm:$0xff] %v5008_v61 }
 0x102   :  { %v1391_v28 = vmax.f32 %v4640_v46, %v4940_v24  ;;  %v667_v29 = vmax.f32 %v4638_v45, %v4942_v26 }
 0x104   :  { %v1489_v50 = vadd.f32 %v1391_v28, %v667_v29  ;;  %v2694_v28 = vadd.f32 %v4634_v40, %v2693_v49  ;;  %v4989_v49 = vmul.f32 1.4142135, %v1872_v22 }
 0x106   :  { %542 = vrot.lane.b32.xlu2 %v4950_v30, %s4472_s27  ;;  %2908 = vrot.lane.b32.xlu1 %v4944_v27, %s4472_s27  ;;  %v2311_v30 = vadd.f32 %v2213_v15, %v1489_v50  ;;  %v4986_v27 = vmul.f32 1.4142135, %v329_v2  ;;  %7839 = vst [vmem:[#allocation38_spill] sm:$0xff] %v4989_v49  ;;  %v4991_v62 = vmul.f32 1.4142135, %v2694_v28  ;;  %v2696_v50 = vpop.f32.mrf.mxu3 }
 0x107   :  { %1266 = vrot.lane.b32.xlu0 %v4955_v48, %s4472_s27  ;;  %v2697_v2 = vadd.f32 %v4634_v40, %v2696_v50  ;;  %v5010_v28 = vmul.f32 1.4142135, %v1875_v44  ;;  %v1876_v50 = vpop.f32.mrf.mxu2  ;;  %v1392_v44 = vmax.f32 %v4671_v0, %v4921_v58 }
 0x108   :  { %v4975_v29 = vpop.permute.xlu2 %2072  ;;  %7838 = vst [vmem:[#allocation37_spill] sm:$0xff] %v4986_v27 }
 0x109   :  { %7837 = vst [vmem:[#allocation36_spill] sm:$0xff] %v4975_v29  ;;  %v4977_v63 = vpop.permute.xlu0 %2888  ;;  %v5016_v47 = vmul.f32 1.4142135, %v2697_v2 }
 0x10a   :  { %v3035_v48 = vmax.f32 %v4658_v55, %v4977_v63  ;;  %7840 = vst [vmem:[#allocation39_spill] sm:$0xff] %v4991_v62 }
 0x10b   :  { %7843 = vst [vmem:[#allocation42_spill] sm:$0xff] %v5010_v28 }
 0x10c   :  { %v3133_v10 = vadd.f32 %v3035_v48, %v2311_v30  ;;  %7844 = vst [vmem:[#allocation43_spill] sm:$0xff] %v5016_v47 }
 0x10e   :  { %v3231_v60 = vmul.f32 0.25, %v3133_v10  ;;  %2910 = vrot.lane.b32.xlu2 %v4991_v62, %s4472_s27  ;;  %2088 = vrot.lane.b32.xlu1 %v4989_v49, %s4472_s27  ;;  %v1054_v10 = vpop.f32.mrf.mxu1  ;;  %v1877_v62 = vadd.f32 %v4634_v40, %v1876_v50  ;;  %v2698_v33 = vpop.f32.mrf.mxu3 }
 0x10f   :  { %544 = vrot.lane.b32.xlu0 %v4986_v27, %s4472_s27  ;;  %v1055_v2 = vadd.f32 %v4634_v40, %v1054_v10  ;;  %v5045_v10 = vmul.f32 1.4142135, %v331_v14 }
 0x110   :  { %v3280_v30 = vpack.c.bf16 %v3231_v60, %v3231_v60  ;;  %v5002_v48 = vpop.permute.xlu1 %2890  ;;  %v5004_v15 = vpop.permute.xlu2 %528  ;;  %v5052_v11 = vmul.f32 1.4142135, %v1877_v62  ;;  %v2699_v62 = vadd.f32 %v4634_v40, %v2698_v33 }
 0x111   :  { %7841 = vst [vmem:[#allocation40_spill] sm:$0xff] %v5004_v15  ;;  %v5006_v22 = vpop.permute.xlu0 %522  ;;  %v3036_v37 = vmax.f32 %v4673_v1, %v5002_v48  ;;  %v5049_v50 = vmul.f32 1.4142135, %v1055_v2  ;;  %v4406_v2 = vld [vmem:[%s7519_s0 + $0x134] sm:$0xff] }
 0x112   :  { %3330 = vst.msk [vmem:[%s7520_s3] sm:$0xf] %vm3329_vm3, %v3280_v30  ;;  %v668_v60 = vmax.f32 %v4678_v3, %v5006_v22  ;;  %4015 = vmatmul.msk.bf16.gmra.mxu1 %vm206_vm2, %v4406_v2 }
 0x113   :  { %7846 = vst [vmem:[#allocation45_spill] sm:$0xff] %v5045_v10 }
 0x114   :  { %v1490_v49 = vadd.f32 %v1392_v44, %v668_v60  ;;  %7847 = vst [vmem:[#allocation46_spill] sm:$0xff] %v5049_v50  ;;  %v333_v44 = vpop.f32.mrf.mxu0 }
 0x115   :  { %7848 = vst [vmem:[#allocation47_spill] sm:$0xff] %v5052_v11  ;;  %v334_v4 = vadd.f32 %v4634_v40, %v333_v44 }
 0x116   :  { %2090 = vrot.lane.b32.xlu2 %v5010_v28, %s4472_s27  ;;  %1268 = vrot.lane.b32.xlu1 %v5008_v61, %s4472_s27  ;;  %v1057_v51 = vpop.f32.mrf.mxu1  ;;  %v2701_v56 = vpop.f32.mrf.mxu3 }
 0x117   :  { %2912 = vrot.lane.b32.xlu0 %v5016_v47, %s4472_s27  ;;  %v4430_v47 = vld [vmem:[%s7519_s0 + $0x1f8] sm:$0xff]  ;;  %v5079_v44 = vmul.f32 1.4142135, %v334_v4  ;;  %v3037_v4 = vmax.f32 %v4692_v12, %v4937_v16 }
 0x118   :  { %v5030_v30 = vpop.permute.xlu2 %1252  ;;  %v5032_v27 = vpop.permute.xlu1 %524  ;;  %4185 = vmatmul.msk.bf16.gmra.mxu2 %vm206_vm2, %v4430_v47 }
 0x119   :  { %7845 = vst [vmem:[#allocation44_spill] sm:$0xff] %v5030_v30  ;;  %v5035_v28 = vpop.permute.xlu0 %2068 }
 0x11a   :  { %v2214_v61 = vmax.f32 %v4694_v13, %v5035_v28  ;;  %7850 = vst [vmem:[#allocation49_spill] sm:$0xff] %v5079_v44 }
 0x11c   :  { %v2312_v60 = vadd.f32 %v2214_v61, %v1490_v49  ;;  %v1058_v49 = vadd.f32 %v4634_v40, %v1057_v51  ;;  %v669_v51 = vmax.f32 %v4689_v9, %v5032_v27  ;;  %v335_v2 = vpop.f32.mrf.mxu0 }
 0x11e   :  { %v3134_v14 = vadd.f32 %v3036_v37, %v2312_v60  ;;  %1270 = vrot.lane.b32.xlu2 %v5049_v50, %s4472_s27  ;;  %546 = vrot.lane.b32.xlu1 %v5045_v10, %s4472_s27  ;;  %v5084_v33 = vmul.f32 1.4142135, %v1058_v49  ;;  %v1059_v42 = vpop.f32.mrf.mxu1 }
 0x11f   :  { %2092 = vrot.lane.b32.xlu0 %v5052_v11, %s4472_s27  ;;  %v5086_v11 = vmul.f32 1.4142135, %v2699_v62  ;;  %v2702_v62 = vadd.f32 %v4634_v40, %v2701_v56 }
 0x120   :  { %v3232_v61 = vmul.f32 0.25, %v3134_v14  ;;  %v5068_v37 = vpop.permute.xlu2 %530  ;;  %v5070_v47 = vpop.permute.xlu1 %2070  ;;  %7851 = vst [vmem:[#allocation50_spill] sm:$0xff] %v5084_v33 }
 0x121   :  { %7849 = vst [vmem:[#allocation48_spill] sm:$0xff] %v5068_v37  ;;  %v5075_v38 = vpop.permute.xlu0 %1248  ;;  %v1879_v14 = vpop.f32.mrf.mxu2  ;;  %v2215_v50 = vmax.f32 %v4708_v18, %v5070_v47  ;;  %v5113_v59 = vmul.f32 1.4142135, %v2702_v62  ;;  %v4381_v62 = vld [vmem:[%s7519_s0 + $0x78] sm:$0xff] }
 0x122   :  { %v3281_v60 = vpack.c.bf16 %v3232_v61, %v3232_v61  ;;  %v1393_v6 = vmax.f32 %v4711_v21, %v5075_v38  ;;  %7852 = vst [vmem:[#allocation51_spill] sm:$0xff] %v5086_v11  ;;  %v1880_v61 = vadd.f32 %v4634_v40, %v1879_v14  ;;  %v336_v14 = vadd.f32 %v4634_v40, %v335_v2 }
 0x123   :  { %7857 = vst [vmem:[#allocation56_spill] sm:$0xff] %v5113_v59  ;;  %3846 = vmatmul.msk.bf16.gmra.mxu0 %vm206_vm2, %v4381_v62 }
 0x124   :  { %v1491_v10 = vadd.f32 %v1393_v6, %v669_v51  ;;  %3331 = vst.msk [vmem:[%s7520_s3 + $0x4] sm:$0xf] %vm3329_vm3, %v3281_v60 }
 0x126   :  { %v2313_v49 = vadd.f32 %v2215_v50, %v1491_v10  ;;  %548 = vrot.lane.b32.xlu2 %v5079_v44, %s4472_s27  ;;  %2914 = vrot.lane.b32.xlu1 %v5086_v11, %s4472_s27  ;;  %v5111_v50 = vmul.f32 1.4142135, %v1880_v61  ;;  %v5115_v11 = vmul.f32 1.4142135, %v336_v14 }
 0x127   :  { %1272 = vrot.lane.b32.xlu0 %v5084_v33, %s4472_s27  ;;  %v2703_v33 = vpop.f32.mrf.mxu3 }
 0x128   :  { %v3135_v51 = vadd.f32 %v3037_v4, %v2313_v49  ;;  %v5104_v60 = vpop.permute.xlu2 %2898  ;;  %v5106_v6 = vpop.permute.xlu1 %526  ;;  %7856 = vst [vmem:[#allocation55_spill] sm:$0xff] %v5111_v50  ;;  %v1060_v4 = vadd.f32 %v4634_v40, %v1059_v42  ;;  %v716_v42 = vmin.f32 %v4638_v45, %v4942_v26  ;;  %v4407_v45 = vld [vmem:[%s7519_s0 + $0x13c] sm:$0xff]  ;;  %v671_v26 = vmax.f32 %v4735_v31, %v5004_v15 }
 0x129   :  { %7853 = vst [vmem:[#allocation52_spill] sm:$0xff] %v5104_v60  ;;  %v5109_v10 = vpop.permute.xlu0 %2894  ;;  %v1881_v36 = vpop.f32.mrf.mxu2  ;;  %4016 = vmatmul.msk.bf16.gmra.mxu1 %vm206_vm2, %v4407_v45 }
 0x12a   :  { %7854 = vst [vmem:[#allocation53_spill] sm:$0xff] %v5106_v6  ;;  %v3233_v56 = vmul.f32 0.25, %v3135_v51  ;;  %v1882_v61 = vadd.f32 %v4634_v40, %v1881_v36  ;;  %v670_v51 = vmax.f32 %v4738_v32, %v5106_v6  ;;  %v1440_v36 = vmin.f32 %v4640_v46, %v4940_v24  ;;  %v338_v24 = vpop.f32.mrf.mxu0 }
 0x12b   :  { %7855 = vst [vmem:[#allocation54_spill] sm:$0xff] %v5109_v10  ;;  %v2216_v32 = vmax.f32 %v4713_v23, %v4975_v29  ;;  %v1395_v6 = vmax.f32 %v4751_v39, %v5030_v30  ;;  %v5163_v62 = vmul.f32 1.4142135, %v1060_v4 }
 0x12c   :  { %v3282_v44 = vpack.c.bf16 %v3233_v56, %v3233_v56  ;;  %7858 = vst [vmem:[#allocation57_spill] sm:$0xff] %v5115_v11  ;;  %v1538_v4 = vadd.f32 %v1440_v36, %v716_v42  ;;  %v2262_v36 = vmin.f32 %v4656_v54, %v4890_v25 }
 0x12d   :  { %7862 = vst [vmem:[#allocation61_spill] sm:$0xff] %v5163_v62 }
 0x12e   :  { %2916 = vrot.lane.b32.xlu2 %v5113_v59, %s4472_s27  ;;  %2094 = vrot.lane.b32.xlu1 %v5111_v50, %s4472_s27  ;;  %3332 = vst.msk [vmem:[%s7520_s3 + $0x8] sm:$0xf] %vm3329_vm3, %v3282_v44  ;;  %v2704_v44 = vadd.f32 %v4634_v40, %v2703_v33  ;;  %v4455_v33 = vld [vmem:[%s7519_s0 + $0x2c4] sm:$0xff]  ;;  %v2360_v25 = vadd.f32 %v2262_v36, %v1538_v4 }
 0x12f   :  { %550 = vrot.lane.b32.xlu0 %v5115_v11, %s4472_s27  ;;  %v4431_v11 = vld [vmem:[%s7519_s0 + $0x200] sm:$0xff]  ;;  %4356 = vmatmul.msk.bf16.gmra.mxu3 %vm206_vm2, %v4455_v33  ;;  %v1442_v36 = vmin.f32 %v4711_v21, %v5075_v38  ;;  %v3040_v21 = vmax.f32 %v4801_v8, %v5104_v60 }
 0x130   :  { %v5129_v49 = vpop.permute.xlu2 %2078  ;;  %v5131_v2 = vpop.permute.xlu1 %1250  ;;  %4186 = vmatmul.msk.bf16.gmra.mxu2 %vm206_vm2, %v4431_v11  ;;  %v1493_v11 = vadd.f32 %v1395_v6, %v671_v26 }
 0x131   :  { %7859 = vst [vmem:[#allocation58_spill] sm:$0xff] %v5129_v49  ;;  %v1394_v14 = vmax.f32 %v4755_v43, %v5131_v2  ;;  %v5141_v56 = vpop.permute.xlu0 %2074  ;;  %v5165_v43 = vmul.f32 1.4142135, %v1882_v61  ;;  %v339_v61 = vadd.f32 %v4634_v40, %v338_v24  ;;  %v1884_v15 = vpop.f32.mrf.mxu2 }
 0x132   :  { %7860 = vst [vmem:[#allocation59_spill] sm:$0xff] %v5131_v2  ;;  %v1062_v2 = vpop.f32.mrf.mxu1  ;;  %v2217_v29 = vmax.f32 %v4753_v41, %v5141_v56 }
 0x133   :  { %7861 = vst [vmem:[#allocation60_spill] sm:$0xff] %v5141_v56  ;;  %v1492_v46 = vadd.f32 %v1394_v14, %v670_v51  ;;  %v3038_v51 = vmax.f32 %v4740_v34, %v5109_v10  ;;  %v5171_v14 = vmul.f32 1.4142135, %v2704_v44  ;;  %v1063_v31 = vadd.f32 %v4634_v40, %v1062_v2  ;;  %v4412_v10 = vld [vmem:[%s7519_s0 + $0x164] sm:$0xff] }
 0x134   :  { %7863 = vst [vmem:[#allocation62_spill] sm:$0xff] %v5165_v43  ;;  %v3084_v2 = vmin.f32 %v4658_v55, %v4977_v63  ;;  %v2315_v24 = vadd.f32 %v2217_v29, %v1493_v11  ;;  %v5199_v45 = vmul.f32 1.4142135, %v339_v61  ;;  %v1441_v29 = vmin.f32 %v4671_v0, %v4921_v58 }
 0x135   :  { %7864 = vst [vmem:[#allocation63_spill] sm:$0xff] %v5171_v14  ;;  %v2314_v23 = vadd.f32 %v2216_v32, %v1492_v46  ;;  %v1885_v32 = vadd.f32 %v4634_v40, %v1884_v15  ;;  %v717_v15 = vmin.f32 %v4678_v3, %v5006_v22  ;;  %v5201_v54 = vmul.f32 1.4142135, %v1063_v31 }
 0x136   :  { %2096 = vrot.lane.b32.xlu2 %v5165_v43, %s4472_s27  ;;  %1274 = vrot.lane.b32.xlu1 %v5163_v62, %s4472_s27  ;;  %7868 = vst [vmem:[#allocation67_spill] sm:$0xff] %v5199_v45  ;;  %v3182_v11 = vadd.f32 %v3084_v2, %v2360_v25  ;;  %v672_v0 = vmax.f32 %v4772_v53, %v5068_v37  ;;  %v2706_v25 = vpop.f32.mrf.mxu3 }
 0x137   :  { %v3136_v44 = vadd.f32 %v3038_v51, %v2314_v23  ;;  %2918 = vrot.lane.b32.xlu0 %v5171_v14, %s4472_s27  ;;  %7869 = vst [vmem:[#allocation68_spill] sm:$0xff] %v5201_v54  ;;  %v5203_v63 = vmul.f32 1.4142135, %v1885_v32  ;;  %v2263_v51 = vmin.f32 %v4694_v13, %v5035_v28  ;;  %v1539_v31 = vadd.f32 %v1441_v29, %v717_v15 }
 0x138   :  { %v5189_v42 = vpop.permute.xlu2 %1258  ;;  %v5191_v33 = vpop.permute.xlu1 %2896  ;;  %v3379_v32 = vmul.f32 0.25, %v3182_v11  ;;  %v718_v15 = vmin.f32 %v4689_v9, %v5032_v27  ;;  %v2264_v27 = vmin.f32 %v4708_v18, %v5070_v47  ;;  %v4408_v18 = vld [vmem:[%s7519_s0 + $0x144] sm:$0xff] }
 0x139   :  { %7865 = vst [vmem:[#allocation64_spill] sm:$0xff] %v5189_v42  ;;  %v3234_v46 = vmul.f32 0.25, %v3136_v44  ;;  %v3039_v23 = vmax.f32 %v4770_v52, %v5191_v33  ;;  %v5195_v6 = vpop.permute.xlu0 %1254  ;;  %v340_v52 = vpop.f32.mrf.mxu0  ;;  %v2361_v58 = vadd.f32 %v2263_v51, %v1539_v31  ;;  %4017 = vmatmul.msk.bf16.gmra.mxu1 %vm206_vm2, %v4408_v18  ;;  %v7884_v18 = vld [vmem:[#allocation19_spill] sm:$0xff] }
 0x13a   :  { %7866 = vst [vmem:[#allocation65_spill] sm:$0xff] %v5191_v33  ;;  %v1396_v3 = vmax.f32 %v4774_v57, %v5195_v6  ;;  %v1064_v22 = vpop.f32.mrf.mxu1  ;;  %v341_v28 = vadd.f32 %v4634_v40, %v340_v52  ;;  %v3085_v52 = vmin.f32 %v4673_v1, %v5002_v48  ;;  %v1540_v51 = vadd.f32 %v1442_v36, %v718_v15  ;;  %v4432_v1 = vld [vmem:[%s7519_s0 + $0x208] sm:$0xff] }
 0x13b   :  { %7867 = vst [vmem:[#allocation66_spill] sm:$0xff] %v5195_v6  ;;  %v3283_v55 = vpack.c.bf16 %v3234_v46, %v3234_v46  ;;  %v3137_v26 = vadd.f32 %v3039_v23, %v2315_v24  ;;  %v1065_v46 = vadd.f32 %v4634_v40, %v1064_v22  ;;  %v2707_v48 = vadd.f32 %v4634_v40, %v2706_v25  ;;  %v1886_v25 = vpop.f32.mrf.mxu2  ;;  %v4459_v6 = vld [vmem:[%s7519_s0 + $0x2e4] sm:$0xff] }
 0x13c   :  { %7870 = vst [vmem:[#allocation69_spill] sm:$0xff] %v5203_v63  ;;  %v1494_v2 = vadd.f32 %v1396_v3, %v672_v0  ;;  %v3183_v29 = vadd.f32 %v3085_v52, %v2361_v58  ;;  %v4382_v58 = vld [vmem:[%s7519_s0 + $0x80] sm:$0xff]  ;;  %v3086_v52 = vmin.f32 %v4692_v12, %v4937_v16  ;;  %v2219_v15 = vmax.f32 %v4814_v19, %v5129_v49  ;;  %v7923_v19 = vld [vmem:[#allocation32_spill] sm:$0xff] }
 0x13d   :  { %v3235_v44 = vmul.f32 0.25, %v3137_v26  ;;  %3333 = vst.msk [vmem:[%s7520_s3 + $0xc] sm:$0xf] %vm3329_vm3, %v3283_v55  ;;  %v5245_v55 = vmul.f32 1.4142135, %v341_v28  ;;  %v3428_v26 = vpack.c.bf16 %v3379_v32, %v3379_v32  ;;  %3847 = vmatmul.msk.bf16.gmra.mxu0 %vm206_vm2, %v4382_v58 }
 0x13e   :  { %1276 = vrot.lane.b32.xlu2 %v5201_v54, %s4472_s27  ;;  %552 = vrot.lane.b32.xlu1 %v5199_v45, %s4472_s27  ;;  %v5247_v11 = vmul.f32 1.4142135, %v1065_v46  ;;  %v5278_v46 = vmul.f32 1.4142135, %v2707_v48 }
 0x13f   :  { %v3284_v13 = vpack.c.bf16 %v3235_v44, %v3235_v44  ;;  %2098 = vrot.lane.b32.xlu0 %v5203_v63, %s4472_s27  ;;  %7874 = vst [vmem:[#allocation73_spill] sm:$0xff] %v5245_v55 }
 0x140   :  { %v5224_v4 = vpop.permute.xlu2 %536  ;;  %v5226_v61 = vpop.permute.xlu1 %2076  ;;  %7875 = vst [vmem:[#allocation74_spill] sm:$0xff] %v5247_v11  ;;  %4187 = vmatmul.msk.bf16.gmra.mxu2 %vm206_vm2, %v4432_v1  ;;  %v1887_v1 = vadd.f32 %v4634_v40, %v1886_v25 }
 0x141   :  { %7871 = vst [vmem:[#allocation70_spill] sm:$0xff] %v5224_v4  ;;  %v2218_v24 = vmax.f32 %v4799_v7, %v5226_v61  ;;  %v5233_v23 = vpop.permute.xlu0 %532  ;;  %v343_v9 = vpop.f32.mrf.mxu0 }
 0x142   :  { %7872 = vst [vmem:[#allocation71_spill] sm:$0xff] %v5226_v61  ;;  %v344_v31 = vadd.f32 %v4634_v40, %v343_v9  ;;  %v673_v28 = vmax.f32 %v4797_v5, %v5233_v23  ;;  %v7931_v61 = vld [vmem:[#allocation35_spill] sm:$0xff] }
 0x143   :  { %7873 = vst [vmem:[#allocation72_spill] sm:$0xff] %v5233_v23  ;;  %v2316_v38 = vadd.f32 %v2218_v24, %v1494_v2  ;;  %v2362_v2 = vadd.f32 %v2264_v27, %v1540_v51  ;;  %v4456_v24 = vld [vmem:[%s7519_s0 + $0x2cc] sm:$0xff] }
 0x144   :  { %3334 = vst.msk [vmem:[%s7520_s3 + $0x10] sm:$0xf] %vm3329_vm3, %v3284_v13  ;;  %v3380_v13 = vmul.f32 0.25, %v3183_v29  ;;  %4357 = vmatmul.msk.bf16.gmra.mxu3 %vm206_vm2, %v4456_v24  ;;  %v2708_v29 = vpop.f32.mrf.mxu3 }
 0x145   :  { %v3138_v44 = vadd.f32 %v3040_v21, %v2316_v38  ;;  %7879 = vst [vmem:[#allocation78_spill] sm:$0xff] %v5278_v46  ;;  %v5288_v21 = vmul.f32 1.4142135, %v344_v31  ;;  %v3184_v16 = vadd.f32 %v3086_v52, %v2362_v2  ;;  %v2709_v48 = vadd.f32 %v4634_v40, %v2708_v29  ;;  %v1889_v52 = vpop.f32.mrf.mxu2 }
 0x146   :  { %554 = vrot.lane.b32.xlu2 %v5245_v55, %s4472_s27  ;;  %3526 = vrot.lane.b32.xlu1 %v3428_v26, %s4473_s23  ;;  %v3429_v26 = vpack.c.bf16 %v3380_v13, %v3380_v13  ;;  %v5315_v2 = vmul.f32 1.4142135, %v1887_v1 }
 0x147   :  { %v3236_v3 = vmul.f32 0.25, %v3138_v44  ;;  %1278 = vrot.lane.b32.xlu0 %v5247_v11, %s4472_s27  ;;  %7880 = vst [vmem:[#allocation79_spill] sm:$0xff] %v5288_v21  ;;  %v3381_v58 = vmul.f32 0.25, %v3184_v16  ;;  %v5317_v24 = vmul.f32 1.4142135, %v2709_v48 }
 0x148   :  { %v5262_v22 = vpop.permute.xlu2 %2904  ;;  %v5264_v0 = vpop.permute.xlu1 %1256  ;;  %7885 = vst [vmem:[#allocation83_spill] sm:$0xff] %v5315_v2 }
 0x149   :  { %7876 = vst [vmem:[#allocation75_spill] sm:$0xff] %v5262_v22  ;;  %v3285_v47 = vpack.c.bf16 %v3236_v3, %v3236_v3  ;;  %v1397_v32 = vmax.f32 %v4812_v17, %v5264_v0  ;;  %v5276_v36 = vpop.permute.xlu0 %2900 }
 0x14a   :  { %7877 = vst [vmem:[#allocation76_spill] sm:$0xff] %v5264_v0  ;;  %v3041_v12 = vmax.f32 %v4816_v20, %v5276_v36 }
 0x14b   :  { %7878 = vst [vmem:[#allocation77_spill] sm:$0xff] %v5276_v36  ;;  %v1495_v38 = vadd.f32 %v1397_v32, %v673_v28  ;;  %v1067_v32 = vpop.f32.mrf.mxu1 }
 0x14c   :  { %3335 = vst.msk [vmem:[%s7520_s3 + $0x14] sm:$0xf] %vm3329_vm3, %v3285_v47  ;;  %v1398_v47 = vmax.f32 %v7884_v18, %v5189_v42  ;;  %v1068_v29 = vadd.f32 %v4634_v40, %v1067_v32 }
 0x14d   :  { %v2317_v51 = vadd.f32 %v2219_v15, %v1495_v38  ;;  %7886 = vst [vmem:[#allocation84_spill] sm:$0xff] %v5317_v24  ;;  %v7887_v38 = vld [vmem:[#allocation20_spill] sm:$0xff] }
 0x14e   :  { %2920 = vrot.lane.b32.xlu1 %v5278_v46, %s4472_s27  ;;  %3528 = vrot.lane.b32.xlu2 %v3429_v26, %s4473_s23  ;;  %v3430_v26 = vpack.c.bf16 %v3381_v58, %v3381_v58 }
 0x14f   :  { %v3139_v44 = vadd.f32 %v3041_v12, %v2317_v51  ;;  %556 = vrot.lane.b32.xlu0 %v5288_v21, %s4472_s27  ;;  %v1890_v51 = vadd.f32 %v4634_v40, %v1889_v52  ;;  %v2711_v12 = vpop.f32.mrf.mxu3 }
 0x150   :  { %v5305_v9 = vpop.permute.xlu2 %2084  ;;  %v5307_v27 = vpop.permute.xlu1 %534  ;;  %v2712_v16 = vadd.f32 %v4634_v40, %v2711_v12  ;;  %v4433_v40 = vld [vmem:[%s7519_s0 + $0x210] sm:$0xff] }
 0x151   :  { %7881 = vst [vmem:[#allocation80_spill] sm:$0xff] %v5305_v9  ;;  %v3237_v3 = vmul.f32 0.25, %v3139_v44  ;;  %v674_v31 = vmax.f32 %v4838_v35, %v5307_v27  ;;  %v5311_v13 = vpop.permute.xlu0 %2080  ;;  %4188 = vmatmul.msk.bf16.gmra.mxu2 %vm206_vm2, %v4433_v40 }
 0x152   :  { %7882 = vst [vmem:[#allocation81_spill] sm:$0xff] %v5307_v27  ;;  %v2220_v25 = vmax.f32 %v7887_v38, %v5311_v13  ;;  %v5348_v32 = vmul.f32 1.4142135, %v2712_v16  ;;  %v4457_v16 = vld [vmem:[%s7519_s0 + $0x2d4] sm:$0xff] }
 0x153   :  { %7883 = vst [vmem:[#allocation82_spill] sm:$0xff] %v5311_v13  ;;  %v3286_v28 = vpack.c.bf16 %v3237_v3, %v3237_v3  ;;  %v1496_v15 = vadd.f32 %v1398_v47, %v674_v31  ;;  %v7890_v3 = vld [vmem:[#allocation23_spill] sm:$0xff]  ;;  %v5341_v47 = vmul.f32 1.4142135, %v1068_v29  ;;  %v1069_v12 = vpop.f32.mrf.mxu1  ;;  %v7895_v29 = vld [vmem:[#allocation22_spill] sm:$0xff] }
 0x154   :  { %7894 = vst [vmem:[#allocation90_spill] sm:$0xff] %v5348_v32  ;;  %4358 = vmatmul.msk.bf16.gmra.mxu3 %vm206_vm2, %v4457_v16 }
 0x155   :  { %3336 = vst.msk [vmem:[%s7520_s3 + $0x18] sm:$0xf] %vm3329_vm3, %v3286_v28  ;;  %v2318_v48 = vadd.f32 %v2220_v25, %v1496_v15  ;;  %v5343_v28 = vmul.f32 1.4142135, %v1890_v51  ;;  %v4383_v15 = vld [vmem:[%s7519_s0 + $0x88] sm:$0xff]  ;;  %v345_v25 = vpop.f32.mrf.mxu0 }
 0x156   :  { %2100 = vrot.lane.b32.xlu1 %v5315_v2, %s4472_s27  ;;  %2922 = vrot.lane.b32.xlu2 %v5317_v24, %s4472_s27  ;;  %7892 = vst [vmem:[#allocation88_spill] sm:$0xff] %v5341_v47 }
 0x157   :  { %3530 = vrot.lane.b32.xlu0 %v3430_v26, %s4473_s23  ;;  %7893 = vst [vmem:[#allocation89_spill] sm:$0xff] %v5343_v28  ;;  %3848 = vmatmul.msk.bf16.gmra.mxu0 %vm206_vm2, %v4383_v15 }
 0x158   :  { %v5333_v44 = vpop.permute.xlu2 %1264  ;;  %v5335_v1 = vpop.permute.xlu1 %2902 }
 0x159   :  { %7888 = vst [vmem:[#allocation85_spill] sm:$0xff] %v5333_v44  ;;  %v3042_v31 = vmax.f32 %v7890_v3, %v5335_v1  ;;  %v5339_v58 = vpop.permute.xlu0 %1260  ;;  %v1891_v3 = vpop.f32.mrf.mxu2 }
 0x15a   :  { %7889 = vst [vmem:[#allocation86_spill] sm:$0xff] %v5335_v1  ;;  %v1399_v51 = vmax.f32 %v7895_v29, %v5339_v58 }
 0x15b   :  { %7891 = vst [vmem:[#allocation87_spill] sm:$0xff] %v5339_v58  ;;  %v3140_v52 = vadd.f32 %v3042_v31, %v2318_v48  ;;  %v7896_v48 = vld [vmem:[#allocation21_spill] sm:$0xff]  ;;  %v7899_v58 = vld [vmem:[#allocation24_spill] sm:$0xff]  ;;  %v1072_v42 = vpop.f32.mrf.mxu1 }
 0x15c   :  { %v675_v31 = vmax.f32 %v7896_v48, %v5224_v4 }
 0x15d   :  { %v3238_v26 = vmul.f32 0.25, %v3140_v52  ;;  %v5372_v52 = vld [vmem:[%s7518_s2] ss:$0 sm:$0xff] }
 0x15e   :  { %1280 = vrot.lane.b32.xlu1 %v5341_v47, %s4472_s27  ;;  %2102 = vrot.lane.b32.xlu2 %v5343_v28, %s4472_s27  ;;  %v346_v15 = vadd.f32 %v5372_v52, %v345_v25  ;;  %v1070_v1 = vadd.f32 %v5372_v52, %v1069_v12  ;;  %v1497_v29 = vadd.f32 %v1399_v51, %v675_v31  ;;  %v7901_v25 = vld [vmem:[#allocation25_spill] sm:$0xff]  ;;  %v348_v31 = vpop.f32.mrf.mxu0 }
 0x15f   :  { %v3287_v40 = vpack.c.bf16 %v3238_v26, %v3238_v26  ;;  %2924 = vrot.lane.b32.xlu0 %v5348_v32, %s4472_s27  ;;  %v4409_v26 = vld [vmem:[%s7519_s0 + $0x14c] sm:$0xff]  ;;  %v1892_v16 = vadd.f32 %v5372_v52, %v1891_v3  ;;  %v3043_v12 = vmax.f32 %v7901_v25, %v5262_v22  ;;  %v2713_v3 = vpop.f32.mrf.mxu3  ;;  %v349_v18 = vadd.f32 %v5372_v52, %v348_v31 }
 0x160   :  { %v5376_v38 = vpop.permute.xlu2 %542  ;;  %v5378_v13 = vpop.permute.xlu1 %2082  ;;  %4018 = vmatmul.msk.bf16.gmra.mxu1 %vm206_vm2, %v4409_v26  ;;  %v5395_v27 = vmul.f32 1.4142135, %v346_v15  ;;  %v5397_v51 = vmul.f32 1.4142135, %v1070_v1  ;;  %v2714_v1 = vadd.f32 %v5372_v52, %v2713_v3  ;;  %v7907_v26 = vld [vmem:[#allocation26_spill] sm:$0xff] }
 0x161   :  { %7897 = vst [vmem:[#allocation91_spill] sm:$0xff] %v5376_v38  ;;  %v2221_v48 = vmax.f32 %v7899_v58, %v5378_v13  ;;  %v5386_v4 = vpop.permute.xlu0 %538  ;;  %v5399_v58 = vmul.f32 1.4142135, %v1892_v16  ;;  %v1894_v36 = vpop.f32.mrf.mxu2 }
 0x162   :  { %7898 = vst [vmem:[#allocation92_spill] sm:$0xff] %v5378_v13  ;;  %v676_v16 = vmax.f32 %v7907_v26, %v5386_v4 }
 0x163   :  { %7900 = vst [vmem:[#allocation93_spill] sm:$0xff] %v5386_v4  ;;  %v2319_v35 = vadd.f32 %v2221_v48, %v1497_v29  ;;  %v1073_v29 = vadd.f32 %v5372_v52, %v1072_v42  ;;  %v7911_v42 = vld [vmem:[#allocation28_spill] sm:$0xff] }
 0x164   :  { %3337 = vst.msk [vmem:[%s7520_s3 + $0x1c] sm:$0xf] %vm3329_vm3, %v3287_v40  ;;  %v2222_v22 = vmax.f32 %v7911_v42, %v5305_v9 }
 0x165   :  { %7902 = vst [vmem:[#allocation94_spill] sm:$0xff] %v5395_v27  ;;  %v3141_v13 = vadd.f32 %v3043_v12, %v2319_v35  ;;  %v7908_v12 = vld [vmem:[#allocation27_spill] sm:$0xff]  ;;  %v5424_v20 = vmul.f32 1.4142135, %v1073_v29 }
 0x166   :  { %7903 = vst [vmem:[#allocation95_spill] sm:$0xff] %v5397_v51  ;;  %558 = vrot.lane.b32.xlu1 %v5395_v27, %s4472_s27  ;;  %1282 = vrot.lane.b32.xlu2 %v5397_v51, %s4472_s27  ;;  %v350_v33 = vpop.f32.mrf.mxu0 }
 0x167   :  { %7904 = vst [vmem:[#allocation96_spill] sm:$0xff] %v5399_v58  ;;  %v3239_v40 = vmul.f32 0.25, %v3141_v13  ;;  %2104 = vrot.lane.b32.xlu0 %v5399_v58, %s4472_s27  ;;  %v5420_v13 = vmul.f32 1.4142135, %v349_v18  ;;  %v2716_v26 = vpop.f32.mrf.mxu3 }
 0x168   :  { %v5410_v48 = vpop.permute.xlu2 %2910  ;;  %v5412_v35 = vpop.permute.xlu1 %1262  ;;  %7912 = vst [vmem:[#allocation101_spill] sm:$0xff] %v5424_v20  ;;  %v2717_v29 = vadd.f32 %v5372_v52, %v2716_v26  ;;  %v351_v26 = vadd.f32 %v5372_v52, %v350_v33  ;;  %v7921_v33 = vld [vmem:[#allocation31_spill] sm:$0xff] }
 0x169   :  { %7905 = vst [vmem:[#allocation97_spill] sm:$0xff] %v5410_v48  ;;  %v3288_v15 = vpack.c.bf16 %v3239_v40, %v3239_v40  ;;  %v1400_v31 = vmax.f32 %v7908_v12, %v5412_v35  ;;  %v5418_v25 = vpop.permute.xlu0 %2906  ;;  %v5430_v40 = vmul.f32 1.4142135, %v2714_v1  ;;  %v7914_v12 = vld [vmem:[#allocation29_spill] sm:$0xff]  ;;  %v1401_v42 = vmax.f32 %v7921_v33, %v5333_v44  ;;  %v1896_v9 = vpop.f32.mrf.mxu2 }
 0x16a   :  { %7906 = vst [vmem:[#allocation98_spill] sm:$0xff] %v5412_v35  ;;  %v3044_v18 = vmax.f32 %v7914_v12, %v5418_v25  ;;  %v1895_v35 = vadd.f32 %v5372_v52, %v1894_v36  ;;  %v4384_v36 = vld [vmem:[%s7519_s0 + $0x90] sm:$0xff] }
 0x16b   :  { %7909 = vst [vmem:[#allocation99_spill] sm:$0xff] %v5418_v25  ;;  %v1498_v3 = vadd.f32 %v1400_v31, %v676_v16  ;;  %v7917_v31 = vld [vmem:[#allocation30_spill] sm:$0xff]  ;;  %3849 = vmatmul.msk.bf16.gmra.mxu0 %vm206_vm2, %v4384_v36  ;;  %v4434_v25 = vld [vmem:[%s7519_s0 + $0x218] sm:$0xff]  ;;  %v5471_v36 = vmul.f32 1.4142135, %v351_v26 }
 0x16c   :  { %7910 = vst [vmem:[#allocation100_spill] sm:$0xff] %v5420_v13  ;;  %4189 = vmatmul.msk.bf16.gmra.mxu2 %vm206_vm2, %v4434_v25 }
 0x16d   :  { %3338 = vst.msk [vmem:[%s7520_s3 + $0x20] sm:$0xf] %vm3329_vm3, %v3288_v15  ;;  %v2320_v4 = vadd.f32 %v2222_v22, %v1498_v3 }
 0x16e   :  { %7913 = vst [vmem:[#allocation102_spill] sm:$0xff] %v5430_v40  ;;  %2926 = vrot.lane.b32.xlu1 %v5430_v40, %s4472_s27  ;;  %560 = vrot.lane.b32.xlu2 %v5420_v13, %s4472_s27  ;;  %v353_v44 = vpop.f32.mrf.mxu0 }
 0x16f   :  { %v3142_v16 = vadd.f32 %v3044_v18, %v2320_v4  ;;  %1284 = vrot.lane.b32.xlu0 %v5424_v20, %s4472_s27  ;;  %v5454_v4 = vmul.f32 1.4142135, %v1895_v35  ;;  %v5456_v18 = vmul.f32 1.4142135, %v2717_v29  ;;  %v4410_v35 = vld [vmem:[%s7519_s0 + $0x154] sm:$0xff]  ;;  %v1074_v29 = vpop.f32.mrf.mxu1  ;;  %7922 = vst [vmem:[#allocation108_spill] sm:$0xff] %v5471_v36 }
 0x170   :  { %v5442_v1 = vpop.permute.xlu2 %2090  ;;  %v5444_v22 = vpop.permute.xlu1 %540  ;;  %4019 = vmatmul.msk.bf16.gmra.mxu1 %vm206_vm2, %v4410_v35  ;;  %v1075_v25 = vadd.f32 %v5372_v52, %v1074_v29  ;;  %v7926_v35 = vld [vmem:[#allocation33_spill] sm:$0xff] }
 0x171   :  { %7915 = vst [vmem:[#allocation103_spill] sm:$0xff] %v5442_v1  ;;  %v3240_v15 = vmul.f32 0.25, %v3142_v16  ;;  %v677_v3 = vmax.f32 %v7917_v31, %v5444_v22  ;;  %v5452_v12 = vpop.permute.xlu0 %2086  ;;  %v4458_v16 = vld [vmem:[%s7519_s0 + $0x2dc] sm:$0xff] }
 0x172   :  { %7916 = vst [vmem:[#allocation104_spill] sm:$0xff] %v5444_v22  ;;  %v2223_v49 = vmax.f32 %v7923_v19, %v5452_v12  ;;  %4359 = vmatmul.msk.bf16.gmra.mxu3 %vm206_vm2, %v4458_v16  ;;  %v5498_v8 = vmul.f32 1.4142135, %v1075_v25 }
 0x173   :  { %7918 = vst [vmem:[#allocation105_spill] sm:$0xff] %v5452_v12  ;;  %v3289_v31 = vpack.c.bf16 %v3240_v15, %v3240_v15  ;;  %v1499_v22 = vadd.f32 %v1401_v42, %v677_v3  ;;  %v2718_v15 = vpop.f32.mrf.mxu3  ;;  %v1897_v42 = vadd.f32 %v5372_v52, %v1896_v9 }
 0x174   :  { %7919 = vst [vmem:[#allocation106_spill] sm:$0xff] %v5454_v4 }
 0x175   :  { %7920 = vst [vmem:[#allocation107_spill] sm:$0xff] %v5456_v18  ;;  %v2321_v16 = vadd.f32 %v2223_v49, %v1499_v22  ;;  %v5500_v60 = vmul.f32 1.4142135, %v1897_v42  ;;  %v354_v22 = vadd.f32 %v5372_v52, %v353_v44 }
 0x176   :  { %3339 = vst.msk [vmem:[%s7520_s3 + $0x24] sm:$0xf] %vm3329_vm3, %v3289_v31  ;;  %2106 = vrot.lane.b32.xlu1 %v5454_v4, %s4472_s27  ;;  %2928 = vrot.lane.b32.xlu2 %v5456_v18, %s4472_s27  ;;  %v2719_v31 = vadd.f32 %v5372_v52, %v2718_v15 }
 0x177   :  { %562 = vrot.lane.b32.xlu0 %v5471_v36, %s4472_s27  ;;  %7928 = vst [vmem:[#allocation112_spill] sm:$0xff] %v5498_v8  ;;  %v1077_v29 = vpop.f32.mrf.mxu1 }
 0x178   :  { %v5489_v26 = vpop.permute.xlu2 %1270  ;;  %v5491_v3 = vpop.permute.xlu1 %2908  ;;  %7929 = vst [vmem:[#allocation113_spill] sm:$0xff] %v5500_v60  ;;  %v5502_v9 = vmul.f32 1.4142135, %v2719_v31  ;;  %v1078_v15 = vadd.f32 %v5372_v52, %v1077_v29  ;;  %v7935_v29 = vld [vmem:[#allocation38_spill] sm:$0xff] }
 0x179   :  { %7924 = vst [vmem:[#allocation109_spill] sm:$0xff] %v5489_v26  ;;  %v3045_v19 = vmax.f32 %v7926_v35, %v5491_v3  ;;  %v5496_v12 = vpop.permute.xlu0 %1266  ;;  %v1899_v35 = vpop.f32.mrf.mxu2 }
 0x17a   :  { %7925 = vst [vmem:[#allocation110_spill] sm:$0xff] %v5491_v3  ;;  %v1402_v49 = vmax.f32 %v7931_v61, %v5496_v12 }
 0x17b   :  { %7927 = vst [vmem:[#allocation111_spill] sm:$0xff] %v5496_v12  ;;  %v3143_v33 = vadd.f32 %v3045_v19, %v2321_v16  ;;  %v7932_v19 = vld [vmem:[#allocation34_spill] sm:$0xff]  ;;  %v7939_v12 = vld [vmem:[#allocation39_spill] sm:$0xff] }
 0x17c   :  { %7930 = vst [vmem:[#allocation114_spill] sm:$0xff] %v5502_v9  ;;  %v678_v25 = vmax.f32 %v7932_v19, %v5376_v38  ;;  %v3046_v19 = vmax.f32 %v7939_v12, %v5410_v48 }
 0x17d   :  { %v3241_v7 = vmul.f32 0.25, %v3143_v33  ;;  %v1900_v33 = vadd.f32 %v5372_v52, %v1899_v35  ;;  %v5531_v35 = vmul.f32 1.4142135, %v1078_v15 }
 0x17e   :  { %1286 = vrot.lane.b32.xlu1 %v5498_v8, %s4472_s27  ;;  %2108 = vrot.lane.b32.xlu2 %v5500_v60, %s4472_s27  ;;  %v1500_v31 = vadd.f32 %v1402_v49, %v678_v25  ;;  %v2721_v25 = vpop.f32.mrf.mxu3 }
 0x17f   :  { %v3290_v42 = vpack.c.bf16 %v3241_v7, %v3241_v7  ;;  %2930 = vrot.lane.b32.xlu0 %v5502_v9, %s4472_s27  ;;  %v5529_v7 = vmul.f32 1.4142135, %v354_v22  ;;  %7938 = vst [vmem:[#allocation119_spill] sm:$0xff] %v5531_v35  ;;  %v5535_v38 = vmul.f32 1.4142135, %v1900_v33  ;;  %v2722_v23 = vadd.f32 %v5372_v52, %v2721_v25  ;;  %v4385_v33 = vld [vmem:[%s7519_s0 + $0x98] sm:$0xff] }
 0x180   :  { %v5517_v16 = vpop.permute.xlu2 %548  ;;  %v5519_v44 = vpop.permute.xlu1 %2088  ;;  %3850 = vmatmul.msk.bf16.gmra.mxu0 %vm206_vm2, %v4385_v33 }
 0x181   :  { %7933 = vst [vmem:[#allocation115_spill] sm:$0xff] %v5517_v16  ;;  %v2224_v3 = vmax.f32 %v7935_v29, %v5519_v44  ;;  %v5523_v61 = vpop.permute.xlu0 %544  ;;  %v355_v29 = vpop.f32.mrf.mxu0  ;;  %v5566_v57 = vmul.f32 1.4142135, %v2722_v23 }
 0x182   :  { %7934 = vst [vmem:[#allocation116_spill] sm:$0xff] %v5519_v44  ;;  %v4435_v44 = vld [vmem:[%s7519_s0 + $0x220] sm:$0xff]  ;;  %v1901_v23 = vpop.f32.mrf.mxu2  ;;  %4360 = vmatmul.msk.bf16.gmra.mxu3 %vm206_vm2, %v4459_v6 }
 0x183   :  { %7936 = vst [vmem:[#allocation117_spill] sm:$0xff] %v5523_v61  ;;  %v2322_v49 = vadd.f32 %v2224_v3, %v1500_v31  ;;  %4190 = vmatmul.msk.bf16.gmra.mxu2 %vm206_vm2, %v4435_v44  ;;  %v356_v3 = vadd.f32 %v5372_v52, %v355_v29  ;;  %v4411_v31 = vld [vmem:[%s7519_s0 + $0x15c] sm:$0xff]  ;;  %v1902_v6 = vadd.f32 %v5372_v52, %v1901_v23 }
 0x184   :  { %3340 = vst.msk [vmem:[%s7520_s3 + $0x28] sm:$0xf] %vm3329_vm3, %v3290_v42  ;;  %v1079_v42 = vpop.f32.mrf.mxu1  ;;  %v7944_v29 = vld [vmem:[#allocation41_spill] sm:$0xff]  ;;  %4020 = vmatmul.msk.bf16.gmra.mxu1 %vm206_vm2, %v4411_v31 }
 0x185   :  { %7937 = vst [vmem:[#allocation118_spill] sm:$0xff] %v5529_v7  ;;  %v3144_v5 = vadd.f32 %v3046_v19, %v2322_v49  ;;  %v7943_v49 = vld [vmem:[#allocation37_spill] sm:$0xff]  ;;  %v1080_v44 = vadd.f32 %v5372_v52, %v1079_v42  ;;  %v5579_v42 = vmul.f32 1.4142135, %v356_v3  ;;  %v5607_v23 = vmul.f32 1.4142135, %v1902_v6 }
 0x186   :  { %7940 = vst [vmem:[#allocation120_spill] sm:$0xff] %v5535_v38  ;;  %564 = vrot.lane.b32.xlu1 %v5529_v7, %s4472_s27  ;;  %1288 = vrot.lane.b32.xlu2 %v5531_v35, %s4472_s27  ;;  %v679_v25 = vmax.f32 %v7943_v49, %v5523_v61  ;;  %v2723_v49 = vpop.f32.mrf.mxu3 }
 0x187   :  { %v3242_v22 = vmul.f32 0.25, %v3144_v5  ;;  %2110 = vrot.lane.b32.xlu0 %v5535_v38, %s4472_s27  ;;  %7946 = vst [vmem:[#allocation124_spill] sm:$0xff] %v5566_v57  ;;  %v5582_v33 = vmul.f32 1.4142135, %v1080_v44  ;;  %v7953_v44 = vld [vmem:[#allocation45_spill] sm:$0xff] }
 0x188   :  { %v5549_v15 = vpop.permute.xlu2 %2916  ;;  %v5551_v19 = vpop.permute.xlu1 %1268  ;;  %7948 = vst [vmem:[#allocation125_spill] sm:$0xff] %v5579_v42 }
 0x189   :  { %7941 = vst [vmem:[#allocation121_spill] sm:$0xff] %v5549_v15  ;;  %v3291_v5 = vpack.c.bf16 %v3242_v22, %v3242_v22  ;;  %v1403_v12 = vmax.f32 %v7944_v29, %v5551_v19  ;;  %v5564_v48 = vpop.permute.xlu0 %2912  ;;  %v7947_v22 = vld [vmem:[#allocation42_spill] sm:$0xff]  ;;  %v7950_v29 = vld [vmem:[#allocation43_spill] sm:$0xff] }
 0x18a   :  { %7942 = vst [vmem:[#allocation122_spill] sm:$0xff] %v5551_v19  ;;  %v2225_v41 = vmax.f32 %v7947_v22, %v5442_v1  ;;  %v3047_v22 = vmax.f32 %v7950_v29, %v5564_v48  ;;  %v1904_v17 = vpop.f32.mrf.mxu2 }
 0x18b   :  { %7945 = vst [vmem:[#allocation123_spill] sm:$0xff] %v5564_v48  ;;  %v1501_v56 = vadd.f32 %v1403_v12, %v679_v25  ;;  %v358_v12 = vpop.f32.mrf.mxu0 }
 0x18c   :  { %3341 = vst.msk [vmem:[%s7520_s3 + $0x2c] sm:$0xf] %vm3329_vm3, %v3291_v5  ;;  %v359_v3 = vadd.f32 %v5372_v52, %v358_v12  ;;  %v1082_v19 = vpop.f32.mrf.mxu1 }
 0x18d   :  { %7949 = vst [vmem:[#allocation126_spill] sm:$0xff] %v5582_v33  ;;  %v2323_v61 = vadd.f32 %v2225_v41, %v1501_v56  ;;  %v2724_v41 = vadd.f32 %v5372_v52, %v2723_v49 }
 0x18e   :  { %2932 = vrot.lane.b32.xlu1 %v5566_v57, %s4472_s27  ;;  %566 = vrot.lane.b32.xlu2 %v5579_v42, %s4472_s27  ;;  %v5605_v1 = vmul.f32 1.4142135, %v359_v3  ;;  %7956 = vst [vmem:[#allocation130_spill] sm:$0xff] %v5607_v23  ;;  %v1905_v3 = vadd.f32 %v5372_v52, %v1904_v17 }
 0x18f   :  { %v3145_v31 = vadd.f32 %v3047_v22, %v2323_v61  ;;  %1290 = vrot.lane.b32.xlu0 %v5582_v33, %s4472_s27  ;;  %v7955_v61 = vld [vmem:[#allocation46_spill] sm:$0xff]  ;;  %v5609_v49 = vmul.f32 1.4142135, %v2724_v41 }
 0x190   :  { %v5595_v56 = vpop.permute.xlu2 %2096  ;;  %v5597_v5 = vpop.permute.xlu1 %546  ;;  %v1404_v22 = vmax.f32 %v7955_v61, %v5489_v26 }
 0x191   :  { %7951 = vst [vmem:[#allocation127_spill] sm:$0xff] %v5595_v56  ;;  %v3243_v25 = vmul.f32 0.25, %v3145_v31  ;;  %v680_v29 = vmax.f32 %v7953_v44, %v5597_v5  ;;  %v5601_v48 = vpop.permute.xlu0 %2092  ;;  %v7958_v31 = vld [vmem:[#allocation47_spill] sm:$0xff]  ;;  %v1083_v44 = vadd.f32 %v5372_v52, %v1082_v19 }
 0x192   :  { %7952 = vst [vmem:[#allocation128_spill] sm:$0xff] %v5597_v5  ;;  %v2226_v34 = vmax.f32 %v7958_v31, %v5601_v48  ;;  %v7961_v19 = vld [vmem:[#allocation51_spill] sm:$0xff] }
 0x193   :  { %7954 = vst [vmem:[#allocation129_spill] sm:$0xff] %v5601_v48  ;;  %v3292_v12 = vpack.c.bf16 %v3243_v25, %v3243_v25  ;;  %v1502_v0 = vadd.f32 %v1404_v22, %v680_v29  ;;  %v2726_v25 = vpop.f32.mrf.mxu3  ;;  %v5634_v31 = vmul.f32 1.4142135, %v1083_v44  ;;  %v5636_v48 = vmul.f32 1.4142135, %v1905_v3  ;;  %v4460_v44 = vld [vmem:[%s7519_s0 + $0x2ec] sm:$0xff] }
 0x194   :  { %7957 = vst [vmem:[#allocation131_spill] sm:$0xff] %v5609_v49  ;;  %v2727_v29 = vadd.f32 %v5372_v52, %v2726_v25  ;;  %v4436_v25 = vld [vmem:[%s7519_s0 + $0x228] sm:$0xff]  ;;  %4361 = vmatmul.msk.bf16.gmra.mxu3 %vm206_vm2, %v4460_v44  ;;  %4021 = vmatmul.msk.bf16.gmra.mxu1 %vm206_vm2, %v4412_v10 }
 0x195   :  { %3342 = vst.msk [vmem:[%s7520_s3 + $0x30] sm:$0xf] %vm3329_vm3, %v3292_v12  ;;  %v2324_v22 = vadd.f32 %v2226_v34, %v1502_v0  ;;  %v4386_v34 = vld [vmem:[%s7519_s0 + $0xa0] sm:$0xff]  ;;  %v360_v0 = vpop.f32.mrf.mxu0  ;;  %4191 = vmatmul.msk.bf16.gmra.mxu2 %vm206_vm2, %v4436_v25 }
 0x196   :  { %2112 = vrot.lane.b32.xlu1 %v5607_v23, %s4472_s27  ;;  %2934 = vrot.lane.b32.xlu2 %v5609_v49, %s4472_s27  ;;  %v5641_v5 = vmul.f32 1.4142135, %v2727_v29  ;;  %v1906_v29 = vpop.f32.mrf.mxu2 }
 0x197   :  { %568 = vrot.lane.b32.xlu0 %v5605_v1, %s4472_s27  ;;  %3851 = vmatmul.msk.bf16.gmra.mxu0 %vm206_vm2, %v4386_v34 }
 0x198   :  { %v5626_v6 = vpop.permute.xlu2 %1276  ;;  %v5628_v41 = vpop.permute.xlu1 %2914 }
 0x199   :  { %7959 = vst [vmem:[#allocation132_spill] sm:$0xff] %v5626_v6  ;;  %v3048_v17 = vmax.f32 %v7961_v19, %v5628_v41  ;;  %v5632_v12 = vpop.permute.xlu0 %1272  ;;  %v1084_v19 = vpop.f32.mrf.mxu1 }
 0x19a   :  { %7960 = vst [vmem:[#allocation133_spill] sm:$0xff] %v5628_v41  ;;  %v7963_v41 = vld [vmem:[#allocation50_spill] sm:$0xff]  ;;  %v1085_v34 = vadd.f32 %v5372_v52, %v1084_v19  ;;  %v3049_v19 = vmax.f32 %v5113_v59, %v5549_v15 }
 0x19b   :  { %7962 = vst [vmem:[#allocation134_spill] sm:$0xff] %v5632_v12  ;;  %v3146_v61 = vadd.f32 %v3048_v17, %v2324_v22  ;;  %v1405_v26 = vmax.f32 %v7963_v41, %v5632_v12  ;;  %v7964_v22 = vld [vmem:[#allocation49_spill] sm:$0xff] }
 0x19c   :  { %v681_v17 = vmax.f32 %v7964_v22, %v5517_v16 }
 0x19d   :  { %v3244_v3 = vmul.f32 0.25, %v3146_v61  ;;  %v361_v61 = vadd.f32 %v5372_v52, %v360_v0 }
 0x19e   :  { %1292 = vrot.lane.b32.xlu1 %v5634_v31, %s4472_s27  ;;  %2114 = vrot.lane.b32.xlu2 %v5636_v48, %s4472_s27  ;;  %v1503_v53 = vadd.f32 %v1405_v26, %v681_v17  ;;  %v5685_v26 = vmul.f32 1.4142135, %v1085_v34  ;;  %v363_v17 = vpop.f32.mrf.mxu0  ;;  %v1909_v59 = vpop.f32.mrf.mxu2 }
 0x19f   :  { %v3293_v25 = vpack.c.bf16 %v3244_v3, %v3244_v3  ;;  %2936 = vrot.lane.b32.xlu0 %v5641_v5, %s4472_s27  ;;  %v1907_v3 = vadd.f32 %v5372_v52, %v1906_v29  ;;  %v5683_v44 = vmul.f32 1.4142135, %v361_v61  ;;  %v2728_v29 = vpop.f32.mrf.mxu3  ;;  %v364_v37 = vadd.f32 %v5372_v52, %v363_v17 }
 0x1a0   :  { %v5664_v41 = vpop.permute.xlu2 %554  ;;  %v5666_v12 = vpop.permute.xlu1 %2094 }
 0x1a1   :  { %7965 = vst [vmem:[#allocation135_spill] sm:$0xff] %v5664_v41  ;;  %v2227_v22 = vmax.f32 %v5111_v50, %v5666_v12  ;;  %v5674_v16 = vpop.permute.xlu0 %550  ;;  %v5687_v50 = vmul.f32 1.4142135, %v1907_v3  ;;  %v1087_v39 = vpop.f32.mrf.mxu1  ;;  %v7969_v3 = vld [vmem:[#allocation57_spill] sm:$0xff] }
 0x1a2   :  { %7966 = vst [vmem:[#allocation136_spill] sm:$0xff] %v5666_v12  ;;  %v1088_v10 = vadd.f32 %v5372_v52, %v1087_v39 }
 0x1a3   :  { %7967 = vst [vmem:[#allocation137_spill] sm:$0xff] %v5674_v16  ;;  %v2325_v0 = vadd.f32 %v2227_v22, %v1503_v53  ;;  %v2729_v22 = vadd.f32 %v5372_v52, %v2728_v29  ;;  %v2228_v29 = vmax.f32 %v5165_v43, %v5595_v56 }
 0x1a4   :  { %3343 = vst.msk [vmem:[%s7520_s3 + $0x34] sm:$0xf] %vm3329_vm3, %v3293_v25  ;;  %v5714_v17 = vmul.f32 1.4142135, %v1088_v10 }
 0x1a5   :  { %v3147_v12 = vadd.f32 %v3049_v19, %v2325_v0  ;;  %v682_v19 = vmax.f32 %v7969_v3, %v5674_v16  ;;  %v5720_v15 = vmul.f32 1.4142135, %v2729_v22  ;;  %v1910_v16 = vadd.f32 %v5372_v52, %v1909_v59  ;;  %v4387_v59 = vld [vmem:[%s7519_s0 + $0xa8] sm:$0xff] }
 0x1a6   :  { %570 = vrot.lane.b32.xlu1 %v5683_v44, %s4472_s27  ;;  %1294 = vrot.lane.b32.xlu2 %v5685_v26, %s4472_s27 }
 0x1a7   :  { %v3245_v53 = vmul.f32 0.25, %v3147_v12  ;;  %2116 = vrot.lane.b32.xlu0 %v5687_v50, %s4472_s27  ;;  %v5710_v12 = vmul.f32 1.4142135, %v364_v37  ;;  %v2731_v3 = vpop.f32.mrf.mxu3  ;;  %3852 = vmatmul.msk.bf16.gmra.mxu0 %vm206_vm2, %v4387_v59 }
 0x1a8   :  { %v5698_v25 = vpop.permute.xlu1 %1274  ;;  %v3529_v61 = vpop.permute.xlu2 %3528  ;;  %v2732_v10 = vadd.f32 %v5372_v52, %v2731_v3 }
 0x1a9   :  { %7968 = vst [vmem:[#allocation138_spill] sm:$0xff] %v5698_v25  ;;  %v3294_v34 = vpack.c.bf16 %v3245_v53, %v3245_v53  ;;  %v1406_v0 = vmax.f32 %v5163_v62, %v5698_v25  ;;  %v5708_v39 = vpop.permute.xlu0 %2918  ;;  %v365_v62 = vpop.f32.mrf.mxu0 }
 0x1aa   :  { %3675 = vst.msk [vmem:[%s7520_s3 + $0x4] sm:$0xf] %vm3673_vm4, %v3529_v61  ;;  %v3050_v37 = vmax.f32 %v5171_v14, %v5708_v39  ;;  %v366_v3 = vadd.f32 %v5372_v52, %v365_v62  ;;  %v5744_v14 = vmul.f32 1.4142135, %v2732_v10  ;;  %v4413_v62 = vld [vmem:[%s7519_s0 + $0x16c] sm:$0xff]  ;;  %v1911_v10 = vpop.f32.mrf.mxu2 }
 0x1ab   :  { %7970 = vst [vmem:[#allocation139_spill] sm:$0xff] %v5708_v39  ;;  %v1504_v53 = vadd.f32 %v1406_v0, %v682_v19  ;;  %4022 = vmatmul.msk.bf16.gmra.mxu1 %vm206_vm2, %v4413_v62 }
 0x1ac   :  { %3344 = vst.msk [vmem:[%s7520_s3 + $0x38] sm:$0xf] %vm3329_vm3, %v3294_v34 }
 0x1ad   :  { %v2326_v61 = vadd.f32 %v2228_v29, %v1504_v53  ;;  %v5742_v53 = vmul.f32 1.4142135, %v1910_v16  ;;  %7974 = vst [vmem:[#allocation143_spill] sm:$0xff] %v5744_v14  ;;  %v5762_v16 = vmul.f32 1.4142135, %v366_v3 }
 0x1ae   :  { %2938 = vrot.lane.b32.xlu1 %v5720_v15, %s4472_s27  ;;  %572 = vrot.lane.b32.xlu2 %v5710_v12, %s4472_s27 }
 0x1af   :  { %v3148_v34 = vadd.f32 %v3050_v37, %v2326_v61  ;;  %1296 = vrot.lane.b32.xlu0 %v5714_v17, %s4472_s27  ;;  %v4437_v61 = vld [vmem:[%s7519_s0 + $0x230] sm:$0xff]  ;;  %7975 = vst [vmem:[#allocation144_spill] sm:$0xff] %v5762_v16  ;;  %v2733_v59 = vpop.f32.mrf.mxu3 }
 0x1b0   :  { %v5732_v22 = vpop.permute.xlu1 %552  ;;  %v5734_v19 = vpop.permute.xlu2 %2922  ;;  %v4461_v37 = vld [vmem:[%s7519_s0 + $0x2f4] sm:$0xff]  ;;  %4192 = vmatmul.msk.bf16.gmra.mxu2 %vm206_vm2, %v4437_v61  ;;  %v1912_v61 = vadd.f32 %v5372_v52, %v1911_v10  ;;  %v2734_v62 = vadd.f32 %v5372_v52, %v2733_v59 }
 0x1b1   :  { %7971 = vst [vmem:[#allocation140_spill] sm:$0xff] %v5732_v22  ;;  %v3246_v0 = vmul.f32 0.25, %v3148_v34  ;;  %v5740_v29 = vpop.permute.xlu0 %2098  ;;  %v1089_v34 = vpop.f32.mrf.mxu1  ;;  %4362 = vmatmul.msk.bf16.gmra.mxu3 %vm206_vm2, %v4461_v37  ;;  %v683_v37 = vmax.f32 %v5199_v45, %v5732_v22 }
 0x1b2   :  { %7972 = vst [vmem:[#allocation141_spill] sm:$0xff] %v5734_v19  ;;  %v368_v56 = vpop.f32.mrf.mxu0  ;;  %v5788_v25 = vmul.f32 1.4142135, %v1912_v61  ;;  %v2229_v59 = vmax.f32 %v5203_v63, %v5740_v29  ;;  %v5792_v45 = vmul.f32 1.4142135, %v2734_v62 }
 0x1b3   :  { %7973 = vst [vmem:[#allocation142_spill] sm:$0xff] %v5740_v29  ;;  %v3295_v39 = vpack.c.bf16 %v3246_v0, %v3246_v0  ;;  %v1090_v0 = vadd.f32 %v5372_v52, %v1089_v34  ;;  %v1407_v34 = vmax.f32 %v5201_v54, %v5626_v6  ;;  %v369_v22 = vadd.f32 %v5372_v52, %v368_v56 }
 0x1b4   :  { %7978 = vst [vmem:[#allocation147_spill] sm:$0xff] %v5788_v25 }
 0x1b5   :  { %3345 = vst.msk [vmem:[%s7520_s3 + $0x3c] sm:$0xf] %vm3329_vm3, %v3295_v39  ;;  %v5786_v10 = vmul.f32 1.4142135, %v1090_v0  ;;  %v5811_v63 = vmul.f32 1.4142135, %v369_v22  ;;  %v684_v22 = vmax.f32 %v5245_v55, %v5664_v41 }
 0x1b6   :  { %2118 = vrot.lane.b32.xlu1 %v5742_v53, %s4472_s27  ;;  %2940 = vrot.lane.b32.xlu2 %v5744_v14, %s4472_s27  ;;  %7979 = vst [vmem:[#allocation148_spill] sm:$0xff] %v5792_v45  ;;  %v1914_v14 = vpop.f32.mrf.mxu2 }
 0x1b7   :  { %574 = vrot.lane.b32.xlu0 %v5762_v16, %s4472_s27  ;;  %v1505_v16 = vadd.f32 %v1407_v34, %v683_v37  ;;  %v1915_v0 = vadd.f32 %v5372_v52, %v1914_v14  ;;  %v2736_v56 = vpop.f32.mrf.mxu3 }
 0x1b8   :  { %v3527_v39 = vpop.permute.xlu1 %3526  ;;  %v5773_v3 = vpop.permute.xlu2 %2102 }
 0x1b9   :  { %7976 = vst [vmem:[#allocation145_spill] sm:$0xff] %v5773_v3  ;;  %v5782_v43 = vpop.permute.xlu0 %1278  ;;  %v1092_v30 = vpop.f32.mrf.mxu1  ;;  %v2327_v62 = vadd.f32 %v2229_v59, %v1505_v16  ;;  %v5815_v54 = vmul.f32 1.4142135, %v1915_v0  ;;  %v4438_v16 = vld [vmem:[%s7519_s0 + $0x238] sm:$0xff]  ;;  %v2737_v59 = vadd.f32 %v5372_v52, %v2736_v56  ;;  %v4388_v56 = vld [vmem:[%s7519_s0 + $0xb0] sm:$0xff] }
 0x1ba   :  { %3674 = vst.msk [vmem:[%s7520_s3] sm:$0xf] %vm3673_vm4, %v3527_v39  ;;  %v1093_v39 = vadd.f32 %v5372_v52, %v1092_v30  ;;  %v1408_v6 = vmax.f32 %v5247_v11, %v5782_v43  ;;  %3853 = vmatmul.msk.bf16.gmra.mxu0 %vm206_vm2, %v4388_v56 }
 0x1bb   :  { %7977 = vst [vmem:[#allocation146_spill] sm:$0xff] %v5782_v43  ;;  %v5850_v11 = vmul.f32 1.4142135, %v2737_v59 }
 0x1bc   :  { %v5813_v29 = vmul.f32 1.4142135, %v1093_v39 }
 0x1be   :  { %1298 = vrot.lane.b32.xlu1 %v5786_v10, %s4472_s27  ;;  %2120 = vrot.lane.b32.xlu2 %v5788_v25, %s4472_s27  ;;  %v370_v25 = vpop.f32.mrf.mxu0 }
 0x1bf   :  { %2942 = vrot.lane.b32.xlu0 %v5792_v45, %s4472_s27  ;;  %v371_v0 = vadd.f32 %v5372_v52, %v370_v25 }
 0x1c0   :  { %v5803_v61 = vpop.permute.xlu1 %2920  ;;  %v5805_v37 = vpop.permute.xlu2 %1282  ;;  %4193 = vmatmul.msk.bf16.gmra.mxu2 %vm206_vm2, %v4438_v16 }
 0x1c1   :  { %7980 = vst [vmem:[#allocation149_spill] sm:$0xff] %v5803_v61  ;;  %v3051_v30 = vmax.f32 %v5278_v46, %v5803_v61  ;;  %v5809_v34 = vpop.permute.xlu0 %556  ;;  %v1094_v46 = vpop.f32.mrf.mxu1  ;;  %v5863_v59 = vmul.f32 1.4142135, %v371_v0 }
 0x1c2   :  { %7981 = vst [vmem:[#allocation150_spill] sm:$0xff] %v5805_v37  ;;  %v1095_v25 = vadd.f32 %v5372_v52, %v1094_v46  ;;  %v3052_v46 = vmax.f32 %v5317_v24, %v5734_v19  ;;  %v2231_v19 = vmax.f32 %v5343_v28, %v5773_v3 }
 0x1c3   :  { %7982 = vst [vmem:[#allocation151_spill] sm:$0xff] %v5809_v34  ;;  %v3149_v14 = vadd.f32 %v3051_v30, %v2327_v62 }
 0x1c5   :  { %v3247_v45 = vmul.f32 0.25, %v3149_v14  ;;  %v4414_v14 = vld [vmem:[%s7519_s0 + $0x174] sm:$0xff] }
 0x1c6   :  { %576 = vrot.lane.b32.xlu1 %v5811_v63, %s4472_s27  ;;  %1300 = vrot.lane.b32.xlu2 %v5813_v29, %s4472_s27  ;;  %v373_v56 = vpop.f32.mrf.mxu0 }
 0x1c7   :  { %v3296_v39 = vpack.c.bf16 %v3247_v45, %v3247_v45  ;;  %2122 = vrot.lane.b32.xlu0 %v5815_v54, %s4472_s27  ;;  %v1506_v45 = vadd.f32 %v1408_v6, %v684_v22  ;;  %4023 = vmatmul.msk.bf16.gmra.mxu1 %vm206_vm2, %v4414_v14  ;;  %v4462_v6 = vld [vmem:[%s7519_s0 + $0x2fc] sm:$0xff]  ;;  %v374_v24 = vadd.f32 %v5372_v52, %v373_v56 }
 0x1c8   :  { %v5833_v62 = vpop.permute.xlu1 %2100  ;;  %v5835_v30 = vpop.permute.xlu2 %560  ;;  %4363 = vmatmul.msk.bf16.gmra.mxu3 %vm206_vm2, %v4462_v6  ;;  %v685_v6 = vmax.f32 %v5288_v21, %v5809_v34 }
 0x1c9   :  { %7983 = vst [vmem:[#allocation152_spill] sm:$0xff] %v5833_v62  ;;  %v2230_v16 = vmax.f32 %v5315_v2, %v5833_v62  ;;  %v3531_v61 = vpop.permute.xlu0 %3530  ;;  %v1916_v2 = vpop.f32.mrf.mxu2  ;;  %v5866_v62 = vmul.f32 1.4142135, %v1095_v25 }
 0x1ca   :  { %7984 = vst [vmem:[#allocation153_spill] sm:$0xff] %v5835_v30  ;;  %v1917_v0 = vadd.f32 %v5372_v52, %v1916_v2  ;;  %v5893_v2 = vmul.f32 1.4142135, %v374_v24 }
 0x1cb   :  { %3346 = vst.msk [vmem:[%s7520_s3 + $0x40] sm:$0xf] %vm3329_vm3, %v3296_v39  ;;  %v2328_v22 = vadd.f32 %v2230_v16, %v1506_v45  ;;  %v2738_v39 = vpop.f32.mrf.mxu3 }
 0x1cc   :  { %3676 = vst.msk [vmem:[%s7520_s3 + $0x8] sm:$0xf] %vm3673_vm4, %v3531_v61  ;;  %v2739_v45 = vadd.f32 %v5372_v52, %v2738_v39  ;;  %v5895_v21 = vmul.f32 1.4142135, %v1917_v0 }
 0x1cd   :  { %v3150_v61 = vadd.f32 %v3052_v46, %v2328_v22 }
 0x1ce   :  { %2944 = vrot.lane.b32.xlu1 %v5850_v11, %s4472_s27  ;;  %578 = vrot.lane.b32.xlu2 %v5863_v59, %s4472_s27  ;;  %v375_v0 = vpop.f32.mrf.mxu0 }
 0x1cf   :  { %v3248_v14 = vmul.f32 0.25, %v3150_v61  ;;  %1302 = vrot.lane.b32.xlu0 %v5866_v62, %s4472_s27  ;;  %v1097_v61 = vpop.f32.mrf.mxu1 }
 0x1d0   :  { %v5877_v25 = vpop.permute.xlu1 %1280  ;;  %v5879_v16 = vpop.permute.xlu2 %2928  ;;  %v1098_v28 = vadd.f32 %v5372_v52, %v1097_v61 }
 0x1d1   :  { %7985 = vst [vmem:[#allocation154_spill] sm:$0xff] %v5877_v25  ;;  %v3297_v46 = vpack.c.bf16 %v3248_v14, %v3248_v14  ;;  %v1409_v22 = vmax.f32 %v5341_v47, %v5877_v25  ;;  %v5885_v56 = vpop.permute.xlu0 %2924  ;;  %v5897_v14 = vmul.f32 1.4142135, %v2739_v45  ;;  %v1919_v34 = vpop.f32.mrf.mxu2 }
 0x1d2   :  { %7986 = vst [vmem:[#allocation155_spill] sm:$0xff] %v5879_v16  ;;  %v3053_v25 = vmax.f32 %v5348_v32, %v5885_v56  ;;  %v1920_v3 = vadd.f32 %v5372_v52, %v1919_v34  ;;  %v5918_v61 = vmul.f32 1.4142135, %v1098_v28 }
 0x1d3   :  { %7987 = vst [vmem:[#allocation156_spill] sm:$0xff] %v5885_v56  ;;  %v1507_v39 = vadd.f32 %v1409_v22, %v685_v6  ;;  %v2741_v43 = vpop.f32.mrf.mxu3  ;;  %v4389_v56 = vld [vmem:[%s7519_s0 + $0xb8] sm:$0xff] }
 0x1d4   :  { %3347 = vst.msk [vmem:[%s7520_s3 + $0x44] sm:$0xf] %vm3329_vm3, %v3297_v46  ;;  %v2742_v45 = vadd.f32 %v5372_v52, %v2741_v43  ;;  %v4439_v43 = vld [vmem:[%s7519_s0 + $0x240] sm:$0xff]  ;;  %3854 = vmatmul.msk.bf16.gmra.mxu0 %vm206_vm2, %v4389_v56 }
 0x1d5   :  { %v2329_v47 = vadd.f32 %v2231_v19, %v1507_v39  ;;  %v5920_v39 = vmul.f32 1.4142135, %v1920_v3  ;;  %4194 = vmatmul.msk.bf16.gmra.mxu2 %vm206_vm2, %v4439_v43  ;;  %v376_v43 = vadd.f32 %v5372_v52, %v375_v0 }
 0x1d6   :  { %2124 = vrot.lane.b32.xlu1 %v5895_v21, %s4472_s27  ;;  %2946 = vrot.lane.b32.xlu2 %v5897_v14, %s4472_s27  ;;  %v5927_v32 = vmul.f32 1.4142135, %v2742_v45  ;;  %v4463_v45 = vld [vmem:[%s7519_s0 + $0x304] sm:$0xff] }
 0x1d7   :  { %v3151_v24 = vadd.f32 %v3053_v25, %v2329_v47  ;;  %580 = vrot.lane.b32.xlu0 %v5893_v2, %s4472_s27  ;;  %v1410_v47 = vmax.f32 %v5397_v51, %v5805_v37 }
 0x1d8   :  { %v5910_v19 = vpop.permute.xlu1 %558  ;;  %v5912_v6 = vpop.permute.xlu2 %2108  ;;  %7991 = vst [vmem:[#allocation160_spill] sm:$0xff] %v5927_v32  ;;  %4364 = vmatmul.msk.bf16.gmra.mxu3 %vm206_vm2, %v4463_v45  ;;  %v5965_v45 = vmul.f32 1.4142135, %v376_v43 }
 0x1d9   :  { %7988 = vst [vmem:[#allocation157_spill] sm:$0xff] %v5910_v19  ;;  %v3249_v46 = vmul.f32 0.25, %v3151_v24  ;;  %v686_v34 = vmax.f32 %v5395_v27, %v5910_v19  ;;  %v5916_v22 = vpop.permute.xlu0 %2104  ;;  %v1099_v24 = vpop.f32.mrf.mxu1 }
 0x1da   :  { %7989 = vst [vmem:[#allocation158_spill] sm:$0xff] %v5912_v6  ;;  %v2232_v3 = vmax.f32 %v5399_v58, %v5916_v22  ;;  %v1100_v56 = vadd.f32 %v5372_v52, %v1099_v24  ;;  %v4415_v58 = vld [vmem:[%s7519_s0 + $0x17c] sm:$0xff] }
 0x1db   :  { %7990 = vst [vmem:[#allocation159_spill] sm:$0xff] %v5916_v22  ;;  %v3298_v25 = vpack.c.bf16 %v3249_v46, %v3249_v46  ;;  %v1508_v28 = vadd.f32 %v1410_v47, %v686_v34  ;;  %v2743_v51 = vpop.f32.mrf.mxu3  ;;  %v1921_v46 = vpop.f32.mrf.mxu2  ;;  %4024 = vmatmul.msk.bf16.gmra.mxu1 %vm206_vm2, %v4415_v58 }
 0x1dc   :  { %v378_v34 = vpop.f32.mrf.mxu0  ;;  %v1922_v37 = vadd.f32 %v5372_v52, %v1921_v46  ;;  %v5967_v55 = vmul.f32 1.4142135, %v1100_v56 }
 0x1dd   :  { %3348 = vst.msk [vmem:[%s7520_s3 + $0x48] sm:$0xf] %vm3329_vm3, %v3298_v25  ;;  %v2330_v22 = vadd.f32 %v2232_v3, %v1508_v28  ;;  %v379_v46 = vadd.f32 %v5372_v52, %v378_v34 }
 0x1de   :  { %1304 = vrot.lane.b32.xlu1 %v5918_v61, %s4472_s27  ;;  %2126 = vrot.lane.b32.xlu2 %v5920_v39, %s4472_s27  ;;  %v5969_v41 = vmul.f32 1.4142135, %v1922_v37 }
 0x1df   :  { %2948 = vrot.lane.b32.xlu0 %v5927_v32, %s4472_s27 }
 0x1e0   :  { %v5952_v47 = vpop.permute.xlu1 %2926  ;;  %v5954_v25 = vpop.permute.xlu2 %1288 }
 0x1e1   :  { %7992 = vst [vmem:[#allocation161_spill] sm:$0xff] %v5952_v47  ;;  %v3054_v27 = vmax.f32 %v5430_v40, %v5952_v47  ;;  %v5962_v19 = vpop.permute.xlu0 %1284  ;;  %v1102_v24 = vpop.f32.mrf.mxu1  ;;  %v5996_v40 = vmul.f32 1.4142135, %v379_v46 }
 0x1e2   :  { %7993 = vst [vmem:[#allocation162_spill] sm:$0xff] %v5954_v25  ;;  %v1411_v28 = vmax.f32 %v5424_v20, %v5962_v19  ;;  %v1103_v37 = vadd.f32 %v5372_v52, %v1102_v24 }
 0x1e3   :  { %7994 = vst [vmem:[#allocation163_spill] sm:$0xff] %v5962_v19  ;;  %v3152_v0 = vadd.f32 %v3054_v27, %v2330_v22  ;;  %v2746_v3 = vpop.f32.mrf.mxu3  ;;  %v687_v27 = vmax.f32 %v5420_v13, %v5835_v30  ;;  %v2744_v22 = vadd.f32 %v5372_v52, %v2743_v51  ;;  %v3055_v51 = vmax.f32 %v5456_v18, %v5879_v16  ;;  %v1924_v30 = vpop.f32.mrf.mxu2 }
 0x1e4   :  { %v380_v24 = vpop.f32.mrf.mxu0  ;;  %7998 = vst [vmem:[#allocation167_spill] sm:$0xff] %v5996_v40  ;;  %v6000_v47 = vmul.f32 1.4142135, %v1103_v37  ;;  %v2747_v46 = vadd.f32 %v5372_v52, %v2746_v3 }
 0x1e5   :  { %v3250_v32 = vmul.f32 0.25, %v3152_v0  ;;  %v1509_v56 = vadd.f32 %v1411_v28, %v687_v27  ;;  %v6002_v20 = vmul.f32 1.4142135, %v2744_v22  ;;  %v63_v28 = vld [vmem:[%s7519_s0 + $0xc0] sm:$0xf]  ;;  %v1925_v27 = vadd.f32 %v5372_v52, %v1924_v30 }
 0x1e6   :  { %582 = vrot.lane.b32.xlu1 %v5965_v45, %s4472_s27  ;;  %1306 = vrot.lane.b32.xlu2 %v5967_v55, %s4472_s27  ;;  %7999 = vst [vmem:[#allocation168_spill] sm:$0xff] %v6000_v47  ;;  %v169_v37 = vunpack.c.l.b16 %v63_v28  ;;  %v4244_v22 = vld [vmem:[%s7519_s0 + $0x30c] sm:$0xf] }
 0x1e7   :  { %v3299_v58 = vpack.c.bf16 %v3250_v32, %v3250_v32  ;;  %2128 = vrot.lane.b32.xlu0 %v5969_v41, %s4472_s27 }
 0x1e8   :  { %v5984_v43 = vpop.permute.xlu1 %2106  ;;  %v5986_v34 = vpop.permute.xlu2 %566  ;;  %v194_v3 = vpack.c.b16 %v169_v37, %v169_v37  ;;  %v6034_v37 = vmul.f32 1.4142135, %v2747_v46 }
 0x1e9   :  { %7995 = vst [vmem:[#allocation164_spill] sm:$0xff] %v5984_v43  ;;  %v2233_v32 = vmax.f32 %v5454_v4, %v5984_v43  ;;  %v5994_v0 = vpop.permute.xlu0 %562 }
 0x1ea   :  { %7996 = vst [vmem:[#allocation165_spill] sm:$0xff] %v5986_v34  ;;  %v688_v16 = vmax.f32 %v5471_v36, %v5994_v0  ;;  %3855 = vmatmul.msk.bf16.gmra.mxu0 %vm206_vm2, %v194_v3 }
 0x1eb   :  { %3349 = vst.msk [vmem:[%s7520_s3 + $0x4c] sm:$0xf] %vm3329_vm3, %v3299_v58  ;;  %v2331_v13 = vadd.f32 %v2233_v32, %v1509_v56  ;;  %v1104_v58 = vpop.f32.mrf.mxu1 }
 0x1ec   :  { %7997 = vst [vmem:[#allocation166_spill] sm:$0xff] %v5994_v0  ;;  %v383_v43 = vpop.f32.mrf.mxu0 }
 0x1ed   :  { %v3153_v19 = vadd.f32 %v3055_v51, %v2331_v13  ;;  %v2748_v13 = vpop.f32.mrf.mxu3  ;;  %v2556_v51 = vunpack.c.l.b16 %v4244_v22 }
 0x1ee   :  { %2950 = vrot.lane.b32.xlu1 %v6002_v20, %s4472_s27  ;;  %584 = vrot.lane.b32.xlu2 %v5996_v40, %s4472_s27  ;;  %v6032_v40 = vmul.f32 1.4142135, %v1925_v27  ;;  %v1926_v27 = vpop.f32.mrf.mxu2 }
 0x1ef   :  { %v3251_v56 = vmul.f32 0.25, %v3153_v19  ;;  %1308 = vrot.lane.b32.xlu0 %v6000_v47, %s4472_s27  ;;  %v381_v19 = vadd.f32 %v5372_v52, %v380_v24  ;;  %v3904_v47 = vld [vmem:[%s7519_s0 + $0x184] sm:$0xf]  ;;  %v2234_v24 = vmax.f32 %v5500_v60, %v5912_v6 }
 0x1f0   :  { %v6018_v32 = vpop.permute.xlu1 %1286  ;;  %v6020_v30 = vpop.permute.xlu2 %2934  ;;  %v912_v36 = vunpack.c.l.b16 %v3904_v47  ;;  %v1105_v47 = vadd.f32 %v5372_v52, %v1104_v58  ;;  %v4074_v58 = vld [vmem:[%s7519_s0 + $0x248] sm:$0xf] }
 0x1f1   :  { %8000 = vst [vmem:[#allocation169_spill] sm:$0xff] %v6018_v32  ;;  %v3300_v18 = vpack.c.bf16 %v3251_v56, %v3251_v56  ;;  %v1412_v28 = vmax.f32 %v5498_v8, %v6018_v32  ;;  %v6027_v4 = vpop.permute.xlu0 %2930  ;;  %v2581_v56 = vpack.c.b16 %v2556_v51, %v2556_v51  ;;  %v6044_v0 = vmul.f32 1.4142135, %v381_v19 }
 0x1f2   :  { %8001 = vst [vmem:[#allocation170_spill] sm:$0xff] %v6020_v30  ;;  %v3056_v3 = vmax.f32 %v5502_v9, %v6027_v4  ;;  %v937_v60 = vpack.c.b16 %v912_v36, %v912_v36  ;;  %v1927_v19 = vadd.f32 %v5372_v52, %v1926_v27  ;;  %v1413_v27 = vmax.f32 %v5531_v35, %v5954_v25 }
 0x1f3   :  { %8002 = vst [vmem:[#allocation171_spill] sm:$0xff] %v6027_v4  ;;  %v1510_v22 = vadd.f32 %v1412_v28, %v688_v16  ;;  %4365 = vmatmul.msk.bf16.gmra.mxu3 %vm206_vm2, %v2581_v56  ;;  %v1107_v51 = vpop.f32.mrf.mxu1  ;;  %v6071_v4 = vmul.f32 1.4142135, %v1105_v47  ;;  %v384_v35 = vadd.f32 %v5372_v52, %v383_v43 }
 0x1f4   :  { %3350 = vst.msk [vmem:[%s7520_s3 + $0x50] sm:$0xf] %vm3329_vm3, %v3300_v18  ;;  %4025 = vmatmul.msk.bf16.gmra.mxu1 %vm206_vm2, %v937_v60  ;;  %v385_v9 = vpop.f32.mrf.mxu0  ;;  %v6073_v60 = vmul.f32 1.4142135, %v1927_v19 }
 0x1f5   :  { %v2332_v46 = vadd.f32 %v2234_v24, %v1510_v22  ;;  %v2751_v16 = vpop.f32.mrf.mxu3  ;;  %v2749_v22 = vadd.f32 %v5372_v52, %v2748_v13 }
 0x1f6   :  { %2130 = vrot.lane.b32.xlu1 %v6032_v40, %s4472_s27  ;;  %2952 = vrot.lane.b32.xlu2 %v6034_v37, %s4472_s27  ;;  %v1929_v47 = vpop.f32.mrf.mxu2 }
 0x1f7   :  { %v3154_v18 = vadd.f32 %v3056_v3, %v2332_v46  ;;  %586 = vrot.lane.b32.xlu0 %v6044_v0, %s4472_s27  ;;  %v6079_v13 = vmul.f32 1.4142135, %v2749_v22  ;;  %v6092_v22 = vld [vmem:[%s7518_s2] ss:$0 sm:$0xff] }
 0x1f8   :  { %v6056_v28 = vpop.permute.xlu1 %564  ;;  %v6058_v56 = vpop.permute.xlu2 %2114 }
 0x1f9   :  { %8003 = vst [vmem:[#allocation172_spill] sm:$0xff] %v6056_v28  ;;  %v3252_v24 = vmul.f32 0.25, %v3154_v18  ;;  %v689_v36 = vmax.f32 %v5529_v7, %v6056_v28  ;;  %v6064_v46 = vpop.permute.xlu0 %2110  ;;  %v1734_v18 = vunpack.c.l.b16 %v4074_v58 }
 0x1fa   :  { %8004 = vst [vmem:[#allocation173_spill] sm:$0xff] %v6064_v46  ;;  %v2235_v7 = vmax.f32 %v5535_v38, %v6064_v46  ;;  %v6106_v38 = vmul.f32 1.4142135, %v384_v35  ;;  %v690_v35 = vmax.f32 %v5579_v42, %v5986_v34 }
 0x1fb   :  { %v3301_v3 = vpack.c.bf16 %v3252_v24, %v3252_v24  ;;  %v1511_v6 = vadd.f32 %v1413_v27, %v689_v36  ;;  %v1108_v24 = vadd.f32 %v5372_v52, %v1107_v51  ;;  %v1759_v19 = vpack.c.b16 %v1734_v18, %v1734_v18  ;;  %v1109_v43 = vpop.f32.mrf.mxu1 }
 0x1fc   :  { %v1930_v36 = vadd.f32 %v6092_v22, %v1929_v47  ;;  %v388_v28 = vpop.f32.mrf.mxu0 }
 0x1fd   :  { %3351 = vst.msk [vmem:[%s7520_s3 + $0x54] sm:$0xf] %vm3329_vm3, %v3301_v3  ;;  %4195 = vmatmul.msk.bf16.gmra.mxu2 %vm206_vm2, %v1759_v19  ;;  %v2333_v58 = vadd.f32 %v2235_v7, %v1511_v6  ;;  %v2753_v18 = vpop.f32.mrf.mxu3  ;;  %v6108_v47 = vmul.f32 1.4142135, %v1108_v24  ;;  %v2752_v7 = vadd.f32 %v6092_v22, %v2751_v16 }
 0x1fe   :  { %1310 = vrot.lane.b32.xlu1 %v6071_v4, %s4472_s27  ;;  %2132 = vrot.lane.b32.xlu2 %v6073_v60, %s4472_s27  ;;  %v6110_v46 = vmul.f32 1.4142135, %v1930_v36 }
 0x1ff   :  { %2954 = vrot.lane.b32.xlu0 %v6079_v13, %s4472_s27 }
 0x200   :  { %v6097_v52 = vpop.permute.xlu1 %2932  ;;  %v6099_v51 = vpop.permute.xlu2 %1294 }
 0x201   :  { %8005 = vst [vmem:[#allocation174_spill] sm:$0xff] %v6097_v52  ;;  %v3057_v27 = vmax.f32 %v5566_v57, %v6097_v52  ;;  %v6104_v3 = vpop.permute.xlu0 %1290  ;;  %v6135_v52 = vmul.f32 1.4142135, %v2752_v7 }
 0x202   :  { %8006 = vst [vmem:[#allocation175_spill] sm:$0xff] %v6104_v3  ;;  %v1414_v32 = vmax.f32 %v5582_v33, %v6104_v3  ;;  %v1931_v33 = vpop.f32.mrf.mxu2 }
 0x203   :  { %v3155_v25 = vadd.f32 %v3057_v27, %v2333_v58  ;;  %v1112_v24 = vpop.f32.mrf.mxu1  ;;  %v1110_v58 = vadd.f32 %v6092_v22, %v1109_v43  ;;  %8008 = vst [vmem:[#allocation177_spill] sm:$0xff] %v6135_v52  ;;  %v389_v43 = vadd.f32 %v6092_v22, %v388_v28 }
 0x204   :  { %v1512_v16 = vadd.f32 %v1414_v32, %v690_v35  ;;  %v6143_v32 = vpop.f32.mrf.mxu0  ;;  %v1932_v35 = vadd.f32 %v6092_v22, %v1931_v33  ;;  %v2237_v33 = vmax.f32 %v5636_v48, %v6058_v56 }
 0x205   :  { %v3253_v8 = vmul.f32 0.25, %v3155_v25  ;;  %v386_v25 = vadd.f32 %v6092_v22, %v385_v9  ;;  %v2756_v57 = vpop.f32.mrf.mxu3  ;;  %v3058_v9 = vmax.f32 %v5609_v49, %v6020_v30  ;;  %v6141_v3 = vmul.f32 1.4142135, %v1110_v58 }
 0x206   :  { %588 = vrot.lane.b32.xlu1 %v6106_v38, %s4472_s27  ;;  %1312 = vrot.lane.b32.xlu2 %v6108_v47, %s4472_s27  ;;  %v6160_v30 = vmul.f32 1.4142135, %v389_v43 }
 0x207   :  { %v3302_v6 = vpack.c.bf16 %v3253_v8, %v3253_v8  ;;  %2134 = vrot.lane.b32.xlu0 %v6110_v46, %s4472_s27  ;;  %v6139_v34 = vmul.f32 1.4142135, %v386_v25  ;;  %8010 = vst [vmem:[#allocation179_spill] sm:$0xff] %v6141_v3  ;;  %v2754_v25 = vadd.f32 %v6092_v22, %v2753_v18  ;;  %v2286_v18 = vmin.f32 %v5636_v48, %v6058_v56 }
 0x208   :  { %v6124_v19 = vpop.permute.xlu1 %2112  ;;  %v6126_v36 = vpop.permute.xlu2 %572 }
 0x209   :  { %8007 = vst [vmem:[#allocation176_spill] sm:$0xff] %v6124_v19  ;;  %v2236_v8 = vmax.f32 %v5607_v23, %v6124_v19  ;;  %v569_v27 = vpop.permute.xlu0 %568  ;;  %v6174_v43 = vmul.f32 1.4142135, %v2754_v25  ;;  %v2757_v25 = vadd.f32 %v6092_v22, %v2756_v57 }
 0x20a   :  { %3352 = vst.msk [vmem:[%s7520_s3 + $0x58] sm:$0xf] %vm3329_vm3, %v3302_v6 }
 0x20b   :  { %v2334_v42 = vadd.f32 %v2236_v8, %v1512_v16  ;;  %8009 = vst [vmem:[#allocation178_spill] sm:$0xff] %v6139_v34  ;;  %v740_v8 = vmin.f32 %v5605_v1, %v569_v27 }
 0x20c   :  { %v393_v56 = vpop.f32.mrf.mxu0 }
 0x20d   :  { %v3156_v6 = vadd.f32 %v3058_v9, %v2334_v42  ;;  %v691_v42 = vmax.f32 %v5605_v1, %v569_v27  ;;  %v1114_v27 = vpop.f32.mrf.mxu1  ;;  %v6170_v23 = vpop.f32.mrf.mxu3 }
 0x20e   :  { %2956 = vrot.lane.b32.xlu1 %v6135_v52, %s4472_s27  ;;  %590 = vrot.lane.b32.xlu2 %v6139_v34, %s4472_s27  ;;  %v1113_v52 = vadd.f32 %v6092_v22, %v1112_v24  ;;  %v1465_v24 = vmin.f32 %v5685_v26, %v6099_v51 }
 0x20f   :  { %v3254_v7 = vmul.f32 0.25, %v3156_v6  ;;  %1314 = vrot.lane.b32.xlu0 %v6141_v3, %s4472_s27 }
 0x210   :  { %v1293_v16 = vpop.permute.xlu1 %1292  ;;  %v6155_v58 = vpop.permute.xlu2 %2940 }
 0x211   :  { %v3303_v28 = vpack.c.bf16 %v3254_v7, %v3254_v7  ;;  %v1415_v9 = vmax.f32 %v5634_v31, %v1293_v16  ;;  %v1464_v49 = vmin.f32 %v5634_v31, %v1293_v16  ;;  %v2937_v6 = vpop.permute.xlu0 %2936  ;;  %v6172_v31 = vmul.f32 1.4142135, %v1932_v35  ;;  %v1934_v16 = vpop.f32.mrf.mxu2 }
 0x212   :  { %v3059_v34 = vmax.f32 %v5641_v5, %v2937_v6  ;;  %v3108_v48 = vmin.f32 %v5641_v5, %v2937_v6 }
 0x213   :  { %3353 = vst.msk [vmem:[%s7520_s3 + $0x5c] sm:$0xf] %vm3329_vm3, %v3303_v28  ;;  %v1513_v7 = vadd.f32 %v1415_v9, %v691_v42  ;;  %v1562_v1 = vadd.f32 %v1464_v49, %v740_v8  ;;  %v1935_v42 = vadd.f32 %v6092_v22, %v1934_v16 }
 0x215   :  { %v2335_v19 = vadd.f32 %v2237_v33, %v1513_v7  ;;  %v2384_v3 = vadd.f32 %v2286_v18, %v1562_v1  ;;  %v6202_v7 = vmul.f32 1.4142135, %v2757_v25  ;;  %v1117_v16 = vpop.f32.mrf.mxu1  ;;  %v1115_v25 = vadd.f32 %v6092_v22, %v1114_v27 }
 0x216   :  { %2136 = vrot.lane.b32.xlu1 %v6172_v31, %s4472_s27  ;;  %2958 = vrot.lane.b32.xlu2 %v6174_v43, %s4472_s27 }
 0x217   :  { %v3157_v49 = vadd.f32 %v3059_v34, %v2335_v19  ;;  %v6184_v35 = vadd.f32 %v3108_v48, %v2384_v3  ;;  %592 = vrot.lane.b32.xlu0 %v6160_v30, %s4472_s27  ;;  %v6195_v34 = vmul.f32 1.4142135, %v1113_v52  ;;  %v6197_v3 = vmul.f32 1.4142135, %v1935_v42  ;;  %8012 = vst [vmem:[#allocation181_spill] sm:$0xff] %v6202_v7  ;;  %v2761_v48 = vpop.f32.mrf.mxu3 }
 0x218   :  { %v571_v5 = vpop.permute.xlu1 %570  ;;  %v6189_v28 = vpop.permute.xlu2 %2120  ;;  %v1416_v19 = vmax.f32 %v5685_v26, %v6099_v51  ;;  %v391_v51 = vadd.f32 %v6092_v22, %v6143_v32 }
 0x219   :  { %8011 = vst [vmem:[#allocation180_spill] sm:$0xff] %v6184_v35  ;;  %v3255_v8 = vmul.f32 0.25, %v3157_v49  ;;  %v692_v9 = vmax.f32 %v5683_v44, %v571_v5  ;;  %v741_v6 = vmin.f32 %v5683_v44, %v571_v5  ;;  %v2117_v33 = vpop.permute.xlu0 %2116  ;;  %v1936_v49 = vpop.f32.mrf.mxu2 }
 0x21a   :  { %v2287_v57 = vmin.f32 %v5687_v50, %v2117_v33  ;;  %v2238_v52 = vmax.f32 %v5687_v50, %v2117_v33  ;;  %v395_v26 = vpop.f32.mrf.mxu0  ;;  %v6228_v27 = vmul.f32 1.4142135, %v391_v51 }
 0x21b   :  { %v3304_v18 = vpack.c.bf16 %v3255_v8, %v3255_v8  ;;  %v1563_v1 = vadd.f32 %v1465_v24, %v741_v6  ;;  %v1514_v44 = vadd.f32 %v1416_v19, %v692_v9  ;;  %v1937_v8 = vadd.f32 %v6092_v22, %v1936_v49 }
 0x21d   :  { %3354 = vst.msk [vmem:[%s7520_s3 + $0x60] sm:$0xf] %vm3329_vm3, %v3304_v18  ;;  %v2385_v42 = vadd.f32 %v2287_v57, %v1563_v1  ;;  %v2336_v50 = vadd.f32 %v2238_v52, %v1514_v44  ;;  %v742_v57 = vmin.f32 %v5710_v12, %v6126_v36  ;;  %v6230_v1 = vmul.f32 1.4142135, %v1115_v25 }
 0x21e   :  { %1316 = vrot.lane.b32.xlu1 %v6195_v34, %s4472_s27  ;;  %2138 = vrot.lane.b32.xlu2 %v6197_v3, %s4472_s27  ;;  %v6232_v52 = vmul.f32 1.4142135, %v1937_v8 }
 0x21f   :  { %2960 = vrot.lane.b32.xlu0 %v6202_v7, %s4472_s27  ;;  %v394_v7 = vadd.f32 %v6092_v22, %v393_v56  ;;  %v2759_v56 = vadd.f32 %v6092_v22, %v6170_v23  ;;  %v8016_v23 = vld [vmem:[#allocation143_spill] sm:$0xff] }
 0x220   :  { %v2939_v5 = vpop.permute.xlu1 %2938  ;;  %v6218_v24 = vpop.permute.xlu2 %1300 }
 0x221   :  { %v3060_v9 = vmax.f32 %v5720_v15, %v2939_v5  ;;  %v3109_v6 = vmin.f32 %v5720_v15, %v2939_v5  ;;  %v1297_v33 = vpop.permute.xlu0 %1296  ;;  %v6235_v15 = vpop.f32.mrf.mxu1 }
 0x222   :  { %v1466_v19 = vmin.f32 %v5714_v17, %v1297_v33  ;;  %v1417_v35 = vmax.f32 %v5714_v17, %v1297_v33  ;;  %v6237_v5 = vpop.f32.mrf.mxu3  ;;  %v6249_v17 = vpop.f32.mrf.mxu0  ;;  %v6261_v33 = vmul.f32 1.4142135, %v394_v7 }
 0x223   :  { %v3158_v18 = vadd.f32 %v3060_v9, %v2336_v50  ;;  %v6226_v32 = vadd.f32 %v3109_v6, %v2385_v42  ;;  %v1118_v50 = vadd.f32 %v6092_v22, %v1117_v16  ;;  %v693_v42 = vmax.f32 %v5710_v12, %v6126_v36  ;;  %v1939_v9 = vpop.f32.mrf.mxu2 }
 0x224   :  { %v1564_v44 = vadd.f32 %v1466_v19, %v742_v57  ;;  %8014 = vst [vmem:[#allocation183_spill] sm:$0xff] %v6261_v33  ;;  %v3061_v19 = vmax.f32 %v8016_v23, %v6155_v58  ;;  %v1940_v7 = vadd.f32 %v6092_v22, %v1939_v9 }
 0x225   :  { %8013 = vst [vmem:[#allocation182_spill] sm:$0xff] %v6226_v32  ;;  %v3256_v49 = vmul.f32 0.25, %v3158_v18  ;;  %v1515_v8 = vadd.f32 %v1417_v35, %v693_v42  ;;  %v6263_v57 = vmul.f32 1.4142135, %v1118_v50  ;;  %v3110_v18 = vmin.f32 %v8016_v23, %v6155_v58 }
 0x226   :  { %594 = vrot.lane.b32.xlu1 %v6228_v27, %s4472_s27  ;;  %1318 = vrot.lane.b32.xlu2 %v6230_v1, %s4472_s27  ;;  %v2762_v50 = vadd.f32 %v6092_v22, %v2761_v48 }
 0x227   :  { %v3305_v51 = vpack.c.bf16 %v3256_v49, %v3256_v49  ;;  %2140 = vrot.lane.b32.xlu0 %v6232_v52, %s4472_s27  ;;  %8015 = vst [vmem:[#allocation184_spill] sm:$0xff] %v6263_v57 }
 0x228   :  { %v2119_v25 = vpop.permute.xlu1 %2118  ;;  %v6253_v16 = vpop.permute.xlu2 %578 }
 0x229   :  { %3355 = vst.msk [vmem:[%s7520_s3 + $0x64] sm:$0xf] %vm3329_vm3, %v3305_v51  ;;  %v2239_v12 = vmax.f32 %v5742_v53, %v2119_v25  ;;  %v2288_v36 = vmin.f32 %v5742_v53, %v2119_v25  ;;  %v575_v6 = vpop.permute.xlu0 %574  ;;  %v6269_v51 = vmul.f32 1.4142135, %v2759_v56  ;;  %v1122_v53 = vpop.f32.mrf.mxu1  ;;  %v396_v56 = vadd.f32 %v6092_v22, %v395_v26 }
 0x22a   :  { %v6273_v25 = vpop.f32.mrf.mxu3 }
 0x22b   :  { %v2337_v49 = vadd.f32 %v2239_v12, %v1515_v8  ;;  %v2386_v32 = vadd.f32 %v2288_v36, %v1564_v44  ;;  %8017 = vst [vmem:[#allocation143_spill] sm:$0xff] %v6269_v51  ;;  %v8019_v44 = vld [vmem:[#allocation144_spill] sm:$0xff] }
 0x22c   :  { %v743_v48 = vmin.f32 %v8019_v44, %v575_v6 }
 0x22d   :  { %v3159_v35 = vadd.f32 %v3061_v19, %v2337_v49  ;;  %v6271_v42 = vadd.f32 %v3110_v18, %v2386_v32  ;;  %v694_v32 = vmax.f32 %v8019_v44, %v575_v6  ;;  %v6290_v18 = vpop.f32.mrf.mxu0  ;;  %v6292_v49 = vmul.f32 1.4142135, %v1940_v7 }
 0x22e   :  { %2962 = vrot.lane.b32.xlu1 %v6269_v51, %s4472_s27  ;;  %596 = vrot.lane.b32.xlu2 %v6261_v33, %s4472_s27  ;;  %v6304_v44 = vmul.f32 1.4142135, %v396_v56 }
 0x22f   :  { %8018 = vst [vmem:[#allocation185_spill] sm:$0xff] %v6271_v42  ;;  %v3257_v58 = vmul.f32 0.25, %v3159_v35  ;;  %1320 = vrot.lane.b32.xlu0 %v6263_v57, %s4472_s27  ;;  %v6294_v35 = vmul.f32 1.4142135, %v2762_v50  ;;  %v8020_v42 = vld [vmem:[#allocation147_spill] sm:$0xff]  ;;  %v8022_v50 = vld [vmem:[#allocation148_spill] sm:$0xff] }
 0x230   :  { %v1299_v8 = vpop.permute.xlu1 %1298  ;;  %v6285_v12 = vpop.permute.xlu2 %2946  ;;  %v2240_v26 = vmax.f32 %v8020_v42, %v6189_v28  ;;  %v2289_v57 = vmin.f32 %v8020_v42, %v6189_v28  ;;  %8021 = vst [vmem:[#allocation144_spill] sm:$0xff] %v6304_v44 }
 0x231   :  { %v3306_v36 = vpack.c.bf16 %v3257_v58, %v3257_v58  ;;  %v1418_v9 = vmax.f32 %v5786_v10, %v1299_v8  ;;  %v1467_v23 = vmin.f32 %v5786_v10, %v1299_v8  ;;  %v2943_v19 = vpop.permute.xlu0 %2942  ;;  %v1941_v58 = vpop.f32.mrf.mxu2 }
 0x232   :  { %v3062_v33 = vmax.f32 %v8022_v50, %v2943_v19  ;;  %v3111_v51 = vmin.f32 %v8022_v50, %v2943_v19  ;;  %v6316_v56 = vpop.f32.mrf.mxu3 }
 0x233   :  { %3356 = vst.msk [vmem:[%s7520_s3 + $0x68] sm:$0xf] %vm3329_vm3, %v3306_v36  ;;  %v1516_v6 = vadd.f32 %v1418_v9, %v694_v32  ;;  %v1565_v10 = vadd.f32 %v1467_v23, %v743_v48  ;;  %v1124_v32 = vpop.f32.mrf.mxu1  ;;  %v1942_v36 = vadd.f32 %v6092_v22, %v1941_v58  ;;  %v2764_v48 = vadd.f32 %v6092_v22, %v6237_v5 }
 0x234   :  { %v1419_v58 = vmax.f32 %v5813_v29, %v6218_v24 }
 0x235   :  { %v2338_v7 = vadd.f32 %v2240_v26, %v1516_v6  ;;  %v2387_v8 = vadd.f32 %v2289_v57, %v1565_v10  ;;  %v1120_v57 = vadd.f32 %v6092_v22, %v6235_v15  ;;  %v6329_v10 = vpop.f32.mrf.mxu0 }
 0x236   :  { %2142 = vrot.lane.b32.xlu1 %v6292_v49, %s4472_s27  ;;  %2964 = vrot.lane.b32.xlu2 %v6294_v35, %s4472_s27 }
 0x237   :  { %v3160_v28 = vadd.f32 %v3062_v33, %v2338_v7  ;;  %v6312_v42 = vadd.f32 %v3111_v51, %v2387_v8  ;;  %598 = vrot.lane.b32.xlu0 %v6304_v44, %s4472_s27  ;;  %v1468_v33 = vmin.f32 %v5813_v29, %v6218_v24  ;;  %v6334_v50 = vmul.f32 1.4142135, %v1120_v57 }
 0x238   :  { %v577_v9 = vpop.permute.xlu1 %576  ;;  %v6323_v23 = vpop.permute.xlu2 %2126  ;;  %v399_v29 = vadd.f32 %v6092_v22, %v6249_v17  ;;  %v1123_v24 = vadd.f32 %v6092_v22, %v1122_v53 }
 0x239   :  { %8023 = vst [vmem:[#allocation147_spill] sm:$0xff] %v6312_v42  ;;  %v3258_v51 = vmul.f32 0.25, %v3160_v28  ;;  %v695_v19 = vmax.f32 %v5811_v63, %v577_v9  ;;  %v744_v26 = vmin.f32 %v5811_v63, %v577_v9  ;;  %v2123_v6 = vpop.permute.xlu0 %2122  ;;  %v1944_v8 = vpop.f32.mrf.mxu2  ;;  %v6336_v42 = vmul.f32 1.4142135, %v1942_v36 }
 0x23a   :  { %v2290_v15 = vmin.f32 %v5815_v54, %v2123_v6  ;;  %v6342_v63 = vmul.f32 1.4142135, %v2764_v48  ;;  %v2241_v9 = vmax.f32 %v5815_v54, %v2123_v6  ;;  %v1945_v57 = vadd.f32 %v6092_v22, %v1944_v8 }
 0x23b   :  { %v3307_v5 = vpack.c.bf16 %v3258_v51, %v3258_v51  ;;  %v1566_v7 = vadd.f32 %v1468_v33, %v744_v26  ;;  %v1517_v28 = vadd.f32 %v1419_v58, %v695_v19  ;;  %v6355_v36 = vpop.f32.mrf.mxu1  ;;  %v6361_v19 = vpop.f32.mrf.mxu3  ;;  %v745_v26 = vmin.f32 %v5863_v59, %v6253_v16 }
 0x23c   :  { %8024 = vst [vmem:[#allocation148_spill] sm:$0xff] %v6342_v63  ;;  %v6365_v6 = vmul.f32 1.4142135, %v399_v29  ;;  %v2767_v29 = vadd.f32 %v6092_v22, %v6273_v25 }
 0x23d   :  { %3357 = vst.msk [vmem:[%s7520_s3 + $0x6c] sm:$0xf] %vm3329_vm3, %v3307_v5  ;;  %v2388_v44 = vadd.f32 %v2290_v15, %v1566_v7  ;;  %v2339_v33 = vadd.f32 %v2241_v9, %v1517_v28  ;;  %v6367_v15 = vmul.f32 1.4142135, %v1123_v24  ;;  %v6370_v5 = vmul.f32 1.4142135, %v1945_v57  ;;  %v6374_v28 = vpop.f32.mrf.mxu0 }
 0x23e   :  { %1322 = vrot.lane.b32.xlu1 %v6334_v50, %s4472_s27  ;;  %2144 = vrot.lane.b32.xlu2 %v6336_v42, %s4472_s27 }
 0x23f   :  { %2966 = vrot.lane.b32.xlu0 %v6342_v63, %s4472_s27 }
 0x240   :  { %v2945_v54 = vpop.permute.xlu1 %2944  ;;  %v6357_v48 = vpop.permute.xlu2 %1306 }
 0x241   :  { %v3063_v17 = vmax.f32 %v5850_v11, %v2945_v54  ;;  %v3112_v53 = vmin.f32 %v5850_v11, %v2945_v54  ;;  %v1303_v51 = vpop.permute.xlu0 %1302  ;;  %v1946_v63 = vpop.f32.mrf.mxu2 }
 0x242   :  { %v1469_v58 = vmin.f32 %v5866_v62, %v1303_v51  ;;  %v1420_v54 = vmax.f32 %v5866_v62, %v1303_v51  ;;  %v401_v62 = vadd.f32 %v6092_v22, %v6290_v18  ;;  %v3064_v18 = vmax.f32 %v5897_v14, %v6285_v12 }
 0x243   :  { %v3161_v7 = vadd.f32 %v3063_v17, %v2339_v33  ;;  %v6372_v8 = vadd.f32 %v3112_v53, %v2388_v44  ;;  %v696_v44 = vmax.f32 %v5863_v59, %v6253_v16  ;;  %v1125_v17 = vadd.f32 %v6092_v22, %v1124_v32  ;;  %v6398_v51 = vpop.f32.mrf.mxu1 }
 0x244   :  { %v1567_v11 = vadd.f32 %v1469_v58, %v745_v26  ;;  %v6400_v26 = vmul.f32 1.4142135, %v2767_v29  ;;  %v3113_v58 = vmin.f32 %v5897_v14, %v6285_v12  ;;  %v1947_v12 = vadd.f32 %v6092_v22, %v1946_v63 }
 0x245   :  { %8025 = vst [vmem:[#allocation186_spill] sm:$0xff] %v6372_v8  ;;  %v3259_v9 = vmul.f32 0.25, %v3161_v7  ;;  %v1518_v25 = vadd.f32 %v1420_v54, %v696_v44  ;;  %v6406_v54 = vpop.f32.mrf.mxu3  ;;  %v6408_v32 = vpop.f32.mrf.mxu0  ;;  %v6410_v44 = vmul.f32 1.4142135, %v401_v62  ;;  %v404_v8 = vadd.f32 %v6092_v22, %v6329_v10 }
 0x246   :  { %600 = vrot.lane.b32.xlu1 %v6365_v6, %s4472_s27  ;;  %1324 = vrot.lane.b32.xlu2 %v6367_v15, %s4472_s27  ;;  %8026 = vst [vmem:[#allocation187_spill] sm:$0xff] %v6400_v26  ;;  %v2292_v63 = vmin.f32 %v5920_v39, %v6323_v23 }
 0x247   :  { %v3308_v24 = vpack.c.bf16 %v3259_v9, %v3259_v9  ;;  %2146 = vrot.lane.b32.xlu0 %v6370_v5, %s4472_s27  ;;  %8027 = vst [vmem:[#allocation188_spill] sm:$0xff] %v6410_v44 }
 0x248   :  { %v2125_v57 = vpop.permute.xlu1 %2124  ;;  %v6389_v33 = vpop.permute.xlu2 %584 }
 0x249   :  { %3358 = vst.msk [vmem:[%s7520_s3 + $0x70] sm:$0xf] %vm3329_vm3, %v3308_v24  ;;  %v2242_v59 = vmax.f32 %v5895_v21, %v2125_v57  ;;  %v2291_v16 = vmin.f32 %v5895_v21, %v2125_v57  ;;  %v581_v53 = vpop.permute.xlu0 %580  ;;  %v6412_v21 = vmul.f32 1.4142135, %v1125_v17  ;;  %v1949_v29 = vpop.f32.mrf.mxu2 }
 0x24a   :  { %v697_v62 = vmax.f32 %v5893_v2, %v581_v53 }
 0x24b   :  { %v2340_v7 = vadd.f32 %v2242_v59, %v1518_v25  ;;  %v2389_v9 = vadd.f32 %v2291_v16, %v1567_v11  ;;  %8028 = vst [vmem:[#allocation189_spill] sm:$0xff] %v6412_v21  ;;  %v2769_v11 = vadd.f32 %v6092_v22, %v6316_v56  ;;  %v746_v59 = vmin.f32 %v5893_v2, %v581_v53 }
 0x24c   :  { %v2243_v56 = vmax.f32 %v5920_v39, %v6323_v23  ;;  %v1128_v23 = vadd.f32 %v6092_v22, %v6355_v36 }
 0x24d   :  { %v3162_v24 = vadd.f32 %v3064_v18, %v2340_v7  ;;  %v6414_v57 = vadd.f32 %v3113_v58, %v2389_v9  ;;  %v6433_v7 = vpop.f32.mrf.mxu1  ;;  %v6435_v9 = vmul.f32 1.4142135, %v404_v8  ;;  %v6453_v39 = vpop.f32.mrf.mxu0 }
 0x24e   :  { %2968 = vrot.lane.b32.xlu1 %v6400_v26, %s4472_s27  ;;  %602 = vrot.lane.b32.xlu2 %v6410_v44, %s4472_s27 }
 0x24f   :  { %8029 = vst [vmem:[#allocation190_spill] sm:$0xff] %v6414_v57  ;;  %v3260_v14 = vmul.f32 0.25, %v3162_v24  ;;  %1326 = vrot.lane.b32.xlu0 %v6412_v21, %s4472_s27  ;;  %v6445_v24 = vpop.f32.mrf.mxu3  ;;  %v8033_v57 = vld [vmem:[#allocation160_spill] sm:$0xff] }
 0x250   :  { %v1305_v25 = vpop.permute.xlu1 %1304  ;;  %v6428_v17 = vpop.permute.xlu2 %2952  ;;  %8030 = vst [vmem:[#allocation191_spill] sm:$0xff] %v6435_v9 }
 0x251   :  { %v3309_v10 = vpack.c.bf16 %v3260_v14, %v3260_v14  ;;  %v1421_v16 = vmax.f32 %v5918_v61, %v1305_v25  ;;  %v1470_v18 = vmin.f32 %v5918_v61, %v1305_v25  ;;  %v2949_v58 = vpop.permute.xlu0 %2948  ;;  %v6447_v61 = vmul.f32 1.4142135, %v1947_v12 }
 0x252   :  { %v6449_v14 = vmul.f32 1.4142135, %v2769_v11  ;;  %v3065_v44 = vmax.f32 %v8033_v57, %v2949_v58  ;;  %v3114_v21 = vmin.f32 %v8033_v57, %v2949_v58  ;;  %v1951_v57 = vpop.f32.mrf.mxu2  ;;  %v6474_v58 = vmul.f32 1.4142135, %v1128_v23 }
 0x253   :  { %3359 = vst.msk [vmem:[%s7520_s3 + $0x74] sm:$0xf] %vm3329_vm3, %v3309_v10  ;;  %v1519_v2 = vadd.f32 %v1421_v16, %v697_v62  ;;  %v1568_v53 = vadd.f32 %v1470_v18, %v746_v59  ;;  %v1950_v62 = vadd.f32 %v6092_v22, %v1949_v29  ;;  %v2772_v10 = vadd.f32 %v6092_v22, %v6361_v19 }
 0x254   :  { %8031 = vst [vmem:[#allocation192_spill] sm:$0xff] %v6447_v61  ;;  %v1471_v29 = vmin.f32 %v5967_v55, %v6357_v48 }
 0x255   :  { %8032 = vst [vmem:[#allocation193_spill] sm:$0xff] %v6449_v14  ;;  %v2341_v8 = vadd.f32 %v2243_v56, %v1519_v2  ;;  %v2390_v25 = vadd.f32 %v2292_v63, %v1568_v53  ;;  %v6476_v56 = vmul.f32 1.4142135, %v1950_v62  ;;  %v1422_v63 = vmax.f32 %v5967_v55, %v6357_v48 }
 0x256   :  { %2148 = vrot.lane.b32.xlu1 %v6447_v61, %s4472_s27  ;;  %2970 = vrot.lane.b32.xlu2 %v6449_v14, %s4472_s27  ;;  %8035 = vst [vmem:[#allocation194_spill] sm:$0xff] %v6474_v58  ;;  %v6481_v53 = vmul.f32 1.4142135, %v2772_v10  ;;  %v406_v48 = vadd.f32 %v6092_v22, %v6374_v28  ;;  %v8059_v14 = vld [vmem:[#allocation36_spill] sm:$0xff] }
 0x257   :  { %v3163_v12 = vadd.f32 %v3065_v44, %v2341_v8  ;;  %v6462_v11 = vadd.f32 %v3114_v21, %v2390_v25  ;;  %604 = vrot.lane.b32.xlu0 %v6435_v9, %s4472_s27  ;;  %8036 = vst [vmem:[#allocation195_spill] sm:$0xff] %v6476_v56  ;;  %v6483_v25 = vpop.f32.mrf.mxu1  ;;  %v409_v9 = vadd.f32 %v6092_v22, %v6408_v32 }
 0x258   :  { %v583_v59 = vpop.permute.xlu1 %582  ;;  %v6468_v36 = vpop.permute.xlu2 %2132  ;;  %8037 = vst [vmem:[#allocation196_spill] sm:$0xff] %v6481_v53  ;;  %v2774_v32 = vadd.f32 %v6092_v22, %v6406_v54  ;;  %v3067_v54 = vmax.f32 %v6034_v37, %v6428_v17 }
 0x259   :  { %8034 = vst [vmem:[#allocation160_spill] sm:$0xff] %v6462_v11  ;;  %v3261_v16 = vmul.f32 0.25, %v3163_v12  ;;  %v698_v18 = vmax.f32 %v5965_v45, %v583_v59  ;;  %v747_v44 = vmin.f32 %v5965_v45, %v583_v59  ;;  %v2129_v21 = vpop.permute.xlu0 %2128  ;;  %v6490_v12 = vpop.f32.mrf.mxu3 }
 0x25a   :  { %v2293_v19 = vmin.f32 %v5969_v41, %v2129_v21  ;;  %v2244_v23 = vmax.f32 %v5969_v41, %v2129_v21  ;;  %v6492_v59 = vpop.f32.mrf.mxu0  ;;  %v1954_v55 = vpop.f32.mrf.mxu2  ;;  %v1130_v41 = vadd.f32 %v6092_v22, %v6398_v51 }
 0x25b   :  { %v3310_v2 = vpack.c.bf16 %v3261_v16, %v3261_v16  ;;  %v1569_v8 = vadd.f32 %v1471_v29, %v747_v44  ;;  %v1520_v45 = vadd.f32 %v1422_v63, %v698_v18  ;;  %v1952_v18 = vadd.f32 %v6092_v22, %v1951_v57  ;;  %v8038_v63 = vld [vmem:[#allocation167_spill] sm:$0xff] }
 0x25d   :  { %3360 = vst.msk [vmem:[%s7520_s3 + $0x78] sm:$0xf] %vm3329_vm3, %v3310_v2  ;;  %v2391_v62 = vadd.f32 %v2293_v19, %v1569_v8  ;;  %v2342_v16 = vadd.f32 %v2244_v23, %v1520_v45  ;;  %v748_v2 = vmin.f32 %v8038_v63, %v6389_v33  ;;  %v8039_v8 = vld [vmem:[#allocation168_spill] sm:$0xff]  ;;  %v6518_v45 = vmul.f32 1.4142135, %v1130_v41 }
 0x25e   :  { %1328 = vrot.lane.b32.xlu1 %v6474_v58, %s4472_s27  ;;  %2150 = vrot.lane.b32.xlu2 %v6476_v56, %s4472_s27  ;;  %v6516_v56 = vmul.f32 1.4142135, %v406_v48  ;;  %v6520_v23 = vmul.f32 1.4142135, %v1952_v18 }
 0x25f   :  { %2972 = vrot.lane.b32.xlu0 %v6481_v53, %s4472_s27  ;;  %v6514_v51 = vpop.f32.mrf.mxu1  ;;  %8042 = vst [vmem:[#allocation197_spill] sm:$0xff] %v6518_v45 }
 0x260   :  { %v2951_v10 = vpop.permute.xlu1 %2950  ;;  %v6504_v29 = vpop.permute.xlu2 %1312  ;;  %8041 = vst [vmem:[#allocation168_spill] sm:$0xff] %v6516_v56 }
 0x261   :  { %v3066_v44 = vmax.f32 %v6002_v20, %v2951_v10  ;;  %v3115_v21 = vmin.f32 %v6002_v20, %v2951_v10  ;;  %v1309_v19 = vpop.permute.xlu0 %1308  ;;  %8043 = vst [vmem:[#allocation198_spill] sm:$0xff] %v6520_v23  ;;  %v6523_v10 = vpop.f32.mrf.mxu3 }
 0x262   :  { %v1472_v11 = vmin.f32 %v8039_v8, %v1309_v19  ;;  %v1423_v20 = vmax.f32 %v8039_v8, %v1309_v19  ;;  %v6537_v41 = vpop.f32.mrf.mxu0  ;;  %v6549_v19 = vmul.f32 1.4142135, %v409_v9  ;;  %v1955_v9 = vadd.f32 %v6092_v22, %v1954_v55 }
 0x263   :  { %v3164_v28 = vadd.f32 %v3066_v44, %v2342_v16  ;;  %v6512_v53 = vadd.f32 %v3115_v21, %v2391_v62  ;;  %v1133_v62 = vadd.f32 %v6092_v22, %v6433_v7  ;;  %v1956_v21 = vpop.f32.mrf.mxu2  ;;  %v411_v55 = vadd.f32 %v6092_v22, %v6453_v39 }
 0x264   :  { %v1570_v57 = vadd.f32 %v1472_v11, %v748_v2  ;;  %v699_v11 = vmax.f32 %v8038_v63, %v6389_v33  ;;  %8044 = vst [vmem:[#allocation199_spill] sm:$0xff] %v6549_v19  ;;  %v3116_v2 = vmin.f32 %v6034_v37, %v6428_v17  ;;  %v6590_v39 = vmul.f32 1.4142135, %v1955_v9  ;;  %v8057_v9 = vld [vmem:[#allocation4_spill] sm:$0xff] }
 0x265   :  { %8040 = vst [vmem:[#allocation167_spill] sm:$0xff] %v6512_v53  ;;  %v3262_v58 = vmul.f32 0.25, %v3164_v28  ;;  %v6551_v63 = vmul.f32 1.4142135, %v1133_v62  ;;  %v2777_v62 = vadd.f32 %v6092_v22, %v6445_v24  ;;  %v8050_v53 = vld [vmem:[#allocation59_spill] sm:$0xff] }
 0x266   :  { %606 = vrot.lane.b32.xlu1 %v6516_v56, %s4472_s27  ;;  %1330 = vrot.lane.b32.xlu2 %v6518_v45, %s4472_s27  ;;  %v1521_v18 = vadd.f32 %v1423_v20, %v699_v11 }
 0x267   :  { %v3311_v48 = vpack.c.bf16 %v3262_v58, %v3262_v58  ;;  %2152 = vrot.lane.b32.xlu0 %v6520_v23, %s4472_s27  ;;  %8045 = vst [vmem:[#allocation200_spill] sm:$0xff] %v6551_v63 }
 0x268   :  { %v2131_v16 = vpop.permute.xlu1 %2130  ;;  %v6541_v7 = vpop.permute.xlu2 %590 }
 0x269   :  { %3361 = vst.msk [vmem:[%s7520_s3 + $0x7c] sm:$0xf] %vm3329_vm3, %v3311_v48  ;;  %v2245_v33 = vmax.f32 %v6032_v40, %v2131_v16  ;;  %v2294_v58 = vmin.f32 %v6032_v40, %v2131_v16  ;;  %v587_v44 = vpop.permute.xlu0 %586  ;;  %v6557_v48 = vmul.f32 1.4142135, %v2774_v32  ;;  %v6561_v40 = vpop.f32.mrf.mxu1 }
 0x26a   :  { %v6572_v17 = vpop.f32.mrf.mxu3  ;;  %v700_v32 = vmax.f32 %v6044_v0, %v587_v44 }
 0x26b   :  { %v2343_v8 = vadd.f32 %v2245_v33, %v1521_v18  ;;  %v2392_v28 = vadd.f32 %v2294_v58, %v1570_v57  ;;  %8046 = vst [vmem:[#allocation201_spill] sm:$0xff] %v6557_v48  ;;  %v6574_v57 = vpop.f32.mrf.mxu0  ;;  %v749_v33 = vmin.f32 %v6044_v0, %v587_v44  ;;  %v2246_v0 = vmax.f32 %v6073_v60, %v6468_v36 }
 0x26c   :  { %v2295_v44 = vmin.f32 %v6073_v60, %v6468_v36 }
 0x26d   :  { %v3165_v20 = vadd.f32 %v3067_v54, %v2343_v8  ;;  %v6559_v11 = vadd.f32 %v3116_v2, %v2392_v28  ;;  %v6584_v8 = vpop.f32.mrf.mxu2  ;;  %v8048_v28 = vld [vmem:[#allocation44_spill] sm:$0xff] }
 0x26e   :  { %2974 = vrot.lane.b32.xlu1 %v6557_v48, %s4472_s27  ;;  %608 = vrot.lane.b32.xlu2 %v6549_v19, %s4472_s27  ;;  %v8051_v19 = vld [vmem:[#allocation8_spill] sm:$0xff]  ;;  %8052 = vst [vmem:[#allocation44_spill] sm:$0xff] %v6590_v39  ;;  %v6592_v48 = vmul.f32 1.4142135, %v2777_v62 }
 0x26f   :  { %8047 = vst [vmem:[#allocation202_spill] sm:$0xff] %v6559_v11  ;;  %v3263_v37 = vmul.f32 0.25, %v3165_v20  ;;  %1332 = vrot.lane.b32.xlu0 %v6551_v63, %s4472_s27  ;;  %v8049_v20 = vld [vmem:[#allocation6_spill] sm:$0xff]  ;;  %v1443_v63 = vmin.f32 %v8051_v19, %v8050_v53  ;;  %v8056_v19 = vld [vmem:[#allocation53_spill] sm:$0xff] }
 0x270   :  { %v1311_v24 = vpop.permute.xlu1 %1310  ;;  %v6579_v16 = vpop.permute.xlu2 %2958  ;;  %v1444_v11 = vmin.f32 %v8049_v20, %v8048_v28  ;;  %8053 = vst [vmem:[#allocation6_spill] sm:$0xff] %v6592_v48  ;;  %v8055_v28 = vld [vmem:[#allocation3_spill] sm:$0xff]  ;;  %v719_v62 = vmin.f32 %v8057_v9, %v8056_v19  ;;  %v6606_v20 = vmul.f32 1.4142135, %v411_v55  ;;  %v8063_v55 = vld [vmem:[#allocation54_spill] sm:$0xff]  ;;  %v1135_v19 = vadd.f32 %v6092_v22, %v6483_v25 }
 0x271   :  { %v3312_v18 = vpack.c.bf16 %v3263_v37, %v3263_v37  ;;  %v1424_v58 = vmax.f32 %v6071_v4, %v1311_v24  ;;  %v1473_v54 = vmin.f32 %v6071_v4, %v1311_v24  ;;  %v2955_v2 = vpop.permute.xlu0 %2954  ;;  %v8054_v24 = vld [vmem:[#allocation40_spill] sm:$0xff]  ;;  %v6610_v36 = vpop.f32.mrf.mxu1  ;;  %v1957_v9 = vadd.f32 %v6092_v22, %v1956_v21  ;;  %v8071_v21 = vld [vmem:[#allocation11_spill] sm:$0xff] }
 0x272   :  { %v720_v53 = vmin.f32 %v8055_v28, %v8054_v24  ;;  %8058 = vst [vmem:[#allocation59_spill] sm:$0xff] %v6606_v20  ;;  %v3068_v56 = vmax.f32 %v6079_v13, %v2955_v2  ;;  %v3117_v60 = vmin.f32 %v6079_v13, %v2955_v2  ;;  %v8067_v28 = vld [vmem:[#allocation15_spill] sm:$0xff] }
 0x273   :  { %3362 = vst.msk [vmem:[%s7520_s3 + $0x80] sm:$0xf] %vm3329_vm3, %v3312_v18  ;;  %v1522_v4 = vadd.f32 %v1424_v58, %v700_v32  ;;  %v1571_v37 = vadd.f32 %v1473_v54, %v749_v33  ;;  %v8060_v18 = vld [vmem:[#allocation2_spill] sm:$0xff]  ;;  %v8061_v58 = vld [vmem:[#allocation48_spill] sm:$0xff] }
 0x274   :  { %v2265_v32 = vmin.f32 %v8060_v18, %v8059_v14  ;;  %v1542_v33 = vadd.f32 %v1444_v11, %v720_v53  ;;  %v8062_v54 = vld [vmem:[#allocation10_spill] sm:$0xff]  ;;  %v420_v14 = vpop.f32.mrf.mxu0 }
 0x275   :  { %v2344_v23 = vadd.f32 %v2246_v0, %v1522_v4  ;;  %v2393_v45 = vadd.f32 %v2295_v44, %v1571_v37  ;;  %v721_v24 = vmin.f32 %v8062_v54, %v8061_v58  ;;  %v8064_v0 = vld [vmem:[#allocation5_spill] sm:$0xff]  ;;  %v1541_v4 = vadd.f32 %v1443_v63, %v719_v62  ;;  %v8066_v37 = vld [vmem:[#allocation76_spill] sm:$0xff]  ;;  %v6650_v61 = vpop.f32.mrf.mxu2 }
 0x276   :  { %2154 = vrot.lane.b32.xlu1 %v6590_v39, %s4472_s27  ;;  %2976 = vrot.lane.b32.xlu2 %v6592_v48, %s4472_s27  ;;  %v3087_v44 = vmin.f32 %v8064_v0, %v8063_v55  ;;  %v6626_v11 = vpop.f32.mrf.mxu3  ;;  %v1446_v53 = vmin.f32 %v8067_v28, %v8066_v37  ;;  %v2779_v63 = vadd.f32 %v6092_v22, %v6490_v12  ;;  %v8068_v54 = vld [vmem:[#allocation60_spill] sm:$0xff]  ;;  %v8069_v55 = vld [vmem:[#allocation7_spill] sm:$0xff]  ;;  %v8070_v0 = vld [vmem:[#allocation66_spill] sm:$0xff] }
 0x277   :  { %v3166_v13 = vadd.f32 %v3068_v56, %v2344_v23  ;;  %v6622_v2 = vadd.f32 %v3117_v60, %v2393_v45  ;;  %610 = vrot.lane.b32.xlu0 %v6606_v20, %s4472_s27  ;;  %v1474_v23 = vmin.f32 %v6108_v47, %v6504_v29  ;;  %v2266_v25 = vmin.f32 %v8069_v55, %v8068_v54  ;;  %v8072_v37 = vld [vmem:[#allocation72_spill] sm:$0xff] }
 0x278   :  { %v589_v56 = vpop.permute.xlu1 %588  ;;  %v6635_v45 = vpop.permute.xlu2 %2138  ;;  %v1445_v14 = vmin.f32 %v8071_v21, %v8070_v0  ;;  %v8073_v12 = vld [vmem:[#allocation12_spill] sm:$0xff]  ;;  %v6654_v55 = vmul.f32 1.4142135, %v1135_v19  ;;  %v6656_v0 = vmul.f32 1.4142135, %v1957_v9  ;;  %v1138_v19 = vadd.f32 %v6092_v22, %v6514_v51  ;;  %v8077_v9 = vld [vmem:[#allocation14_spill] sm:$0xff] }
 0x279   :  { %8065 = vst [vmem:[#allocation8_spill] sm:$0xff] %v6622_v2  ;;  %v3264_v62 = vmul.f32 0.25, %v3166_v13  ;;  %v701_v60 = vmax.f32 %v6106_v38, %v589_v56  ;;  %v750_v18 = vmin.f32 %v6106_v38, %v589_v56  ;;  %v2135_v58 = vpop.permute.xlu0 %2134  ;;  %v722_v28 = vmin.f32 %v8073_v12, %v8072_v37  ;;  %v8074_v38 = vld [vmem:[#allocation71_spill] sm:$0xff]  ;;  %v8075_v56 = vld [vmem:[#allocation13_spill] sm:$0xff] }
 0x27a   :  { %v2296_v20 = vmin.f32 %v6110_v46, %v2135_v58  ;;  %v2363_v2 = vadd.f32 %v2265_v32, %v1541_v4  ;;  %v1425_v13 = vmax.f32 %v6108_v47, %v6504_v29  ;;  %v2267_v26 = vmin.f32 %v8075_v56, %v8074_v38  ;;  %v8082_v38 = vld [vmem:[#allocation177_spill] sm:$0xff] }
 0x27b   :  { %v3313_v48 = vpack.c.bf16 %v3264_v62, %v3264_v62  ;;  %v1572_v39 = vadd.f32 %v1474_v23, %v750_v18  ;;  %v1544_v54 = vadd.f32 %v1446_v53, %v722_v28  ;;  %v6662_v32 = vmul.f32 1.4142135, %v2779_v63  ;;  %v1144_v23 = vpop.f32.mrf.mxu1  ;;  %v8081_v18 = vld [vmem:[#allocation9_spill] sm:$0xff] }
 0x27c   :  { %v1523_v47 = vadd.f32 %v1425_v13, %v701_v60  ;;  %v2247_v29 = vmax.f32 %v6110_v46, %v2135_v58  ;;  %v1543_v62 = vadd.f32 %v1445_v14, %v721_v24  ;;  %v414_v53 = vadd.f32 %v6092_v22, %v6492_v59  ;;  %v8078_v60 = vld [vmem:[#allocation58_spill] sm:$0xff]  ;;  %v8079_v46 = vld [vmem:[#allocation16_spill] sm:$0xff]  ;;  %v8080_v24 = vld [vmem:[#allocation65_spill] sm:$0xff] }
 0x27d   :  { %3363 = vst.msk [vmem:[%s7520_s3 + $0x84] sm:$0xf] %vm3329_vm3, %v3313_v48  ;;  %v2394_v4 = vadd.f32 %v2296_v20, %v1572_v39  ;;  %v8076_v48 = vld [vmem:[#allocation52_spill] sm:$0xff]  ;;  %v2268_v39 = vmin.f32 %v8079_v46, %v8078_v60  ;;  %v1960_v20 = vadd.f32 %v6092_v22, %v6584_v8  ;;  %v2364_v51 = vadd.f32 %v2266_v25, %v1542_v33  ;;  %v8084_v25 = vld [vmem:[#allocation179_spill] sm:$0xff] }
 0x27e   :  { %1334 = vrot.lane.b32.xlu1 %v6654_v55, %s4472_s27  ;;  %2156 = vrot.lane.b32.xlu2 %v6656_v0, %s4472_s27  ;;  %v3089_v63 = vmin.f32 %v8077_v9, %v8076_v48  ;;  %v2788_v59 = vpop.f32.mrf.mxu3  ;;  %v3088_v58 = vmin.f32 %v8081_v18, %v8080_v24  ;;  %v2365_v21 = vadd.f32 %v2267_v26, %v1543_v62  ;;  %v8083_v48 = vld [vmem:[#allocation178_spill] sm:$0xff]  ;;  %v6689_v60 = vmul.f32 1.4142135, %v414_v53 }
 0x27f   :  { %2978 = vrot.lane.b32.xlu0 %v6662_v32, %s4472_s27  ;;  %v3185_v12 = vadd.f32 %v3087_v44, %v2363_v2  ;;  %v2366_v28 = vadd.f32 %v2268_v39, %v1544_v54  ;;  %v2345_v13 = vadd.f32 %v2247_v29, %v1523_v47  ;;  %v751_v9 = vmin.f32 %v8083_v48, %v6541_v7  ;;  %v8085_v29 = vld [vmem:[#allocation77_spill] sm:$0xff] }
 0x280   :  { %v2957_v14 = vpop.permute.xlu1 %2956  ;;  %v6683_v37 = vpop.permute.xlu2 %1318  ;;  %v6691_v33 = vmul.f32 1.4142135, %v1138_v19  ;;  %v6694_v62 = vmul.f32 1.4142135, %v1960_v20  ;;  %v3186_v54 = vadd.f32 %v3088_v58, %v2364_v51  ;;  %v3187_v47 = vadd.f32 %v3089_v63, %v2365_v21  ;;  %v8086_v39 = vld [vmem:[#allocation17_spill] sm:$0xff]  ;;  %v8087_v51 = vld [vmem:[#allocation64_spill] sm:$0xff] }
 0x281   :  { %v3069_v56 = vmax.f32 %v8082_v38, %v2957_v14  ;;  %v3118_v23 = vmin.f32 %v8082_v38, %v2957_v14  ;;  %v1315_v8 = vpop.permute.xlu0 %1314  ;;  %v6698_v2 = vpop.f32.mrf.mxu2  ;;  %v3090_v59 = vmin.f32 %v8086_v39, %v8085_v29  ;;  %v2782_v14 = vadd.f32 %v6092_v22, %v6523_v10  ;;  %v8088_v58 = vld [vmem:[#allocation19_spill] sm:$0xff] }
 0x282   :  { %v1475_v26 = vmin.f32 %v8084_v25, %v1315_v8  ;;  %v1426_v53 = vmax.f32 %v8084_v25, %v1315_v8  ;;  %v702_v63 = vmax.f32 %v8083_v48, %v6541_v7  ;;  %v1447_v21 = vmin.f32 %v8088_v58, %v8087_v51  ;;  %v8090_v25 = vld [vmem:[#allocation18_spill] sm:$0xff] }
 0x283   :  { %v3167_v46 = vadd.f32 %v3069_v56, %v2345_v13  ;;  %v6696_v44 = vadd.f32 %v3118_v23, %v2394_v4  ;;  %v3188_v19 = vadd.f32 %v3090_v59, %v2366_v28  ;;  %v6709_v4 = vmul.f32 0.25, %v3185_v12  ;;  %v8092_v59 = vld [vmem:[#allocation70_spill] sm:$0xff] }
 0x284   :  { %v1573_v24 = vadd.f32 %v1475_v26, %v751_v9  ;;  %v6717_v28 = vmul.f32 0.25, %v3186_v54  ;;  %v416_v10 = vadd.f32 %v6092_v22, %v6537_v41  ;;  %v6723_v12 = vmul.f32 0.25, %v3187_v47  ;;  %v8089_v9 = vld [vmem:[#allocation81_spill] sm:$0xff] }
 0x285   :  { %v3265_v18 = vmul.f32 0.25, %v3167_v46  ;;  %v1524_v7 = vadd.f32 %v1426_v53, %v702_v63  ;;  %v1140_v56 = vadd.f32 %v6092_v22, %v6561_v40  ;;  %v6733_v41 = vmul.f32 0.25, %v3188_v19  ;;  %v8094_v19 = vld [vmem:[#allocation75_spill] sm:$0xff] }
 0x286   :  { %612 = vrot.lane.b32.xlu1 %v6689_v60, %s4472_s27  ;;  %1336 = vrot.lane.b32.xlu2 %v6691_v33, %s4472_s27  ;;  %v723_v26 = vmin.f32 %v8090_v25, %v8089_v9  ;;  %v6737_v46 = vmul.f32 1.4142135, %v2782_v14  ;;  %v3070_v47 = vmax.f32 %v6174_v43, %v6579_v16  ;;  %v3119_v22 = vmin.f32 %v6174_v43, %v6579_v16  ;;  %v8095_v14 = vld [vmem:[#allocation25_spill] sm:$0xff]  ;;  %v8098_v16 = vld [vmem:[#allocation80_spill] sm:$0xff]  ;;  %v6766_v25 = vld [vmem:[%s7518_s2] ss:$0 sm:$0xff] }
 0x287   :  { %v3314_v20 = vpack.c.bf16 %v3265_v18, %v3265_v18  ;;  %2158 = vrot.lane.b32.xlu0 %v6694_v62, %s4472_s27  ;;  %v8093_v18 = vld [vmem:[#allocation21_spill] sm:$0xff]  ;;  %v3092_v63 = vmin.f32 %v8095_v14, %v8094_v19  ;;  %v6753_v51 = vmul.f32 1.4142135, %v1140_v56  ;;  %v1962_v19 = vadd.f32 %v6766_v25, %v6650_v61  ;;  %v8108_v56 = vld [vmem:[#allocation98_spill] sm:$0xff]  ;;  %v8109_v43 = vld [vmem:[#allocation27_spill] sm:$0xff] }
 0x288   :  { %v2137_v13 = vpop.permute.xlu1 %2136  ;;  %v6721_v38 = vpop.permute.xlu2 %596  ;;  %8091 = vst [vmem:[#allocation40_spill] sm:$0xff] %v6737_v46  ;;  %v724_v53 = vmin.f32 %v8093_v18, %v8092_v59  ;;  %v8104_v59 = vld [vmem:[#allocation92_spill] sm:$0xff]  ;;  %v2784_v14 = vadd.f32 %v6766_v25, %v6572_v17  ;;  %v1449_v17 = vmin.f32 %v8109_v43, %v8108_v56  ;;  %v2249_v39 = vmax.f32 %v6197_v3, %v6635_v45 }
 0x289   :  { %3364 = vst.msk [vmem:[%s7520_s3 + $0x88] sm:$0xf] %vm3329_vm3, %v3314_v20  ;;  %v2248_v23 = vmax.f32 %v6172_v31, %v2137_v13  ;;  %v2297_v8 = vmin.f32 %v6172_v31, %v2137_v13  ;;  %v593_v48 = vpop.permute.xlu0 %592  ;;  %v1966_v31 = vpop.f32.mrf.mxu2  ;;  %v6751_v20 = vmul.f32 1.4142135, %v416_v10  ;;  %v419_v10 = vadd.f32 %v6766_v25, %v6574_v57  ;;  %v8105_v18 = vld [vmem:[#allocation24_spill] sm:$0xff] }
 0x28a   :  { %8097 = vst [vmem:[#allocation53_spill] sm:$0xff] %v6753_v51  ;;  %v2270_v57 = vmin.f32 %v8105_v18, %v8104_v59  ;;  %v8107_v59 = vld [vmem:[#allocation23_spill] sm:$0xff]  ;;  %v6808_v43 = vmul.f32 1.4142135, %v1962_v19 }
 0x28b   :  { %v2346_v40 = vadd.f32 %v2248_v23, %v1524_v7  ;;  %v2395_v29 = vadd.f32 %v2297_v8, %v1573_v24  ;;  %8096 = vst [vmem:[#allocation3_spill] sm:$0xff] %v6751_v20  ;;  %v8099_v24 = vld [vmem:[#allocation28_spill] sm:$0xff]  ;;  %v8100_v23 = vld [vmem:[#allocation87_spill] sm:$0xff]  ;;  %v8101_v8 = vld [vmem:[#allocation22_spill] sm:$0xff]  ;;  %v6796_v54 = vmul.f32 1.4142135, %v419_v10 }
 0x28c   :  { %v2271_v7 = vmin.f32 %v8099_v24, %v8098_v16  ;;  %v1448_v9 = vmin.f32 %v8101_v8, %v8100_v23  ;;  %v703_v16 = vmax.f32 %v6160_v30, %v593_v48  ;;  %8113 = vst [vmem:[#allocation36_spill] sm:$0xff] %v6808_v43  ;;  %v6810_v10 = vmul.f32 1.4142135, %v2784_v14  ;;  %v8117_v19 = vld [vmem:[#allocation31_spill] sm:$0xff] }
 0x28d   :  { %v3168_v58 = vadd.f32 %v3070_v47, %v2346_v40  ;;  %v6755_v13 = vadd.f32 %v3119_v22, %v2395_v29  ;;  %v1545_v47 = vadd.f32 %v1447_v21, %v723_v26  ;;  %v8102_v22 = vld [vmem:[#allocation82_spill] sm:$0xff]  ;;  %v8103_v40 = vld [vmem:[#allocation20_spill] sm:$0xff]  ;;  %8110 = vst [vmem:[#allocation4_spill] sm:$0xff] %v6796_v54 }
 0x28e   :  { %2980 = vrot.lane.b32.xlu1 %v6737_v46, %s4472_s27  ;;  %614 = vrot.lane.b32.xlu2 %v6751_v20, %s4472_s27  ;;  %v2269_v29 = vmin.f32 %v8103_v40, %v8102_v22  ;;  %v8106_v40 = vld [vmem:[#allocation86_spill] sm:$0xff]  ;;  %v1546_v61 = vadd.f32 %v1448_v9, %v724_v53  ;;  %v8111_v53 = vld [vmem:[#allocation93_spill] sm:$0xff]  ;;  %8114 = vst [vmem:[#allocation2_spill] sm:$0xff] %v6810_v10 }
 0x28f   :  { %v3266_v31 = vmul.f32 0.25, %v3168_v58  ;;  %1338 = vrot.lane.b32.xlu0 %v6753_v51, %s4472_s27  ;;  %v752_v58 = vmin.f32 %v6160_v30, %v593_v48  ;;  %v3091_v18 = vmin.f32 %v8107_v59, %v8106_v40  ;;  %v2298_v30 = vmin.f32 %v6197_v3, %v6635_v45  ;;  %v8112_v9 = vld [vmem:[#allocation26_spill] sm:$0xff]  ;;  %v8115_v59 = vld [vmem:[#allocation181_spill] sm:$0xff] }
 0x290   :  { %v1317_v24 = vpop.permute.xlu1 %1316  ;;  %v6787_v21 = vpop.permute.xlu2 %2964  ;;  %v2367_v45 = vadd.f32 %v2269_v29, %v1545_v47  ;;  %v8119_v29 = vld [vmem:[#allocation34_spill] sm:$0xff] }
 0x291   :  { %v3315_v26 = vpack.c.bf16 %v3266_v31, %v3266_v31  ;;  %v1427_v23 = vmax.f32 %v6195_v34, %v1317_v24  ;;  %v1476_v8 = vmin.f32 %v6195_v34, %v1317_v24  ;;  %v2961_v22 = vpop.permute.xlu0 %2960  ;;  %v2368_v31 = vadd.f32 %v2270_v57, %v1546_v61  ;;  %v8116_v57 = vld [vmem:[#allocation85_spill] sm:$0xff]  ;;  %v8121_v61 = vld [vmem:[#allocation30_spill] sm:$0xff] }
 0x292   :  { %v725_v24 = vmin.f32 %v8112_v9, %v8111_v53  ;;  %v3071_v20 = vmax.f32 %v8115_v59, %v2961_v22  ;;  %v3120_v3 = vmin.f32 %v8115_v59, %v2961_v22  ;;  %v1450_v14 = vmin.f32 %v8117_v19, %v8116_v57  ;;  %v8120_v22 = vld [vmem:[#allocation104_spill] sm:$0xff]  ;;  %v8126_v19 = vld [vmem:[#allocation99_spill] sm:$0xff] }
 0x293   :  { %3365 = vst.msk [vmem:[%s7520_s3 + $0x8c] sm:$0xf] %vm3329_vm3, %v3315_v26  ;;  %v1525_v34 = vadd.f32 %v1427_v23, %v703_v16  ;;  %v1574_v48 = vadd.f32 %v1476_v8, %v752_v58  ;;  %v1143_v16 = vadd.f32 %v6766_v25, %v6610_v36  ;;  %v2787_v58 = vadd.f32 %v6766_v25, %v6626_v11  ;;  %v8118_v36 = vld [vmem:[#allocation91_spill] sm:$0xff] }
 0x294   :  { %v1547_v51 = vadd.f32 %v1449_v17, %v725_v24  ;;  %v3189_v47 = vadd.f32 %v3091_v18, %v2367_v45  ;;  %v727_v23 = vmin.f32 %v8119_v29, %v8118_v36  ;;  %v6830_v8 = vadd.f32 %v3092_v63, %v2368_v31  ;;  %v8122_v24 = vld [vmem:[#allocation111_spill] sm:$0xff]  ;;  %v8128_v29 = vld [vmem:[#allocation105_spill] sm:$0xff] }
 0x295   :  { %v2347_v56 = vadd.f32 %v2249_v39, %v1525_v34  ;;  %v2396_v40 = vadd.f32 %v2298_v30, %v1574_v48  ;;  %v726_v17 = vmin.f32 %v8121_v61, %v8120_v22  ;;  %v6842_v31 = vmul.f32 1.4142135, %v1143_v16  ;;  %v8130_v22 = vld [vmem:[#allocation116_spill] sm:$0xff]  ;;  %v8131_v61 = vld [vmem:[#allocation38_spill] sm:$0xff] }
 0x296   :  { %2160 = vrot.lane.b32.xlu1 %v6808_v43, %s4472_s27  ;;  %2982 = vrot.lane.b32.xlu2 %v6810_v10, %s4472_s27  ;;  %v2369_v9 = vadd.f32 %v2271_v7, %v1547_v51  ;;  %v1428_v59 = vmax.f32 %v6230_v1, %v6683_v37  ;;  %v6847_v45 = vmul.f32 1.4142135, %v2787_v58  ;;  %v8129_v51 = vld [vmem:[#allocation32_spill] sm:$0xff]  ;;  %v2273_v16 = vmin.f32 %v8131_v61, %v8130_v22 }
 0x297   :  { %v3169_v39 = vadd.f32 %v3071_v20, %v2347_v56  ;;  %v6822_v26 = vadd.f32 %v3120_v3, %v2396_v40  ;;  %616 = vrot.lane.b32.xlu0 %v6796_v54, %s4472_s27  ;;  %v1477_v20 = vmin.f32 %v6230_v1, %v6683_v37  ;;  %v8123_v56 = vld [vmem:[#allocation35_spill] sm:$0xff]  ;;  %8124 = vst [vmem:[#allocation48_spill] sm:$0xff] %v6842_v31 }
 0x298   :  { %v595_v30 = vpop.permute.xlu1 %594  ;;  %v6834_v34 = vpop.permute.xlu2 %2144  ;;  %v1451_v63 = vmin.f32 %v8123_v56, %v8122_v24  ;;  %8125 = vst [vmem:[#allocation10_spill] sm:$0xff] %v6847_v45  ;;  %v2272_v7 = vmin.f32 %v8129_v51, %v8128_v29  ;;  %v8133_v24 = vld [vmem:[#allocation41_spill] sm:$0xff] }
 0x299   :  { %v3267_v48 = vmul.f32 0.25, %v3169_v39  ;;  %v704_v11 = vmax.f32 %v6228_v27, %v595_v30  ;;  %v753_v53 = vmin.f32 %v6228_v27, %v595_v30  ;;  %v2141_v18 = vpop.permute.xlu0 %2140  ;;  %v8127_v39 = vld [vmem:[#allocation29_spill] sm:$0xff]  ;;  %v1548_v27 = vadd.f32 %v1450_v14, %v726_v17  ;;  %v8132_v30 = vld [vmem:[#allocation122_spill] sm:$0xff]  ;;  %v8135_v17 = vld [vmem:[#allocation39_spill] sm:$0xff] }
 0x29a   :  { %v2299_v40 = vmin.f32 %v6232_v52, %v2141_v18  ;;  %v3093_v36 = vmin.f32 %v8127_v39, %v8126_v19  ;;  %v1452_v56 = vmin.f32 %v8133_v24, %v8132_v30  ;;  %v2250_v37 = vmax.f32 %v6232_v52, %v2141_v18  ;;  %v8134_v14 = vld [vmem:[#allocation97_spill] sm:$0xff]  ;;  %v8137_v52 = vld [vmem:[#allocation103_spill] sm:$0xff]  ;;  %v8138_v18 = vld [vmem:[#allocation42_spill] sm:$0xff] }
 0x29b   :  { %v3316_v3 = vpack.c.bf16 %v3267_v48, %v3267_v48  ;;  %v1575_v57 = vadd.f32 %v1477_v20, %v753_v53  ;;  %v1526_v1 = vadd.f32 %v1428_v59, %v704_v11  ;;  %v6862_v20 = vmul.f32 0.25, %v3189_v47  ;;  %v8141_v39 = vld [vmem:[#allocation117_spill] sm:$0xff]  ;;  %v8145_v30 = vld [vmem:[#allocation128_spill] sm:$0xff] }
 0x29c   :  { %v3095_v48 = vmin.f32 %v8135_v17, %v8134_v14  ;;  %v1549_v53 = vadd.f32 %v1451_v63, %v727_v23  ;;  %v8136_v19 = vpack.c.bf16 %v6717_v28, %v6717_v28  ;;  %v1965_v11 = vadd.f32 %v6766_v25, %v6698_v2  ;;  %v8142_v23 = vld [vmem:[#allocation37_spill] sm:$0xff]  ;;  %v8144_v28 = vld [vmem:[#allocation46_spill] sm:$0xff]  ;;  %v8147_v17 = vld [vmem:[#allocation143_spill] sm:$0xff] }
 0x29d   :  { %3366 = vst.msk [vmem:[%s7520_s3 + $0x90] sm:$0xf] %vm3329_vm3, %v3316_v3  ;;  %v2397_v58 = vadd.f32 %v2299_v40, %v1575_v57  ;;  %v3191_v59 = vadd.f32 %v3093_v36, %v2369_v9  ;;  %v2274_v47 = vmin.f32 %v8138_v18, %v8137_v52  ;;  %v8139_v40 = vld [vmem:[#allocation110_spill] sm:$0xff]  ;;  %v8140_v3 = vld [vmem:[#allocation33_spill] sm:$0xff]  ;;  %v728_v63 = vmin.f32 %v8142_v23, %v8141_v39 }
 0x29e   :  { %1340 = vrot.lane.b32.xlu1 %v6842_v31, %s4472_s27  ;;  %3534 = vrot.lane.b32.xlu2 %v8136_v19, %s4473_s23  ;;  %v3094_v57 = vmin.f32 %v8140_v3, %v8139_v40  ;;  %v2370_v29 = vadd.f32 %v2272_v7, %v1548_v27  ;;  %v8143_v51 = vld [vmem:[#allocation109_spill] sm:$0xff]  ;;  %v2371_v61 = vadd.f32 %v2273_v16, %v1549_v53  ;;  %v8148_v40 = vld [vmem:[#allocation134_spill] sm:$0xff]  ;;  %v8150_v7 = vld [vmem:[#allocation183_spill] sm:$0xff]  ;;  %v6894_v16 = vmul.f32 1.4142135, %v1965_v11 }
 0x29f   :  { %2984 = vrot.lane.b32.xlu0 %v6847_v45, %s4472_s27  ;;  %v1453_v22 = vmin.f32 %v8144_v28, %v8143_v51  ;;  %v8146_v2 = vld [vmem:[#allocation45_spill] sm:$0xff]  ;;  %v1550_v24 = vadd.f32 %v1452_v56, %v728_v63  ;;  %v2348_v14 = vadd.f32 %v2250_v37, %v1526_v1  ;;  %v8149_v3 = vld [vmem:[#allocation50_spill] sm:$0xff]  ;;  %v754_v39 = vmin.f32 %v8150_v7, %v6721_v38  ;;  %v8151_v53 = vld [vmem:[#allocation184_spill] sm:$0xff] }
 0x2a0   :  { %v729_v25 = vmin.f32 %v8146_v2, %v8145_v30  ;;  %v2963_v9 = vpop.permute.xlu1 %2962  ;;  %v6886_v36 = vpop.permute.xlu2 %1324  ;;  %v1454_v27 = vmin.f32 %v8149_v3, %v8148_v40  ;;  %v3192_v51 = vadd.f32 %v3094_v57, %v2370_v29  ;;  %v8152_v28 = vld [vmem:[#allocation115_spill] sm:$0xff]  ;;  %v8153_v30 = vld [vmem:[#allocation49_spill] sm:$0xff]  ;;  %v8156_v45 = vld [vmem:[#allocation136_spill] sm:$0xff]  ;;  %v3193_v54 = vadd.f32 %v3095_v48, %v2371_v61 }
 0x2a1   :  { %v3072_v19 = vmax.f32 %v8147_v17, %v2963_v9  ;;  %v3121_v52 = vmin.f32 %v8147_v17, %v2963_v9  ;;  %v1321_v18 = vpop.permute.xlu0 %1320  ;;  %v730_v56 = vmin.f32 %v8153_v30, %v8152_v28  ;;  %v8154_v2 = vld [vmem:[#allocation129_spill] sm:$0xff]  ;;  %v8155_v9 = vld [vmem:[#allocation47_spill] sm:$0xff]  ;;  %v2372_v11 = vadd.f32 %v2274_v47, %v1550_v24 }
 0x2a2   :  { %v1478_v23 = vmin.f32 %v8151_v53, %v1321_v18  ;;  %v1551_v63 = vadd.f32 %v1453_v22, %v729_v25  ;;  %v2275_v17 = vmin.f32 %v8155_v9, %v8154_v2  ;;  %v8157_v40 = vld [vmem:[#allocation55_spill] sm:$0xff]  ;;  %v1429_v43 = vmax.f32 %v8151_v53, %v1321_v18  ;;  %v8158_v57 = vld [vmem:[#allocation133_spill] sm:$0xff] }
 0x2a3   :  { %v3170_v1 = vadd.f32 %v3072_v19, %v2348_v14  ;;  %v6899_v37 = vadd.f32 %v3121_v52, %v2397_v58  ;;  %v2276_v3 = vmin.f32 %v8157_v40, %v8156_v45  ;;  %v8159_v29 = vld [vmem:[#allocation51_spill] sm:$0xff]  ;;  %v1552_v28 = vadd.f32 %v1454_v27, %v730_v56  ;;  %v8160_v14 = vld [vmem:[#allocation138_spill] sm:$0xff]  ;;  %v8161_v58 = vld [vmem:[#allocation61_spill] sm:$0xff] }
 0x2a4   :  { %v1576_v31 = vadd.f32 %v1478_v23, %v754_v39  ;;  %v3097_v46 = vmin.f32 %v8159_v29, %v8158_v57  ;;  %v1455_v19 = vmin.f32 %v8161_v58, %v8160_v14  ;;  %v8162_v22 = vpack.c.bf16 %v6709_v4, %v6709_v4  ;;  %v8164_v4 = vld [vmem:[#allocation123_spill] sm:$0xff]  ;;  %v8166_v53 = vld [vmem:[#allocation137_spill] sm:$0xff] }
 0x2a5   :  { %v3268_v10 = vmul.f32 0.25, %v3170_v1  ;;  %v3387_v45 = vmul.f32 0.25, %v6830_v8  ;;  %v6917_v48 = vmul.f32 0.25, %v3191_v59  ;;  %v6919_v47 = vmul.f32 0.25, %v3192_v51  ;;  %v8165_v52 = vld [vmem:[#allocation43_spill] sm:$0xff]  ;;  %v8167_v8 = vld [vmem:[#allocation57_spill] sm:$0xff] }
 0x2a6   :  { %3532 = vrot.lane.b32.xlu1 %v8162_v22, %s4473_s23  ;;  %2162 = vrot.lane.b32.xlu2 %v6894_v16, %s4472_s27  ;;  %v705_v61 = vmax.f32 %v8150_v7, %v6721_v38  ;;  %v8163_v24 = vpack.c.bf16 %v6723_v12, %v6723_v12  ;;  %v3096_v18 = vmin.f32 %v8165_v52, %v8164_v4  ;;  %v6939_v30 = vmul.f32 0.25, %v3193_v54  ;;  %v8168_v56 = vld [vmem:[#allocation121_spill] sm:$0xff]  ;;  %v8169_v1 = vld [vmem:[#allocation56_spill] sm:$0xff]  ;;  %v8170_v29 = vld [vmem:[#allocation127_spill] sm:$0xff] }
 0x2a7   :  { %v3317_v25 = vpack.c.bf16 %v3268_v10, %v3268_v10  ;;  %v2373_v27 = vadd.f32 %v2275_v17, %v1551_v63  ;;  %v2374_v39 = vadd.f32 %v2276_v3, %v1552_v28  ;;  %v731_v59 = vmin.f32 %v8167_v8, %v8166_v53  ;;  %v8171_v54 = vld [vmem:[#allocation62_spill] sm:$0xff]  ;;  %v8177_v52 = vld [vmem:[#allocation135_spill] sm:$0xff] }
 0x2a8   :  { %3536 = vrot.lane.b32.xlu0 %v8163_v24, %s4473_s23  ;;  %v2143_v23 = vpop.permute.xlu1 %2142  ;;  %v6931_v51 = vpop.permute.xlu2 %602  ;;  %v1527_v38 = vadd.f32 %v1429_v43, %v705_v61  ;;  %v3098_v63 = vmin.f32 %v8169_v1, %v8168_v56  ;;  %v3194_v2 = vadd.f32 %v3096_v18, %v2372_v11  ;;  %v3073_v40 = vmax.f32 %v6294_v35, %v6787_v21  ;;  %v8173_v61 = vld [vmem:[#allocation67_spill] sm:$0xff]  ;;  %v8178_v18 = vld [vmem:[#allocation73_spill] sm:$0xff] }
 0x2a9   :  { %3367 = vst.msk [vmem:[%s7520_s3 + $0x94] sm:$0xf] %vm3329_vm3, %v3317_v25  ;;  %v2251_v12 = vmax.f32 %v6292_v49, %v2143_v23  ;;  %v2300_v10 = vmin.f32 %v6292_v49, %v2143_v23  ;;  %v599_v7 = vpop.permute.xlu0 %598  ;;  %v3195_v9 = vadd.f32 %v3097_v46, %v2373_v27  ;;  %v1553_v17 = vadd.f32 %v1455_v19, %v731_v59  ;;  %v8179_v53 = vld [vmem:[#allocation139_spill] sm:$0xff]  ;;  %v8181_v59 = vld [vmem:[#allocation146_spill] sm:$0xff] }
 0x2aa   :  { %v3122_v3 = vmin.f32 %v6294_v35, %v6787_v21  ;;  %v3435_v49 = vpack.c.bf16 %v6862_v20, %v6862_v20  ;;  %v2277_v28 = vmin.f32 %v8171_v54, %v8170_v29  ;;  %v3196_v14 = vadd.f32 %v3098_v63, %v2374_v39  ;;  %v8180_v8 = vld [vmem:[#allocation63_spill] sm:$0xff]  ;;  %v8182_v23 = vld [vmem:[#allocation74_spill] sm:$0xff]  ;;  %v8186_v54 = vld [vmem:[#allocation152_spill] sm:$0xff] }
 0x2ab   :  { %v2349_v43 = vadd.f32 %v2251_v12, %v1527_v38  ;;  %v2398_v57 = vadd.f32 %v2300_v10, %v1576_v31  ;;  %v3436_v58 = vpack.c.bf16 %v3387_v45, %v3387_v45  ;;  %v3437_v46 = vpack.c.bf16 %v6917_v48, %v6917_v48  ;;  %v8172_v31 = vld [vmem:[#allocation140_spill] sm:$0xff] }
 0x2ac   :  { %v3438_v11 = vpack.c.bf16 %v6919_v47, %v6919_v47  ;;  %v6957_v35 = vmul.f32 0.25, %v3194_v2  ;;  %v2375_v21 = vadd.f32 %v2277_v28, %v1553_v17  ;;  %v732_v20 = vmin.f32 %v8173_v61, %v8172_v31  ;;  %v8175_v48 = vld [vmem:[#allocation132_spill] sm:$0xff]  ;;  %v8187_v28 = vld [vmem:[#allocation83_spill] sm:$0xff] }
 0x2ad   :  { %v3171_v19 = vadd.f32 %v3073_v40, %v2349_v43  ;;  %v6955_v22 = vadd.f32 %v3122_v3, %v2398_v57  ;;  %v8174_v25 = vpack.c.bf16 %v6733_v41, %v6733_v41  ;;  %v3439_v45 = vpack.c.bf16 %v6939_v30, %v6939_v30  ;;  %v8176_v47 = vld [vmem:[#allocation68_spill] sm:$0xff]  ;;  %v8184_v57 = vld [vmem:[#allocation142_spill] sm:$0xff] }
 0x2ae   :  { %3540 = vrot.lane.b32.xlu2 %v3435_v49, %s4473_s23  ;;  %v1456_v24 = vmin.f32 %v8176_v47, %v8175_v48  ;;  %v6970_v4 = vmul.f32 0.25, %v3195_v9  ;;  %v733_v27 = vmin.f32 %v8178_v18, %v8177_v52  ;;  %v3099_v41 = vmin.f32 %v8180_v8, %v8179_v53  ;;  %v8183_v12 = vld [vmem:[#allocation144_spill] sm:$0xff]  ;;  %v8185_v49 = vld [vmem:[#allocation69_spill] sm:$0xff]  ;;  %v8191_v53 = vld [vmem:[#allocation154_spill] sm:$0xff] }
 0x2af   :  { %3538 = vrot.lane.b32.xlu1 %v8174_v25, %s4473_s23  ;;  %v3269_v39 = vmul.f32 0.25, %v3171_v19  ;;  %v1457_v38 = vmin.f32 %v8182_v23, %v8181_v59  ;;  %v706_v10 = vmax.f32 %v8183_v12, %v599_v7  ;;  %v6982_v1 = vmul.f32 0.25, %v3196_v14  ;;  %v8189_v25 = vld [vmem:[#allocation78_spill] sm:$0xff]  ;;  %v8192_v8 = vld [vmem:[#allocation88_spill] sm:$0xff] }
 0x2b0   :  { %3542 = vrot.lane.b32.xlu0 %v3436_v58, %s4473_s23  ;;  %v1323_v30 = vpop.permute.xlu1 %1322  ;;  %v6980_v56 = vpop.permute.xlu2 %2970  ;;  %v755_v2 = vmin.f32 %v8183_v12, %v599_v7  ;;  %v3197_v3 = vadd.f32 %v3099_v41, %v2375_v21  ;;  %v1554_v43 = vadd.f32 %v1456_v24, %v732_v20  ;;  %v2278_v29 = vmin.f32 %v8185_v49, %v8184_v57  ;;  %v8188_v20 = vld [vmem:[#allocation149_spill] sm:$0xff] }
 0x2b1   :  { %v3318_v63 = vpack.c.bf16 %v3269_v39, %v3269_v39  ;;  %v1430_v9 = vmax.f32 %v6334_v50, %v1323_v30  ;;  %v1479_v17 = vmin.f32 %v6334_v50, %v1323_v30  ;;  %v2967_v40 = vpop.permute.xlu0 %2966  ;;  %v2279_v58 = vmin.f32 %v8187_v28, %v8186_v54  ;;  %v8196_v30 = vld [vmem:[#allocation89_spill] sm:$0xff]  ;;  %v8201_v28 = vld [vmem:[#allocation150_spill] sm:$0xff] }
 0x2b2   :  { %v2252_v14 = vmax.f32 %v6336_v42, %v6834_v34  ;;  %v2301_v19 = vmin.f32 %v6336_v42, %v6834_v34  ;;  %v3440_v21 = vpack.c.bf16 %v6957_v35, %v6957_v35  ;;  %v3441_v31 = vpack.c.bf16 %v6970_v4, %v6970_v4  ;;  %v8190_v42 = vld [vmem:[#allocation148_spill] sm:$0xff]  ;;  %v8193_v4 = vld [vmem:[#allocation141_spill] sm:$0xff] }
 0x2b3   :  { %3368 = vst.msk [vmem:[%s7520_s3 + $0x98] sm:$0xf] %vm3329_vm3, %v3318_v63  ;;  %v1528_v50 = vadd.f32 %v1430_v9, %v706_v10  ;;  %v1577_v7 = vadd.f32 %v1479_v17, %v755_v2  ;;  %v1555_v61 = vadd.f32 %v1457_v38, %v733_v27  ;;  %v3100_v48 = vmin.f32 %v8189_v25, %v8188_v20  ;;  %v8194_v27 = vld [vmem:[#allocation84_spill] sm:$0xff]  ;;  %v8195_v10 = vld [vmem:[#allocation145_spill] sm:$0xff]  ;;  %v8197_v9 = vld [vmem:[#allocation151_spill] sm:$0xff] }
 0x2b4   :  { %v3074_v34 = vmax.f32 %v8190_v42, %v2967_v40  ;;  %v3123_v52 = vmin.f32 %v8190_v42, %v2967_v40  ;;  %v7007_v18 = vmul.f32 0.25, %v3197_v3  ;;  %v2376_v39 = vadd.f32 %v2278_v29, %v1554_v43  ;;  %v8200_v40 = vld [vmem:[#allocation94_spill] sm:$0xff] }
 0x2b5   :  { %v2350_v47 = vadd.f32 %v2252_v14, %v1528_v50  ;;  %v2399_v24 = vadd.f32 %v2301_v19, %v1577_v7  ;;  %v1458_v41 = vmin.f32 %v8192_v8, %v8191_v53  ;;  %v3442_v35 = vpack.c.bf16 %v6982_v1, %v6982_v1  ;;  %v8203_v50 = vld [vmem:[#allocation163_spill] sm:$0xff]  ;;  %v8204_v7 = vld [vmem:[#allocation101_spill] sm:$0xff]  ;;  %v8208_v53 = vld [vmem:[#allocation96_spill] sm:$0xff] }
 0x2b6   :  { %3546 = vrot.lane.b32.xlu2 %v3438_v11, %s4473_s23  ;;  %v3101_v59 = vmin.f32 %v8194_v27, %v8193_v4  ;;  %v2377_v23 = vadd.f32 %v2279_v58, %v1555_v61  ;;  %v2280_v63 = vmin.f32 %v8196_v30, %v8195_v10  ;;  %v3198_v2 = vadd.f32 %v3100_v48, %v2376_v39  ;;  %v8199_v11 = vld [vmem:[#allocation157_spill] sm:$0xff]  ;;  %v8202_v58 = vld [vmem:[#allocation95_spill] sm:$0xff]  ;;  %v8209_v4 = vld [vmem:[#allocation164_spill] sm:$0xff] }
 0x2b7   :  { %3544 = vrot.lane.b32.xlu1 %v3437_v46, %s4473_s23  ;;  %v3172_v38 = vadd.f32 %v3074_v34, %v2350_v47  ;;  %v7017_v12 = vadd.f32 %v3123_v52, %v2399_v24  ;;  %v8198_v46 = vld [vmem:[#allocation79_spill] sm:$0xff]  ;;  %v735_v3 = vmin.f32 %v8200_v40, %v8199_v11  ;;  %v1480_v57 = vmin.f32 %v6367_v15, %v6886_v36  ;;  %v8205_v34 = vld [vmem:[#allocation153_spill] sm:$0xff]  ;;  %v8206_v52 = vld [vmem:[#allocation100_spill] sm:$0xff] }
 0x2b8   :  { %3548 = vrot.lane.b32.xlu0 %v3439_v45, %s4473_s23  ;;  %v734_v17 = vmin.f32 %v8198_v46, %v8197_v9  ;;  %v601_v1 = vpop.permute.xlu1 %600  ;;  %v7026_v43 = vpop.permute.xlu2 %2150  ;;  %v1459_v14 = vmin.f32 %v8202_v58, %v8201_v28  ;;  %v1460_v61 = vmin.f32 %v8204_v7, %v8203_v50  ;;  %v3199_v25 = vadd.f32 %v3101_v59, %v2377_v23  ;;  %v8207_v39 = vld [vmem:[#allocation159_spill] sm:$0xff]  ;;  %v8212_v9 = vld [vmem:[#allocation102_spill] sm:$0xff]  ;;  %v8213_v40 = vld [vmem:[#allocation156_spill] sm:$0xff] }
 0x2b9   :  { %v3270_v49 = vmul.f32 0.25, %v3172_v38  ;;  %v707_v29 = vmax.f32 %v6365_v6, %v601_v1  ;;  %v756_v45 = vmin.f32 %v6365_v6, %v601_v1  ;;  %v2147_v54 = vpop.permute.xlu0 %2146  ;;  %v1431_v48 = vmax.f32 %v6367_v15, %v6886_v36  ;;  %v8220_v50 = vld [vmem:[#allocation166_spill] sm:$0xff]  ;;  %v8221_v7 = vld [vmem:[#allocation108_spill] sm:$0xff] }
 0x2ba   :  { %v1556_v19 = vadd.f32 %v1458_v41, %v734_v17  ;;  %v2302_v20 = vmin.f32 %v6370_v5, %v2147_v54  ;;  %v3395_v42 = vmul.f32 0.25, %v3198_v2  ;;  %v736_v6 = vmin.f32 %v8206_v52, %v8205_v34  ;;  %v8210_v41 = vld [vmem:[#allocation106_spill] sm:$0xff]  ;;  %v8211_v2 = vld [vmem:[#allocation161_spill] sm:$0xff] }
 0x2bb   :  { %v3319_v47 = vpack.c.bf16 %v3270_v49, %v3270_v49  ;;  %v1578_v24 = vadd.f32 %v1480_v57, %v756_v45  ;;  %v2281_v8 = vmin.f32 %v8208_v53, %v8207_v39  ;;  %v2282_v27 = vmin.f32 %v8210_v41, %v8209_v4  ;;  %v8216_v57 = vld [vmem:[#allocation112_spill] sm:$0xff]  ;;  %v8226_v52 = vld [vmem:[#allocation162_spill] sm:$0xff]  ;;  %v8228_v41 = vld [vmem:[#allocation165_spill] sm:$0xff] }
 0x2bc   :  { %v1557_v38 = vadd.f32 %v1459_v14, %v735_v3  ;;  %v1529_v59 = vadd.f32 %v1431_v48, %v707_v29  ;;  %v2253_v15 = vmax.f32 %v6370_v5, %v2147_v54  ;;  %v2378_v23 = vadd.f32 %v2280_v63, %v1556_v19  ;;  %v8214_v5 = vld [vmem:[#allocation90_spill] sm:$0xff]  ;;  %v8215_v63 = vld [vmem:[#allocation169_spill] sm:$0xff]  ;;  %v8217_v29 = vld [vmem:[#allocation155_spill] sm:$0xff] }
 0x2bd   :  { %3369 = vst.msk [vmem:[%s7520_s3 + $0x9c] sm:$0xf] %vm3329_vm3, %v3319_v47  ;;  %v7050_v36 = vadd.f32 %v2302_v20, %v1578_v24  ;;  %v1558_v10 = vadd.f32 %v1460_v61, %v736_v6  ;;  %v3443_v30 = vpack.c.bf16 %v7007_v18, %v7007_v18  ;;  %v3103_v46 = vmin.f32 %v8212_v9, %v8211_v2  ;;  %v8218_v18 = vld [vmem:[#allocation107_spill] sm:$0xff]  ;;  %v8222_v20 = vld [vmem:[#allocation172_spill] sm:$0xff]  ;;  %v8225_v24 = vld [vmem:[#allocation126_spill] sm:$0xff] }
 0x2be   :  { %3552 = vrot.lane.b32.xlu2 %v3441_v31, %s4473_s23  ;;  %v3396_v17 = vmul.f32 0.25, %v3199_v25  ;;  %v3444_v11 = vpack.c.bf16 %v3395_v42, %v3395_v42  ;;  %v3102_v3 = vmin.f32 %v8214_v5, %v8213_v40  ;;  %v1461_v49 = vmin.f32 %v8216_v57, %v8215_v63  ;;  %v8223_v25 = vld [vmem:[#allocation118_spill] sm:$0xff]  ;;  %v8224_v47 = vld [vmem:[#allocation175_spill] sm:$0xff]  ;;  %v8233_v9 = vld [vmem:[#allocation113_spill] sm:$0xff] }
 0x2bf   :  { %3550 = vrot.lane.b32.xlu1 %v3440_v21, %s4473_s23  ;;  %v2380_v1 = vadd.f32 %v2282_v27, %v1558_v10  ;;  %v3104_v45 = vmin.f32 %v8218_v18, %v8217_v29  ;;  %v2379_v54 = vadd.f32 %v2281_v8, %v1557_v38  ;;  %v2351_v28 = vadd.f32 %v2253_v15, %v1529_v59  ;;  %v8227_v6 = vld [vmem:[#allocation119_spill] sm:$0xff]  ;;  %v8229_v27 = vld [vmem:[#allocation125_spill] sm:$0xff]  ;;  %v8230_v15 = vld [vmem:[#allocation176_spill] sm:$0xff] }
 0x2c0   :  { %3554 = vrot.lane.b32.xlu0 %v3442_v35, %s4473_s23  ;;  %v7063_v21 = vpop.permute.xlu1 %2968  ;;  %v7065_v31 = vpop.permute.xlu2 %1330  ;;  %v8219_v35 = vld [vmem:[#allocation187_spill] sm:$0xff]  ;;  %v3200_v19 = vadd.f32 %v3102_v3, %v2378_v23  ;;  %v737_v61 = vmin.f32 %v8221_v7, %v8220_v50  ;;  %v738_v48 = vmin.f32 %v8223_v25, %v8222_v20  ;;  %v1463_v42 = vmin.f32 %v8225_v24, %v8224_v47  ;;  %v8231_v23 = vld [vmem:[#allocation130_spill] sm:$0xff]  ;;  %v8234_v3 = vld [vmem:[#allocation189_spill] sm:$0xff] }
 0x2c1   :  { %v3075_v58 = vmax.f32 %v8219_v35, %v7063_v21  ;;  %v1327_v14 = vpop.permute.xlu0 %1326  ;;  %v3201_v34 = vadd.f32 %v3103_v46, %v2379_v54  ;;  %v1462_v39 = vmin.f32 %v8227_v6, %v8226_v52  ;;  %v3445_v8 = vpack.c.bf16 %v3396_v17, %v3396_v17  ;;  %v8232_v2 = vld [vmem:[#allocation158_spill] sm:$0xff]  ;;  %v8235_v18 = vld [vmem:[#allocation173_spill] sm:$0xff]  ;;  %v8236_v17 = vld [vmem:[#allocation120_spill] sm:$0xff] }
 0x2c2   :  { %v3202_v4 = vadd.f32 %v3104_v45, %v2380_v1  ;;  %v739_v38 = vmin.f32 %v8229_v27, %v8228_v41  ;;  %v1559_v59 = vadd.f32 %v1461_v49, %v737_v61  ;;  %v2285_v10 = vmin.f32 %v8231_v23, %v8230_v15  ;;  %v8237_v54 = vld [vmem:[#allocation188_spill] sm:$0xff]  ;;  %v8241_v52 = vld [vmem:[#allocation170_spill] sm:$0xff]  ;;  %v8242_v6 = vld [vmem:[#allocation131_spill] sm:$0xff] }
 0x2c3   :  { %v3173_v53 = vadd.f32 %v3075_v58, %v2351_v28  ;;  %v2283_v40 = vmin.f32 %v8233_v9, %v8232_v2  ;;  %v1432_v63 = vmax.f32 %v8234_v3, %v1327_v14  ;;  %v1481_v46 = vmin.f32 %v8234_v3, %v1327_v14  ;;  %v8239_v7 = vld [vmem:[#allocation124_spill] sm:$0xff]  ;;  %v8245_v27 = vld [vmem:[#allocation193_spill] sm:$0xff] }
 0x2c4   :  { %v3397_v57 = vmul.f32 0.25, %v3200_v19  ;;  %v1560_v29 = vadd.f32 %v1462_v39, %v738_v48  ;;  %v2284_v1 = vmin.f32 %v8236_v17, %v8235_v18  ;;  %v1561_v45 = vadd.f32 %v1463_v42, %v739_v38  ;;  %v8238_v19 = vld [vmem:[#allocation174_spill] sm:$0xff] }
 0x2c5   :  { %v3271_v5 = vmul.f32 0.25, %v3173_v53  ;;  %v3398_v49 = vmul.f32 0.25, %v3201_v34  ;;  %v708_v28 = vmax.f32 %v8237_v54, %v6931_v51  ;;  %v757_v58 = vmin.f32 %v8237_v54, %v6931_v51  ;;  %v8240_v51 = vld [vmem:[#allocation192_spill] sm:$0xff]  ;;  %v8243_v53 = vld [vmem:[#allocation171_spill] sm:$0xff]  ;;  %v8247_v54 = vld [vmem:[#allocation194_spill] sm:$0xff] }
 0x2c6   :  { %3558 = vrot.lane.b32.xlu2 %v3444_v11, %s4473_s23  ;;  %v2381_v14 = vadd.f32 %v2283_v40, %v1559_v59  ;;  %v3106_v61 = vmin.f32 %v8239_v7, %v8238_v19  ;;  %v2383_v20 = vadd.f32 %v2285_v10, %v1561_v45  ;;  %v3107_v39 = vmin.f32 %v8242_v6, %v8241_v52  ;;  %v8246_v45 = vld [vmem:[#allocation191_spill] sm:$0xff]  ;;  %v8251_v52 = vld [vmem:[#allocation182_spill] sm:$0xff] }
 0x2c7   :  { %3556 = vrot.lane.b32.xlu1 %v3443_v30, %s4473_s23  ;;  %v3320_v50 = vpack.c.bf16 %v3271_v5, %v3271_v5  ;;  %v3399_v30 = vmul.f32 0.25, %v3202_v4  ;;  %v1530_v11 = vadd.f32 %v1432_v63, %v708_v28  ;;  %v1579_v47 = vadd.f32 %v1481_v46, %v757_v58 }
 0x2c8   :  { %3560 = vrot.lane.b32.xlu0 %v3445_v8, %s4473_s23  ;;  %v2149_v25 = vpop.permute.xlu1 %2148  ;;  %v7098_v48 = vpop.permute.xlu2 %608  ;;  %v8244_v8 = vld [vmem:[#allocation114_spill] sm:$0xff]  ;;  %v2382_v4 = vadd.f32 %v2284_v1, %v1560_v29  ;;  %v3076_v38 = vmax.f32 %v8245_v27, %v6980_v56  ;;  %v3125_v59 = vmin.f32 %v8245_v27, %v6980_v56  ;;  %v3446_v10 = vpack.c.bf16 %v3397_v57, %v3397_v57  ;;  %v8253_v27 = vld [vmem:[#allocation168_spill] sm:$0xff] }
 0x2c9   :  { %3370 = vst.msk [vmem:[%s7520_s3 + $0xa0] sm:$0xf] %vm3329_vm3, %v3320_v50  ;;  %v2254_v24 = vmax.f32 %v8240_v51, %v2149_v25  ;;  %v2303_v42 = vmin.f32 %v8240_v51, %v2149_v25  ;;  %v7106_v34 = vpop.permute.xlu0 %604  ;;  %v3105_v41 = vmin.f32 %v8244_v8, %v8243_v53  ;;  %v3447_v2 = vpack.c.bf16 %v3398_v49, %v3398_v49  ;;  %v8252_v8 = vld [vmem:[#allocation185_spill] sm:$0xff] }
 0x2ca   :  { %v3204_v40 = vadd.f32 %v3106_v61, %v2382_v4  ;;  %v3205_v5 = vadd.f32 %v3107_v39, %v2383_v20  ;;  %v3448_v46 = vpack.c.bf16 %v3399_v30, %v3399_v30  ;;  %v709_v49 = vmax.f32 %v8246_v45, %v7106_v34  ;;  %v8249_v30 = vld [vmem:[#allocation196_spill] sm:$0xff] }
 0x2cb   :  { %v2352_v15 = vadd.f32 %v2254_v24, %v1530_v11  ;;  %v2401_v23 = vadd.f32 %v2303_v42, %v1579_v47  ;;  %v3203_v9 = vadd.f32 %v3105_v41, %v2381_v14  ;;  %v8248_v14 = vld [vmem:[#allocation195_spill] sm:$0xff]  ;;  %v8250_v24 = vld [vmem:[#allocation180_spill] sm:$0xff]  ;;  %v3404_v6 = vmul.f32 0.25, %v8251_v52 }
 0x2cc   :  { %v3401_v56 = vmul.f32 0.25, %v3204_v40  ;;  %v3402_v50 = vmul.f32 0.25, %v3205_v5  ;;  %v2255_v19 = vmax.f32 %v8248_v14, %v7026_v43  ;;  %v3403_v42 = vmul.f32 0.25, %v8250_v24  ;;  %v8260_v52 = vld [vmem:[#allocation200_spill] sm:$0xff] }
 0x2cd   :  { %v3174_v3 = vadd.f32 %v3076_v38, %v2352_v15  ;;  %v7116_v63 = vadd.f32 %v3125_v59, %v2401_v23  ;;  %v3400_v18 = vmul.f32 0.25, %v3203_v9  ;;  %v3405_v41 = vmul.f32 0.25, %v8252_v8  ;;  %v8254_v15 = vld [vmem:[#allocation197_spill] sm:$0xff]  ;;  %v8261_v8 = vld [vmem:[#allocation199_spill] sm:$0xff] }
 0x2ce   :  { %3564 = vrot.lane.b32.xlu2 %v3447_v2, %s4473_s23  ;;  %v3450_v20 = vpack.c.bf16 %v3401_v56, %v3401_v56  ;;  %v3451_v47 = vpack.c.bf16 %v3402_v50, %v3402_v50  ;;  %v1434_v23 = vmax.f32 %v8254_v15, %v7065_v31  ;;  %v3452_v2 = vpack.c.bf16 %v3403_v42, %v3403_v42  ;;  %v8257_v56 = vld [vmem:[#allocation186_spill] sm:$0xff] }
 0x2cf   :  { %3562 = vrot.lane.b32.xlu1 %v3446_v10, %s4473_s23  ;;  %v3272_v29 = vmul.f32 0.25, %v3174_v3  ;;  %v3449_v61 = vpack.c.bf16 %v3400_v18, %v3400_v18  ;;  %v3453_v9 = vpack.c.bf16 %v3404_v6, %v3404_v6  ;;  %v3454_v40 = vpack.c.bf16 %v3405_v41, %v3405_v41  ;;  %v8255_v3 = vld [vmem:[#allocation198_spill] sm:$0xff] }
 0x2d0   :  { %3566 = vrot.lane.b32.xlu0 %v3448_v46, %s4473_s23  ;;  %v7121_v17 = vpop.permute.xlu1 %1328  ;;  %v7123_v57 = vpop.permute.xlu2 %2976  ;;  %v8258_v50 = vld [vmem:[#allocation190_spill] sm:$0xff]  ;;  %v711_v41 = vmax.f32 %v8261_v8, %v7098_v48 }
 0x2d1   :  { %v3321_v1 = vpack.c.bf16 %v3272_v29, %v3272_v29  ;;  %v1433_v28 = vmax.f32 %v8247_v54, %v7121_v17  ;;  %v7129_v58 = vpop.permute.xlu0 %2972  ;;  %v8256_v29 = vld [vmem:[#allocation147_spill] sm:$0xff] }
 0x2d2   :  { %v3077_v11 = vmax.f32 %v8249_v30, %v7129_v58  ;;  %v3406_v18 = vmul.f32 0.25, %v8256_v29 }
 0x2d3   :  { %3371 = vst.msk [vmem:[%s7520_s3 + $0xa4] sm:$0xf] %vm3329_vm3, %v3321_v1  ;;  %v1531_v7 = vadd.f32 %v1433_v28, %v709_v49  ;;  %v3407_v1 = vmul.f32 0.25, %v8257_v56 }
 0x2d5   :  { %v2353_v25 = vadd.f32 %v2255_v19, %v1531_v7  ;;  %v3408_v19 = vmul.f32 0.25, %v8258_v50  ;;  %v8266_v50 = vld [vmem:[#allocation6_spill] sm:$0xff] }
 0x2d6   :  { %3570 = vrot.lane.b32.xlu2 %v3450_v20, %s4473_s23 }
 0x2d7   :  { %3568 = vrot.lane.b32.xlu1 %v3449_v61, %s4473_s23  ;;  %v3175_v51 = vadd.f32 %v3077_v11, %v2353_v25  ;;  %v8259_v61 = vld [vmem:[#allocation201_spill] sm:$0xff]  ;;  %v3457_v24 = vpack.c.bf16 %v3408_v19, %v3408_v19  ;;  %v3079_v19 = vmax.f32 %v8266_v50, %v7123_v57 }
 0x2d8   :  { %3572 = vrot.lane.b32.xlu0 %v3451_v47, %s4473_s23  ;;  %v7144_v39 = vpop.permute.xlu1 %606  ;;  %v7146_v53 = vpop.permute.xlu2 %2156  ;;  %v3455_v47 = vpack.c.bf16 %v3406_v18, %v3406_v18  ;;  %v8265_v18 = vld [vmem:[#allocation44_spill] sm:$0xff] }
 0x2d9   :  { %v3273_v4 = vmul.f32 0.25, %v3175_v51  ;;  %v710_v38 = vmax.f32 %v8253_v27, %v7144_v39  ;;  %v7151_v59 = vpop.permute.xlu0 %2152  ;;  %v3456_v51 = vpack.c.bf16 %v3407_v1, %v3407_v1 }
 0x2da   :  { %v2256_v46 = vmax.f32 %v8255_v3, %v7151_v59 }
 0x2db   :  { %v3322_v10 = vpack.c.bf16 %v3273_v4, %v3273_v4  ;;  %v1532_v5 = vadd.f32 %v1434_v23, %v710_v38  ;;  %v8262_v38 = vld [vmem:[#allocation160_spill] sm:$0xff] }
 0x2dc   :  { %v3409_v23 = vmul.f32 0.25, %v8262_v38 }
 0x2dd   :  { %3372 = vst.msk [vmem:[%s7520_s3 + $0xa8] sm:$0xf] %vm3329_vm3, %v3322_v10  ;;  %v2354_v7 = vadd.f32 %v2256_v46, %v1532_v5  ;;  %v8263_v10 = vld [vmem:[#allocation167_spill] sm:$0xff]  ;;  %v8264_v5 = vld [vmem:[#allocation202_spill] sm:$0xff] }
 0x2de   :  { %3576 = vrot.lane.b32.xlu2 %v3453_v9, %s4473_s23  ;;  %v3411_v46 = vmul.f32 0.25, %v8264_v5 }
 0x2df   :  { %3574 = vrot.lane.b32.xlu1 %v3452_v2, %s4473_s23  ;;  %v3410_v2 = vmul.f32 0.25, %v8263_v10 }
 0x2e0   :  { %3578 = vrot.lane.b32.xlu0 %v3454_v40, %s4473_s23  ;;  %v7166_v49 = vpop.permute.xlu1 %2974  ;;  %v7168_v28 = vpop.permute.xlu2 %1336 }
 0x2e1   :  { %v3078_v20 = vmax.f32 %v8259_v61, %v7166_v49  ;;  %v7173_v25 = vpop.permute.xlu0 %1332 }
 0x2e2   :  { %v1435_v6 = vmax.f32 %v8260_v52, %v7173_v25 }
 0x2e3   :  { %v3176_v11 = vadd.f32 %v3078_v20, %v2354_v7  ;;  %v3458_v20 = vpack.c.bf16 %v3409_v23, %v3409_v23  ;;  %v3414_v23 = vmul.f32 0.25, %v6755_v13 }
 0x2e4   :  { %v1533_v29 = vadd.f32 %v1435_v6, %v711_v41  ;;  %v3413_v41 = vmul.f32 0.25, %v6696_v44 }
 0x2e5   :  { %v3274_v42 = vmul.f32 0.25, %v3176_v11  ;;  %v3459_v11 = vpack.c.bf16 %v3410_v2, %v3410_v2  ;;  %v8268_v2 = vld [vmem:[#allocation59_spill] sm:$0xff] }
 0x2e6   :  { %3582 = vrot.lane.b32.xlu2 %v3456_v51, %s4473_s23  ;;  %v3462_v13 = vpack.c.bf16 %v3413_v41, %v3413_v41 }
 0x2e7   :  { %3580 = vrot.lane.b32.xlu1 %v3455_v47, %s4473_s23  ;;  %v3323_v4 = vpack.c.bf16 %v3274_v42, %v3274_v42  ;;  %v3460_v47 = vpack.c.bf16 %v3411_v46, %v3411_v46  ;;  %v8267_v42 = vld [vmem:[#allocation8_spill] sm:$0xff] }
 0x2e8   :  { %3584 = vrot.lane.b32.xlu0 %v3457_v24, %s4473_s23  ;;  %v7184_v9 = vpop.permute.xlu1 %2154  ;;  %v7186_v40 = vpop.permute.xlu2 %614  ;;  %v3412_v6 = vmul.f32 0.25, %v8267_v42 }
 0x2e9   :  { %3373 = vst.msk [vmem:[%s7520_s3 + $0xac] sm:$0xf] %vm3329_vm3, %v3323_v4  ;;  %v2257_v56 = vmax.f32 %v8265_v18, %v7184_v9  ;;  %v7195_v1 = vpop.permute.xlu0 %610 }
 0x2ea   :  { %v712_v5 = vmax.f32 %v8268_v2, %v7195_v1 }
 0x2eb   :  { %v2355_v7 = vadd.f32 %v2257_v56, %v1533_v29  ;;  %v2258_v56 = vmax.f32 %v6656_v0, %v7146_v53 }
 0x2ed   :  { %v3177_v51 = vadd.f32 %v3079_v19, %v2355_v7  ;;  %v3461_v19 = vpack.c.bf16 %v3412_v6, %v3412_v6  ;;  %v3463_v7 = vpack.c.bf16 %v3414_v23, %v3414_v23  ;;  %v3416_v6 = vmul.f32 0.25, %v6899_v37 }
 0x2ee   :  { %3588 = vrot.lane.b32.xlu2 %v3459_v11, %s4473_s23  ;;  %v759_v37 = vmin.f32 %v8253_v27, %v7144_v39  ;;  %v2306_v39 = vmin.f32 %v8265_v18, %v7184_v9  ;;  %v3127_v9 = vmin.f32 %v8259_v61, %v7166_v49  ;;  %v761_v61 = vmin.f32 %v8268_v2, %v7195_v1 }
 0x2ef   :  { %3586 = vrot.lane.b32.xlu1 %v3458_v20, %s4473_s23  ;;  %v3275_v24 = vmul.f32 0.25, %v3177_v51  ;;  %v3124_v51 = vmin.f32 %v8219_v35, %v7063_v21  ;;  %v2307_v1 = vmin.f32 %v6656_v0, %v7146_v53 }
 0x2f0   :  { %3590 = vrot.lane.b32.xlu0 %v3460_v47, %s4473_s23  ;;  %v7204_v4 = vpop.permute.xlu1 %1334  ;;  %v7206_v38 = vpop.permute.xlu2 %2982  ;;  %v3415_v47 = vmul.f32 0.25, %v6822_v26  ;;  %v758_v26 = vmin.f32 %v8246_v45, %v7106_v34  ;;  %v1437_v45 = vmax.f32 %v6691_v33, %v7168_v28 }
 0x2f1   :  { %v3324_v10 = vpack.c.bf16 %v3275_v24, %v3275_v24  ;;  %v1436_v46 = vmax.f32 %v6654_v55, %v7204_v4  ;;  %v7213_v29 = vpop.permute.xlu0 %2978  ;;  %v1482_v24 = vmin.f32 %v8247_v54, %v7121_v17  ;;  %v3222_v17 = vadd.f32 %v3124_v51, %v7050_v36 }
 0x2f2   :  { %v3080_v11 = vmax.f32 %v6662_v32, %v7213_v29  ;;  %v3464_v35 = vpack.c.bf16 %v3415_v47, %v3415_v47 }
 0x2f3   :  { %3374 = vst.msk [vmem:[%s7520_s3 + $0xb0] sm:$0xf] %vm3329_vm3, %v3324_v10  ;;  %v1534_v44 = vadd.f32 %v1436_v46, %v712_v5  ;;  %v3417_v10 = vmul.f32 0.25, %v6955_v22  ;;  %v1484_v22 = vmin.f32 %v8260_v52, %v7173_v25  ;;  %v1580_v34 = vadd.f32 %v1482_v24, %v758_v26 }
 0x2f4   :  { %v2304_v25 = vmin.f32 %v8248_v14, %v7026_v43  ;;  %v3418_v43 = vmul.f32 0.25, %v7017_v12  ;;  %v3419_v14 = vmul.f32 0.25, %v3222_v17  ;;  %v3128_v24 = vmin.f32 %v8266_v50, %v7123_v57 }
 0x2f5   :  { %v2356_v20 = vadd.f32 %v2258_v56, %v1534_v44  ;;  %v3465_v56 = vpack.c.bf16 %v3416_v6, %v3416_v6  ;;  %v1483_v44 = vmin.f32 %v8254_v15, %v7065_v31  ;;  %v3466_v27 = vpack.c.bf16 %v3417_v10, %v3417_v10 }
 0x2f6   :  { %3594 = vrot.lane.b32.xlu2 %v3462_v13, %s4473_s23  ;;  %v1485_v13 = vmin.f32 %v6654_v55, %v7204_v4  ;;  %v3467_v4 = vpack.c.bf16 %v3418_v43, %v3418_v43 }
 0x2f7   :  { %3592 = vrot.lane.b32.xlu1 %v3461_v19, %s4473_s23  ;;  %v3178_v42 = vadd.f32 %v3080_v11, %v2356_v20  ;;  %v760_v19 = vmin.f32 %v8261_v8, %v7098_v48  ;;  %v1581_v31 = vadd.f32 %v1483_v44, %v759_v37  ;;  %v2305_v48 = vmin.f32 %v8255_v3, %v7151_v59  ;;  %v8269_v11 = vld [vmem:[#allocation40_spill] sm:$0xff] }
 0x2f8   :  { %3596 = vrot.lane.b32.xlu0 %v3463_v7, %s4473_s23  ;;  %v613_v41 = vpop.permute.xlu1 %612  ;;  %v3535_v23 = vpop.permute.xlu2 %3534  ;;  %v2402_v8 = vadd.f32 %v2304_v25, %v1580_v34  ;;  %v3420_v3 = vmul.f32 0.25, %v7116_v63  ;;  %v3126_v20 = vmin.f32 %v8249_v30, %v7129_v58  ;;  %v1486_v58 = vmin.f32 %v6691_v33, %v7168_v28  ;;  %v8271_v28 = vld [vmem:[#allocation3_spill] sm:$0xff] }
 0x2f9   :  { %v3276_v5 = vmul.f32 0.25, %v3178_v42  ;;  %v713_v46 = vmax.f32 %v6689_v60, %v613_v41  ;;  %3678 = vst.msk [vmem:[%s7520_s3 + $0x10] sm:$0xf] %vm3673_vm4, %v3535_v23  ;;  %v7240_v21 = vpop.permute.xlu0 %2158  ;;  %v1582_v15 = vadd.f32 %v1484_v22, %v760_v19  ;;  %v2403_v49 = vadd.f32 %v2305_v48, %v1581_v31 }
 0x2fa   :  { %v2259_v52 = vmax.f32 %v6694_v62, %v7240_v21  ;;  %v762_v55 = vmin.f32 %v6689_v60, %v613_v41  ;;  %v3468_v42 = vpack.c.bf16 %v3419_v14, %v3419_v14  ;;  %v3224_v6 = vadd.f32 %v3126_v20, %v2402_v8 }
 0x2fb   :  { %v3325_v54 = vpack.c.bf16 %v3276_v5, %v3276_v5  ;;  %v1535_v36 = vadd.f32 %v1437_v45, %v713_v46  ;;  %v2404_v18 = vadd.f32 %v2306_v39, %v1582_v15  ;;  %v3225_v23 = vadd.f32 %v3127_v9, %v2403_v49  ;;  %v8270_v46 = vld [vmem:[#allocation53_spill] sm:$0xff] }
 0x2fc   :  { %v1583_v10 = vadd.f32 %v1485_v13, %v761_v61  ;;  %v3469_v26 = vpack.c.bf16 %v3420_v3, %v3420_v3  ;;  %v1584_v60 = vadd.f32 %v1486_v58, %v762_v55  ;;  %v2308_v2 = vmin.f32 %v6694_v62, %v7240_v21 }
 0x2fd   :  { %3375 = vst.msk [vmem:[%s7520_s3 + $0xb4] sm:$0xf] %vm3329_vm3, %v3325_v54  ;;  %v2357_v12 = vadd.f32 %v2259_v52, %v1535_v36  ;;  %v3226_v30 = vadd.f32 %v3128_v24, %v2404_v18  ;;  %v3421_v33 = vmul.f32 0.25, %v3224_v6  ;;  %v714_v41 = vmax.f32 %v8271_v28, %v7186_v40  ;;  %v8272_v54 = vld [vmem:[#allocation36_spill] sm:$0xff] }
 0x2fe   :  { %3600 = vrot.lane.b32.xlu2 %v3465_v56, %s4473_s23  ;;  %v3422_v22 = vmul.f32 0.25, %v3225_v23  ;;  %v2405_v53 = vadd.f32 %v2307_v1, %v1583_v10  ;;  %v3129_v19 = vmin.f32 %v6662_v32, %v7213_v29  ;;  %v2406_v39 = vadd.f32 %v2308_v2, %v1584_v60 }
 0x2ff   :  { %3598 = vrot.lane.b32.xlu1 %v3464_v35, %s4473_s23  ;;  %v763_v35 = vmin.f32 %v8271_v28, %v7186_v40  ;;  %v3423_v0 = vmul.f32 0.25, %v3226_v30  ;;  %v3470_v48 = vpack.c.bf16 %v3421_v33, %v3421_v33 }
 0x300   :  { %3602 = vrot.lane.b32.xlu0 %v3466_v27, %s4473_s23  ;;  %v2981_v7 = vpop.permute.xlu1 %2980  ;;  %v7273_v59 = vpop.permute.xlu2 %2162  ;;  %v8273_v27 = vld [vmem:[#allocation2_spill] sm:$0xff]  ;;  %v3471_v15 = vpack.c.bf16 %v3422_v22, %v3422_v22  ;;  %v3227_v43 = vadd.f32 %v3129_v19, %v2405_v53 }
 0x301   :  { %v3081_v47 = vmax.f32 %v8269_v11, %v2981_v7  ;;  %v1339_v51 = vpop.permute.xlu0 %1338  ;;  %v3130_v17 = vmin.f32 %v8269_v11, %v2981_v7  ;;  %v3082_v25 = vmax.f32 %v8273_v27, %v7206_v38  ;;  %v3131_v36 = vmin.f32 %v8273_v27, %v7206_v38  ;;  %v8274_v38 = vld [vmem:[#allocation4_spill] sm:$0xff] }
 0x302   :  { %v1438_v57 = vmax.f32 %v8270_v46, %v1339_v51  ;;  %v1487_v50 = vmin.f32 %v8270_v46, %v1339_v51  ;;  %v3472_v8 = vpack.c.bf16 %v3423_v0, %v3423_v0  ;;  %v3424_v18 = vmul.f32 0.25, %v3227_v43  ;;  %v8275_v51 = vld [vmem:[#allocation48_spill] sm:$0xff] }
 0x303   :  { %v3179_v63 = vadd.f32 %v3081_v47, %v2357_v12  ;;  %v3228_v14 = vadd.f32 %v3130_v17, %v2406_v39  ;;  %v2261_v55 = vmax.f32 %v6894_v16, %v7273_v59 }
 0x304   :  { %v1536_v34 = vadd.f32 %v1438_v57, %v714_v41  ;;  %v1585_v45 = vadd.f32 %v1487_v50, %v763_v35 }
 0x305   :  { %v3277_v5 = vmul.f32 0.25, %v3179_v63  ;;  %v3425_v13 = vmul.f32 0.25, %v3228_v14  ;;  %v3473_v63 = vpack.c.bf16 %v3424_v18, %v3424_v18 }
 0x306   :  { %3606 = vrot.lane.b32.xlu2 %v3468_v42, %s4473_s23 }
 0x307   :  { %3604 = vrot.lane.b32.xlu1 %v3467_v4, %s4473_s23  ;;  %v3326_v37 = vpack.c.bf16 %v3277_v5, %v3277_v5  ;;  %v2310_v4 = vmin.f32 %v6894_v16, %v7273_v59  ;;  %v3474_v23 = vpack.c.bf16 %v3425_v13, %v3425_v13 }
 0x308   :  { %3608 = vrot.lane.b32.xlu0 %v3469_v26, %s4473_s23  ;;  %v2161_v62 = vpop.permute.xlu1 %2160  ;;  %v3541_v21 = vpop.permute.xlu2 %3540  ;;  %v8276_v26 = vld [vmem:[#allocation10_spill] sm:$0xff] }
 0x309   :  { %3376 = vst.msk [vmem:[%s7520_s3 + $0xb8] sm:$0xf] %vm3329_vm3, %v3326_v37  ;;  %v2260_v56 = vmax.f32 %v8272_v54, %v2161_v62  ;;  %v2309_v40 = vmin.f32 %v8272_v54, %v2161_v62  ;;  %v617_v44 = vpop.permute.xlu0 %616 }
 0x30a   :  { %3681 = vst.msk [vmem:[%s7520_s3 + $0x1c] sm:$0xf] %vm3673_vm4, %v3541_v21  ;;  %v715_v3 = vmax.f32 %v8274_v38, %v617_v44  ;;  %v764_v47 = vmin.f32 %v8274_v38, %v617_v44 }
 0x30b   :  { %v2358_v52 = vadd.f32 %v2260_v56, %v1536_v34  ;;  %v2407_v31 = vadd.f32 %v2309_v40, %v1585_v45 }
 0x30d   :  { %v3180_v32 = vadd.f32 %v3082_v25, %v2358_v52  ;;  %v3229_v29 = vadd.f32 %v3131_v36, %v2407_v31 }
 0x30e   :  { %3612 = vrot.lane.b32.xlu2 %v3471_v15, %s4473_s23 }
 0x30f   :  { %3610 = vrot.lane.b32.xlu1 %v3470_v48, %s4473_s23  ;;  %v3278_v9 = vmul.f32 0.25, %v3180_v32  ;;  %v3426_v7 = vmul.f32 0.25, %v3229_v29 }
 0x310   :  { %3614 = vrot.lane.b32.xlu0 %v3472_v8, %s4473_s23  ;;  %v1341_v20 = vpop.permute.xlu1 %1340  ;;  %v3547_v12 = vpop.permute.xlu2 %3546 }
 0x311   :  { %v3327_v11 = vpack.c.bf16 %v3278_v9, %v3278_v9  ;;  %v1439_v24 = vmax.f32 %v8275_v51, %v1341_v20  ;;  %v1488_v49 = vmin.f32 %v8275_v51, %v1341_v20  ;;  %3684 = vst.msk [vmem:[%s7520_s3 + $0x28] sm:$0xf] %vm3673_vm4, %v3547_v12  ;;  %v2985_v61 = vpop.permute.xlu0 %2984  ;;  %v3475_v58 = vpack.c.bf16 %v3426_v7, %v3426_v7 }
 0x312   :  { %v3083_v5 = vmax.f32 %v8276_v26, %v2985_v61  ;;  %v3132_v46 = vmin.f32 %v8276_v26, %v2985_v61 }
 0x313   :  { %3377 = vst.msk [vmem:[%s7520_s3 + $0xbc] sm:$0xf] %vm3329_vm3, %v3327_v11  ;;  %v1537_v42 = vadd.f32 %v1439_v24, %v715_v3  ;;  %v1586_v6 = vadd.f32 %v1488_v49, %v764_v47 }
 0x315   :  { %v2359_v30 = vadd.f32 %v2261_v55, %v1537_v42  ;;  %v2408_v10 = vadd.f32 %v2310_v4, %v1586_v6 }
 0x316   :  { %3618 = vrot.lane.b32.xlu2 %v3474_v23, %s4473_s23 }
 0x317   :  { %3616 = vrot.lane.b32.xlu1 %v3473_v63, %s4473_s23  ;;  %v3181_v16 = vadd.f32 %v3083_v5, %v2359_v30  ;;  %v3230_v59 = vadd.f32 %v3132_v46, %v2408_v10 }
 0x318   :  { %3620 = vrot.lane.b32.xlu0 %v3475_v58, %s4473_s23  ;;  %v3533_v57 = vpop.permute.xlu1 %3532  ;;  %v3553_v50 = vpop.permute.xlu2 %3552 }
 0x319   :  { %v3279_v1 = vmul.f32 0.25, %v3181_v16  ;;  %v3427_v60 = vmul.f32 0.25, %v3230_v59  ;;  %3677 = vst.msk [vmem:[%s7520_s3 + $0xc] sm:$0xf] %vm3673_vm4, %v3533_v57 }
 0x31a   :  { %v3537_v2 = vpop.permute.xlu0 %3536  ;;  %3687 = vst.msk [vmem:[%s7520_s3 + $0x34] sm:$0xf] %vm3673_vm4, %v3553_v50 }
 0x31b   :  { %v3328_v33 = vpack.c.bf16 %v3279_v1, %v3279_v1  ;;  %v3476_v28 = vpack.c.bf16 %v3427_v60, %v3427_v60  ;;  %3679 = vst.msk [vmem:[%s7520_s3 + $0x14] sm:$0xf] %vm3673_vm4, %v3537_v2 }
 0x31d   :  { %3378 = vst.msk [vmem:[%s7520_s3 + $0xc0] sm:$0xf] %vm3329_vm3, %v3328_v33 }
 0x31f   :  { %3622 = vrot.lane.b32.xlu1 %v3476_v28, %s4473_s23 }
 0x320   :  { %v3559_v35 = vpop.permute.xlu2 %3558 }
 0x321   :  { %v3539_v41 = vpop.permute.xlu1 %3538  ;;  %3690 = vst.msk [vmem:[%s7520_s3 + $0x40] sm:$0xf] %vm3673_vm4, %v3559_v35 }
 0x322   :  { %3680 = vst.msk [vmem:[%s7520_s3 + $0x18] sm:$0xf] %vm3673_vm4, %v3539_v41  ;;  %v3543_v37 = vpop.permute.xlu0 %3542 }
 0x323   :  { %3682 = vst.msk [vmem:[%s7520_s3 + $0x20] sm:$0xf] %vm3673_vm4, %v3543_v37 }
 0x328   :  { %v3565_v0 = vpop.permute.xlu2 %3564 }
 0x329   :  { %v3545_v22 = vpop.permute.xlu1 %3544  ;;  %3693 = vst.msk [vmem:[%s7520_s3 + $0x4c] sm:$0xf] %vm3673_vm4, %v3565_v0 }
 0x32a   :  { %3683 = vst.msk [vmem:[%s7520_s3 + $0x24] sm:$0xf] %vm3673_vm4, %v3545_v22  ;;  %v3549_v53 = vpop.permute.xlu0 %3548 }
 0x32b   :  { %3685 = vst.msk [vmem:[%s7520_s3 + $0x2c] sm:$0xf] %vm3673_vm4, %v3549_v53 }
 0x330   :  { %v3571_v62 = vpop.permute.xlu2 %3570 }
 0x331   :  { %v3551_v17 = vpop.permute.xlu1 %3550  ;;  %3696 = vst.msk [vmem:[%s7520_s3 + $0x58] sm:$0xf] %vm3673_vm4, %v3571_v62 }
 0x332   :  { %3686 = vst.msk [vmem:[%s7520_s3 + $0x30] sm:$0xf] %vm3673_vm4, %v3551_v17  ;;  %v3555_v21 = vpop.permute.xlu0 %3554 }
 0x333   :  { %3688 = vst.msk [vmem:[%s7520_s3 + $0x38] sm:$0xf] %vm3673_vm4, %v3555_v21 }
 0x338   :  { %v3577_v45 = vpop.permute.xlu2 %3576 }
 0x339   :  { %v3557_v34 = vpop.permute.xlu1 %3556  ;;  %3699 = vst.msk [vmem:[%s7520_s3 + $0x64] sm:$0xf] %vm3673_vm4, %v3577_v45 }
 0x33a   :  { %3689 = vst.msk [vmem:[%s7520_s3 + $0x3c] sm:$0xf] %vm3673_vm4, %v3557_v34  ;;  %v3561_v54 = vpop.permute.xlu0 %3560 }
 0x33b   :  { %3691 = vst.msk [vmem:[%s7520_s3 + $0x44] sm:$0xf] %vm3673_vm4, %v3561_v54 }
 0x340   :  { %v3583_v40 = vpop.permute.xlu2 %3582 }
 0x341   :  { %v3563_v56 = vpop.permute.xlu1 %3562  ;;  %3702 = vst.msk [vmem:[%s7520_s3 + $0x70] sm:$0xf] %vm3673_vm4, %v3583_v40 }
 0x342   :  { %3692 = vst.msk [vmem:[%s7520_s3 + $0x48] sm:$0xf] %vm3673_vm4, %v3563_v56  ;;  %v3567_v44 = vpop.permute.xlu0 %3566 }
 0x343   :  { %3694 = vst.msk [vmem:[%s7520_s3 + $0x50] sm:$0xf] %vm3673_vm4, %v3567_v44 }
 0x348   :  { %v3589_v39 = vpop.permute.xlu2 %3588 }
 0x349   :  { %v3569_v19 = vpop.permute.xlu1 %3568  ;;  %3705 = vst.msk [vmem:[%s7520_s3 + $0x7c] sm:$0xf] %vm3673_vm4, %v3589_v39 }
 0x34a   :  { %3695 = vst.msk [vmem:[%s7520_s3 + $0x54] sm:$0xf] %vm3673_vm4, %v3569_v19  ;;  %v3573_v27 = vpop.permute.xlu0 %3572 }
 0x34b   :  { %3697 = vst.msk [vmem:[%s7520_s3 + $0x5c] sm:$0xf] %vm3673_vm4, %v3573_v27 }
 0x350   :  { %v3595_v36 = vpop.permute.xlu2 %3594 }
 0x351   :  { %v3575_v25 = vpop.permute.xlu1 %3574  ;;  %3708 = vst.msk [vmem:[%s7520_s3 + $0x88] sm:$0xf] %vm3673_vm4, %v3595_v36 }
 0x352   :  { %3698 = vst.msk [vmem:[%s7520_s3 + $0x60] sm:$0xf] %vm3673_vm4, %v3575_v25  ;;  %v3579_v52 = vpop.permute.xlu0 %3578 }
 0x353   :  { %3700 = vst.msk [vmem:[%s7520_s3 + $0x68] sm:$0xf] %vm3673_vm4, %v3579_v52 }
 0x358   :  { %v3601_v48 = vpop.permute.xlu2 %3600 }
 0x359   :  { %v3581_v31 = vpop.permute.xlu1 %3580  ;;  %3711 = vst.msk [vmem:[%s7520_s3 + $0x94] sm:$0xf] %vm3673_vm4, %v3601_v48 }
 0x35a   :  { %3701 = vst.msk [vmem:[%s7520_s3 + $0x6c] sm:$0xf] %vm3673_vm4, %v3581_v31  ;;  %v3585_v15 = vpop.permute.xlu0 %3584 }
 0x35b   :  { %3703 = vst.msk [vmem:[%s7520_s3 + $0x74] sm:$0xf] %vm3673_vm4, %v3585_v15 }
 0x360   :  { %v3607_v14 = vpop.permute.xlu2 %3606 }
 0x361   :  { %v3587_v43 = vpop.permute.xlu1 %3586  ;;  %3714 = vst.msk [vmem:[%s7520_s3 + $0xa0] sm:$0xf] %vm3673_vm4, %v3607_v14 }
 0x362   :  { %3704 = vst.msk [vmem:[%s7520_s3 + $0x78] sm:$0xf] %vm3673_vm4, %v3587_v43  ;;  %v3591_v8 = vpop.permute.xlu0 %3590 }
 0x363   :  { %3706 = vst.msk [vmem:[%s7520_s3 + $0x80] sm:$0xf] %vm3673_vm4, %v3591_v8 }
 0x368   :  { %v3613_v29 = vpop.permute.xlu2 %3612 }
 0x369   :  { %v3593_v32 = vpop.permute.xlu1 %3592  ;;  %3717 = vst.msk [vmem:[%s7520_s3 + $0xac] sm:$0xf] %vm3673_vm4, %v3613_v29 }
 0x36a   :  { %3707 = vst.msk [vmem:[%s7520_s3 + $0x84] sm:$0xf] %vm3673_vm4, %v3593_v32  ;;  %v3597_v9 = vpop.permute.xlu0 %3596 }
 0x36b   :  { %3709 = vst.msk [vmem:[%s7520_s3 + $0x8c] sm:$0xf] %vm3673_vm4, %v3597_v9 }
 0x370   :  { %v3619_v13 = vpop.permute.xlu2 %3618 }
 0x371   :  { %v3599_v18 = vpop.permute.xlu1 %3598  ;;  %3720 = vst.msk [vmem:[%s7520_s3 + $0xb8] sm:$0xf] %vm3673_vm4, %v3619_v13 }
 0x372   :  { %3710 = vst.msk [vmem:[%s7520_s3 + $0x90] sm:$0xf] %vm3673_vm4, %v3599_v18  ;;  %v3603_v7 = vpop.permute.xlu0 %3602 }
 0x373   :  { %3712 = vst.msk [vmem:[%s7520_s3 + $0x98] sm:$0xf] %vm3673_vm4, %v3603_v7 }
 0x379   :  { %v3605_v38 = vpop.permute.xlu1 %3604 }
 0x37a   :  { %3713 = vst.msk [vmem:[%s7520_s3 + $0x9c] sm:$0xf] %vm3673_vm4, %v3605_v38  ;;  %v3609_v3 = vpop.permute.xlu0 %3608 }
 0x37b   :  { %3715 = vst.msk [vmem:[%s7520_s3 + $0xa4] sm:$0xf] %vm3673_vm4, %v3609_v3 }
 0x381   :  { %v3611_v20 = vpop.permute.xlu1 %3610 }
 0x382   :  { %3716 = vst.msk [vmem:[%s7520_s3 + $0xa8] sm:$0xf] %vm3673_vm4, %v3611_v20  ;;  %v3615_v12 = vpop.permute.xlu0 %3614 }
 0x383   :  { %3718 = vst.msk [vmem:[%s7520_s3 + $0xb0] sm:$0xf] %vm3673_vm4, %v3615_v12 }
 0x389   :  { %v3617_v11 = vpop.permute.xlu1 %3616 }
 0x38a   :  { %3719 = vst.msk [vmem:[%s7520_s3 + $0xb4] sm:$0xf] %vm3673_vm4, %v3617_v11  ;;  %v3621_v47 = vpop.permute.xlu0 %3620 }
 0x38b   :  { %3721 = vst.msk [vmem:[%s7520_s3 + $0xbc] sm:$0xf] %vm3673_vm4, %v3621_v47 }
 0x391   :  { %v3623_v51 = vpop.permute.xlu1 %3622 }
 0x392   :  { %3722 = vst.msk [vmem:[%s7520_s3 + $0xc0] sm:$0xf] %vm3673_vm4, %v3623_v51 }

// kernel: all_lenet5_forward.3
= control target key start
LH: loop header
LB: loop body
LE: loop exit
PB: predicated region body
PF: predicated region fallthrough
CT: control target
= control target key end

     0   :  { %vm173_vm0 = vcmask 1042432   ;;  %s2644_s0 = inlined_call_operand.vmem [shape: bf16[4,50,150], index: 0, kind: input, shape index: {}]   ;;  %s2645_s1 = inlined_call_operand.vmem [shape: bf16[150,16], index: 1, kind: input, shape index: {}]   ;;  %s2646_s2 = inlined_call_operand.vmem [shape: f32[1,16], index: 2, kind: input, shape index: {}]   ;;  %s2647_s3 = inlined_call_operand.vmem [shape: bf16[400,120], index: 3, kind: input, shape index: {}]   ;;  %s2648_s4 = inlined_call_operand.vmem [shape: f32[1,120], index: 4, kind: input, shape index: {}]   ;;  %s2649_s5 = inlined_call_operand.vmem [shape: bf16[60,84], index: 5, kind: input, shape index: {}]   ;;  %s2650_s6 = inlined_call_operand.vmem [shape: bf16[60,84], index: 6, kind: input, shape index: {}]   ;;  %s2651_s7 = inlined_call_operand.vmem [shape: f32[1,84], index: 7, kind: input, shape index: {}]   ;;  %s2652_s8 = inlined_call_operand.vmem [shape: bf16[42,10], index: 8, kind: input, shape index: {}]   ;;  %s2653_s9 = inlined_call_operand.vmem [shape: bf16[42,10], index: 9, kind: input, shape index: {}]   ;;  %s2654_s10 = inlined_call_operand.vmem [shape: f32[1,10], index: 10, kind: input, shape index: {}]   ;;  %s2655_s11 = inlined_call_operand.hbm [shape: f32[2,10], index: 11, kind: output, shape index: {}]  }
   0x1   :  { %v1999_v0 = vld [vmem:[%s2645_s1 + $0x38] sm:$0xff]  ;;  %v65_v1 = vld [vmem:[%s2645_s1 + $0x48] sm:$0x7]  ;;  %v2009_v3 = vld [vmem:[%s2645_s1 + $0x30] sm:$0xff] }
   0x2   :  { %v140_v2 = vunpack.c.l.b16 %v65_v1  ;;  %177 = vmatpush.bf16.msra.mxu0 %v1999_v0  ;;  %328 = vmatpush.bf16.msra.mxu2 %v1999_v0  ;;  %v1824_v6 = vld [vmem:[%s2645_s1 + $0x40] sm:$0xff]  ;;  %v2018_v7 = vld [vmem:[%s2645_s1 + $0x28] sm:$0xff]  ;;  %v1825_v8 = vld [vmem:[%s2644_s0 + $0x3c] sm:$0xf] }
   0x3   :  { %v1555_v9 = vld [vmem:[%s2644_s0 + $0x40] sm:$0xf0]  ;;  %v1484_v11 = vld [vmem:[%s2644_s0 + $0x8] sm:$0xf0] }
   0x4   :  { %v150_v4 = vpack.c.b16 %v140_v2, %v140_v2  ;;  %v1810_v10 = vld [vmem:[%s2644_s0 + $0x4] sm:$0xf]  ;;  %v1558_v12 = vor.u32 %v1825_v8, %v1555_v9 }
   0x6   :  { %v175_v5 = vsel %vm173_vm0, %v150_v4, 0  ;;  %178 = vmatpush.bf16.msra.mxu0 %v2009_v3  ;;  %329 = vmatpush.bf16.msra.mxu2 %v2009_v3 }
   0x7   :  { %362 = vmatpush.bf16.msra.mxu3 %v175_v5  ;;  %211 = vmatpush.bf16.msra.mxu1 %v175_v5 }
   0x8   :  { %16 = vsyncpa [#allocation5], 0  ;;  %vm160_vm1 = vcmask 179200   ;;  %v1487_v13 = vor.u32 %v1810_v10, %v1484_v11  ;;  %v1820_v14 = vld [vmem:[%s2645_s1 + $0x20] sm:$0xff]  ;;  %v1819_v15 = vld [vmem:[%s2645_s1 + $0x18] sm:$0xff]  ;;  %vm777_vm2 = vcmask 64512  }
   0x9   :  { %v1818_v16 = vld [vmem:[%s2645_s1 + $0x10] sm:$0xff]  ;;  %v1817_v17 = vld [vmem:[%s2645_s1 + $0x8] sm:$0xff]  ;;  %v1492_v21 = vld [vmem:[%s2644_s0 + $0x18] sm:$0xf0]  ;;  %vm784_vm3 = vcmask 58368   ;;  %vm821_vm4 = vcmask 130112  }
   0xa   :  { %179 = vmatpush.bf16.msra.mxu0 %v2018_v7  ;;  %330 = vmatpush.bf16.msra.mxu2 %v2018_v7  ;;  %v1827_v18 = vld [vmem:[%s2644_s0 + $0x4c] sm:$0xf]  ;;  %v1563_v19 = vld [vmem:[%s2644_s0 + $0x50] sm:$0xf0]  ;;  %v1816_v24 = vld [vmem:[%s2645_s1] sm:$0xff]  ;;  %vm831_vm5 = vcmask 123904  }
   0xb   :  { %363 = vmatpush.bf16.msra.mxu3 %v1824_v6  ;;  %212 = vmatpush.bf16.msra.mxu1 %v1824_v6  ;;  %v1812_v20 = vld [vmem:[%s2644_s0 + $0x14] sm:$0xf]  ;;  %v1566_v22 = vor.u32 %v1827_v18, %v1563_v19  ;;  %v1482_v25 = vld [vmem:[%s2644_s0] sm:$0xf]  ;;  %v1811_v26 = vld [vmem:[%s2644_s0 + $0x4] sm:$0xf0] }
   0xc   :  { %v1495_v23 = vor.u32 %v1812_v20, %v1492_v21  ;;  %v1553_v27 = vld [vmem:[%s2644_s0 + $0x38] sm:$0xf]  ;;  %v1826_v28 = vld [vmem:[%s2644_s0 + $0x3c] sm:$0xf0]  ;;  %v1483_v29 = vor.u32 %v1811_v26, %v1482_v25  ;;  %v1829_v31 = vld [vmem:[%s2644_s0 + $0x5c] sm:$0xf] }
   0xd   :  { %v1554_v30 = vor.u32 %v1826_v28, %v1553_v27  ;;  %v1571_v32 = vld [vmem:[%s2644_s0 + $0x60] sm:$0xf0]  ;;  %v1500_v34 = vld [vmem:[%s2644_s0 + $0x28] sm:$0xf0]  ;;  %v1490_v37 = vld [vmem:[%s2644_s0 + $0x10] sm:$0xf] }
   0xe   :  { %1575 = vmatmul.msk.bf16.vlgmr.msra.gmra.mxu3 %vm160_vm1, %v1558_v12  ;;  %1540 = vmatmul.msk.bf16.vlgmr.msra.gmra.mxu1 %vm160_vm1, %v1487_v13  ;;  %v1814_v33 = vld [vmem:[%s2644_s0 + $0x24] sm:$0xf]  ;;  %v1574_v35 = vor.u32 %v1829_v31, %v1571_v32  ;;  %v1813_v38 = vld [vmem:[%s2644_s0 + $0x14] sm:$0xf0]  ;;  %v1561_v39 = vld [vmem:[%s2644_s0 + $0x48] sm:$0xf] }
   0xf   :  { %527 = vmatpush.bf16.msrb.mxu3 %v175_v5  ;;  %493 = vmatpush.bf16.msrb.mxu1 %v1999_v0  ;;  %v1503_v36 = vor.u32 %v1814_v33, %v1500_v34  ;;  %v1828_v40 = vld [vmem:[%s2644_s0 + $0x4c] sm:$0xf0]  ;;  %v1491_v41 = vor.u32 %v1813_v38, %v1490_v37  ;;  %v1550_v43 = vld [vmem:[%s2644_s0 + $0x68] sm:$0x11]  ;;  %v1498_v49 = vld [vmem:[%s2644_s0 + $0x20] sm:$0xf] }
  0x10   :  { %180 = vmatpush.bf16.msra.mxu0 %v1820_v14  ;;  %331 = vmatpush.bf16.msra.mxu2 %v1820_v14  ;;  %v1562_v42 = vor.u32 %v1828_v40, %v1561_v39  ;;  %v46_v44 = vld [vmem:[%s2644_s0 + $0x30] sm:$0x11]  ;;  %v303_v45 = vunpack.c.h.b16 %v1550_v43  ;;  %v1815_v50 = vld [vmem:[%s2644_s0 + $0x24] sm:$0xf0]  ;;  %v1569_v51 = vld [vmem:[%s2644_s0 + $0x58] sm:$0xf]  ;;  %v302_v62 = vunpack.c.l.b16 %v1550_v43 }
  0x11   :  { %v90_v46 = vunpack.c.h.b16 %v46_v44  ;;  %v1830_v52 = vld [vmem:[%s2644_s0 + $0x5c] sm:$0xf0]  ;;  %v1499_v53 = vor.u32 %v1815_v50, %v1498_v49  ;;  %v1831_v55 = vld [vmem:[%s2644_s0 + $0x74] sm:$0xf]  ;;  %v1590_v56 = vld [vmem:[%s2644_s0 + $0x78] sm:$0xf0]  ;;  %v89_v60 = vunpack.c.l.b16 %v46_v44 }
  0x12   :  { %v311_v47 = vpack.c.b16 %v303_v45, %v303_v45  ;;  %v1570_v54 = vor.u32 %v1830_v52, %v1569_v51  ;;  %v1588_v57 = vld [vmem:[%s2644_s0 + $0x70] sm:$0xf]  ;;  %v1832_v58 = vld [vmem:[%s2644_s0 + $0x74] sm:$0xf0]  ;;  %v1593_v59 = vor.u32 %v1831_v55, %v1590_v56  ;;  %v1833_v1 = vld [vmem:[%s2644_s0 + $0x84] sm:$0xf] }
  0x13   :  { %494 = vmatpush.bf16.msrb.mxu1 %v2009_v3  ;;  %528 = vmatpush.bf16.msrb.mxu3 %v1824_v6  ;;  %v98_v48 = vpack.c.b16 %v90_v46, %v90_v46  ;;  %v1589_v61 = vor.u32 %v1832_v58, %v1588_v57  ;;  %v97_v63 = vpack.c.b16 %v89_v60, %v89_v60  ;;  %v1598_v2 = vld [vmem:[%s2644_s0 + $0x88] sm:$0xf0]  ;;  %v1834_v4 = vld [vmem:[%s2644_s0 + $0x84] sm:$0xf0]  ;;  %v1838_v8 = vld [vmem:[%s2644_s0 + $0xac] sm:$0xf0] }
  0x14   :  { %181 = vmatpush.bf16.msra.mxu0 %v1819_v15  ;;  %332 = vmatpush.bf16.msra.mxu2 %v1819_v15  ;;  %v1837_v9 = vld [vmem:[%s2644_s0 + $0xac] sm:$0xf]  ;;  %v1625_v10 = vld [vmem:[%s2644_s0 + $0xb0] sm:$0xf0]  ;;  %v1631_v19 = vld [vmem:[%s2644_s0 + $0xb8] sm:$0xf] }
  0x15   :  { %v1628_v12 = vor.u32 %v1837_v9, %v1625_v10  ;;  %v1835_v13 = vld [vmem:[%s2644_s0 + $0x94] sm:$0xf]  ;;  %v1840_v20 = vld [vmem:[%s2644_s0 + $0xbc] sm:$0xf0]  ;;  %v1839_v21 = vld [vmem:[%s2644_s0 + $0xbc] sm:$0xf] }
  0x16   :  { %v1585_v25 = vld [vmem:[%s2644_s0 + $0xa0] sm:$0x11]  ;;  %v1841_v32 = vld [vmem:[%s2644_s0 + $0xcc] sm:$0xf]  ;;  %v1641_v33 = vld [vmem:[%s2644_s0 + $0xd0] sm:$0xf0] }
  0x17   :  { %495 = vmatpush.bf16.msrb.mxu1 %v2018_v7  ;;  %v468_v26 = vunpack.c.h.b16 %v1585_v25  ;;  %v467_v27 = vunpack.c.l.b16 %v1585_v25  ;;  %v2219_v46 = vld [vmem:[%s2646_s2] ss:$0 sm:$0xff]  ;;  %s1925_s2 = smov 8   ;;  %s1926_s24 = smov 16   ;;  %vm828_vm6 = vcmask 123968   ;;  %vm838_vm7 = vcmask 255104  }
  0x18   :  { %182 = vmatpush.bf16.msra.mxu0 %v1818_v16  ;;  %333 = vmatpush.bf16.msra.mxu2 %v1818_v16  ;;  %s1927_s25 = smov 32   ;;  %s1928_s26 = smov 48   ;;  %vm845_vm8 = vcmask 386304   ;;  %vm852_vm9 = vcmask 517504   ;;  %vm859_vm10 = vcmask 648704   ;;  %vm866_vm11 = vcmask 779904  }
  0x19   :  { %v476_v28 = vpack.c.b16 %v468_v26, %v468_v26  ;;  %v475_v31 = vpack.c.b16 %v467_v27, %v467_v27  ;;  %s1929_s27 = smov 64   ;;  %s1930_s28 = smov 80   ;;  %vm873_vm12 = vcmask 911104   ;;  %vm880_vm13 = vcmask 1042304  }
  0x1a   :  { %s1931_s29 = smov 96   ;;  %s1932_s30 = smov 112   ;;  %vm1191_vm14 = vcmask 130048   ;;  %vm1298_vm15 = vcmask 1045504   ;;  %vm1294_vm0 = vcmask 490496  }
  0x1b   :  { %496 = vmatpush.bf16.msrb.mxu1 %v1820_v14  ;;  %s1933_s15 = smov 68   ;;  %s1471_s14 = sshll.u32 %s2655_s11, 4  ;;  %s1472_s14 = int_to_ptr.hbm [resolvable:$true] %s1471_s14 }
  0x1c   :  { %183 = vmatpush.bf16.msra.mxu0 %v1817_v17  ;;  %334 = vmatpush.bf16.msra.mxu2 %v1817_v17 }
  0x1e   :  { %1576 = vmatmul.msk.bf16.gmra.mxu3 %vm160_vm1, %v1566_v22  ;;  %1541 = vmatmul.msk.bf16.gmra.mxu1 %vm160_vm1, %v1495_v23  ;;  %v1633_v22 = vld [vmem:[%s2644_s0 + $0xc0] sm:$0xf0]  ;;  %v1632_v23 = vor.u32 %v1840_v20, %v1631_v19 }
  0x1f   :  { %497 = vmatpush.bf16.msrb.mxu1 %v1819_v15 }
  0x20   :  { %184 = vmatpush.bf16.msra.mxu0 %v1816_v24  ;;  %335 = vmatpush.bf16.msra.mxu2 %v1816_v24 }
  0x23   :  { %498 = vmatpush.bf16.msrb.mxu1 %v1818_v16  ;;  %185 = vmatmul.bf16.vlgmr.msra.gmra.mxu0 %v1483_v29  ;;  %v1639_v29 = vld [vmem:[%s2644_s0 + $0xc8] sm:$0xf] }
  0x24   :  { %658 = vmatpush.bf16.msrb.mxu0 %v1999_v0  ;;  %692 = vmatpush.bf16.msrb.mxu2 %v175_v5  ;;  %v310_v0 = vpack.c.b16 %v302_v62, %v302_v62  ;;  %v1601_v5 = vor.u32 %v1833_v1, %v1598_v2 }
  0x25   :  { %336 = vmatmul.bf16.vlgmr.msra.gmra.mxu2 %v1554_v30  ;;  %v1842_v30 = vld [vmem:[%s2644_s0 + $0xcc] sm:$0xf0] }
  0x26   :  { %v1640_v34 = vor.u32 %v1842_v30, %v1639_v29 }
  0x27   :  { %499 = vmatpush.bf16.msrb.mxu1 %v1817_v17 }
  0x28   :  { %659 = vmatpush.bf16.msrb.mxu0 %v2009_v3  ;;  %693 = vmatpush.bf16.msrb.mxu2 %v1824_v6  ;;  %v1596_v3 = vld [vmem:[%s2644_s0 + $0x80] sm:$0xf] }
  0x29   :  { %v1597_v6 = vor.u32 %v1834_v4, %v1596_v3 }
  0x2b   :  { %500 = vmatpush.bf16.msrb.mxu1 %v1816_v24 }
  0x2c   :  { %660 = vmatpush.bf16.msrb.mxu0 %v2018_v7  ;;  %v1623_v7 = vld [vmem:[%s2644_s0 + $0xa8] sm:$0xf] }
  0x2d   :  { %v1624_v11 = vor.u32 %v1838_v8, %v1623_v7 }
  0x2e   :  { %1577 = vmatmul.msk.bf16.gmra.mxu3 %vm160_vm1, %v1574_v35  ;;  %1542 = vmatmul.msk.bf16.gmra.mxu1 %vm160_vm1, %v1503_v36  ;;  %v1644_v35 = vor.u32 %v1841_v32, %v1641_v33  ;;  %v1620_v36 = vld [vmem:[%s2644_s0 + $0xd8] sm:$0x11] }
  0x2f   :  { %v632_v37 = vunpack.c.l.b16 %v1620_v36  ;;  %v633_v38 = vunpack.c.h.b16 %v1620_v36 }
  0x30   :  { %661 = vmatpush.bf16.msrb.mxu0 %v1820_v14  ;;  %v1606_v14 = vld [vmem:[%s2644_s0 + $0x98] sm:$0xf0] }
  0x31   :  { %v640_v40 = vpack.c.b16 %v632_v37, %v632_v37 }
  0x33   :  { %190 = vmatmul.bf16.gmra.mxu0 %v1491_v41  ;;  %v641_v41 = vpack.c.b16 %v633_v38, %v633_v38 }
  0x34   :  { %662 = vmatpush.bf16.msrb.mxu0 %v1819_v15  ;;  %v1604_v15 = vld [vmem:[%s2644_s0 + $0x90] sm:$0xf] }
  0x35   :  { %341 = vmatmul.bf16.gmra.mxu2 %v1562_v42 }
  0x38   :  { %663 = vmatpush.bf16.msrb.mxu0 %v1818_v16  ;;  %v1836_v16 = vld [vmem:[%s2644_s0 + $0x94] sm:$0xf0]  ;;  %s1924_s0 = smov 120  }
  0x39   :  { %v1605_v18 = vor.u32 %v1836_v16, %v1604_v15 }
  0x3c   :  { %664 = vmatpush.bf16.msrb.mxu0 %v1817_v17  ;;  %v1609_v17 = vor.u32 %v1835_v13, %v1606_v14 }
  0x3e   :  { %1578 = vmatmul.msk.bf16.gmra.mxu3 %vm160_vm1, %v311_v47  ;;  %1543 = vmatmul.msk.bf16.gmra.mxu1 %vm160_vm1, %v98_v48 }
  0x40   :  { %665 = vmatpush.bf16.msrb.mxu0 %v1816_v24  ;;  %v1636_v24 = vor.u32 %v1839_v21, %v1633_v22 }
  0x43   :  { %195 = vmatmul.bf16.gmra.mxu0 %v1499_v53 }
  0x45   :  { %346 = vmatmul.bf16.gmra.mxu2 %v1570_v54 }
  0x4e   :  { %1610 = vmatmul.msk.bf16.vlgmr.msrb.gmra.mxu3 %vm160_vm1, %v1593_v59  ;;  %501 = vmatmul.bf16.vlgmr.msrb.gmra.mxu1 %v1589_v61 }
  0x53   :  { %200 = vmatmul.bf16.gmra.mxu0 %v97_v63 }
  0x55   :  { %351 = vmatmul.bf16.gmra.mxu2 %v310_v0 }
  0x5e   :  { %1611 = vmatmul.msk.bf16.gmra.mxu3 %vm160_vm1, %v1601_v5  ;;  %506 = vmatmul.bf16.gmra.mxu1 %v1597_v6 }
  0x63   :  { %666 = vmatmul.bf16.vlgmr.msrb.gmra.mxu0 %v1624_v11 }
  0x65   :  { %1645 = vmatmul.msk.bf16.vlgmr.msrb.gmra.mxu2 %vm160_vm1, %v1628_v12 }
  0x6e   :  { %1612 = vmatmul.msk.bf16.gmra.mxu3 %vm160_vm1, %v1609_v17  ;;  %511 = vmatmul.bf16.gmra.mxu1 %v1605_v18 }
  0x73   :  { %671 = vmatmul.bf16.gmra.mxu0 %v1632_v23 }
  0x75   :  { %1646 = vmatmul.msk.bf16.gmra.mxu2 %vm160_vm1, %v1636_v24 }
  0x7e   :  { %1613 = vmatmul.msk.bf16.gmra.mxu3 %vm160_vm1, %v476_v28  ;;  %516 = vmatmul.bf16.gmra.mxu1 %v475_v31 }
  0x83   :  { %676 = vmatmul.bf16.gmra.mxu0 %v1640_v34 }
  0x85   :  { %1647 = vmatmul.msk.bf16.gmra.mxu2 %vm160_vm1, %v1644_v35 }
  0x8b   :  { %v214_v39 = vpop.f32.mrf.mxu1 }
  0x91   :  { %v365_v42 = vpop.f32.mrf.mxu3 }
  0x93   :  { %681 = vmatmul.bf16.gmra.mxu0 %v640_v40  ;;  %v216_v43 = vpop.f32.mrf.mxu1 }
  0x95   :  { %1648 = vmatmul.msk.bf16.gmra.mxu2 %vm160_vm1, %v641_v41  ;;  %vm1403_vm1 = vcmask 1044480  }
  0x99   :  { %v367_v44 = vpop.f32.mrf.mxu3 }
  0x9b   :  { %v219_v45 = vpop.f32.mrf.mxu1 }
  0xa0   :  { %v186_v47 = vpop.f32.mrf.mxu0 }
  0xa1   :  { %v187_v48 = vadd.f32 %v2219_v46, %v186_v47  ;;  %v370_v49 = vpop.f32.mrf.mxu3 }
  0xa3   :  { %v2222_v50 = vadd.f32 %v214_v39, %v187_v48  ;;  %v221_v51 = vpop.f32.mrf.mxu1 }
  0xa5   :  { %240 = vrot.lane.b32.xlu0 %v2222_v50, %s1924_s0 }
  0xa8   :  { %v337_v52 = vpop.f32.mrf.mxu2  ;;  %v188_v54 = vpop.f32.mrf.mxu0 }
  0xa9   :  { %v338_v53 = vadd.f32 %v2219_v46, %v337_v52  ;;  %v189_v55 = vadd.f32 %v2219_v46, %v188_v54  ;;  %v372_v57 = vpop.f32.mrf.mxu3 }
  0xab   :  { %v2228_v56 = vadd.f32 %v365_v42, %v338_v53  ;;  %v2230_v58 = vadd.f32 %v216_v43, %v189_v55  ;;  %v224_v59 = vpop.f32.mrf.mxu1 }
  0xad   :  { %391 = vrot.lane.b32.xlu1 %v2228_v56, %s1924_s0  ;;  %242 = vrot.lane.b32.xlu0 %v2230_v58, %s1924_s0 }
  0xb0   :  { %v339_v60 = vpop.f32.mrf.mxu2  ;;  %v191_v62 = vpop.f32.mrf.mxu0 }
  0xb1   :  { %v340_v61 = vadd.f32 %v2219_v46, %v339_v60  ;;  %v375_v63 = vpop.f32.mrf.mxu3  ;;  %v192_v2 = vadd.f32 %v2219_v46, %v191_v62 }
  0xb3   :  { %v2237_v0 = vadd.f32 %v367_v44, %v340_v61  ;;  %v226_v1 = vpop.f32.mrf.mxu1  ;;  %v2246_v9 = vadd.f32 %v219_v45, %v192_v2 }
  0xb5   :  { %393 = vrot.lane.b32.xlu0 %v2237_v0, %s1924_s0 }
  0xb8   :  { %v342_v3 = vpop.f32.mrf.mxu2  ;;  %v193_v5 = vpop.f32.mrf.mxu0 }
  0xb9   :  { %v343_v4 = vadd.f32 %v2219_v46, %v342_v3  ;;  %v194_v6 = vadd.f32 %v2219_v46, %v193_v5  ;;  %v377_v8 = vpop.f32.mrf.mxu3 }
  0xbb   :  { %v2244_v7 = vadd.f32 %v370_v49, %v343_v4  ;;  %v2248_v10 = vadd.f32 %v221_v51, %v194_v6  ;;  %v2252_v11 = vpop.f32.mrf.mxu1 }
  0xbd   :  { %395 = vrot.lane.b32.xlu2 %v2244_v7, %s1924_s0  ;;  %246 = vrot.lane.b32.xlu1 %v2248_v10, %s1924_s0 }
  0xbe   :  { %244 = vrot.lane.b32.xlu0 %v2246_v9, %s1924_s0 }
  0xc0   :  { %v344_v12 = vpop.f32.mrf.mxu2  ;;  %v196_v14 = vpop.f32.mrf.mxu0 }
  0xc1   :  { %v345_v13 = vadd.f32 %v2219_v46, %v344_v12  ;;  %v2259_v15 = vpop.f32.mrf.mxu3  ;;  %v197_v18 = vadd.f32 %v2219_v46, %v196_v14 }
  0xc3   :  { %v2261_v16 = vadd.f32 %v372_v57, %v345_v13  ;;  %v231_v17 = vpop.f32.mrf.mxu1  ;;  %v2269_v24 = vadd.f32 %v224_v59, %v197_v18 }
  0xc5   :  { %397 = vrot.lane.b32.xlu1 %v2261_v16, %s1924_s0 }
  0xc8   :  { %v347_v19 = vpop.f32.mrf.mxu2  ;;  %v198_v21 = vpop.f32.mrf.mxu0 }
  0xc9   :  { %v348_v20 = vadd.f32 %v2219_v46, %v347_v19  ;;  %v382_v23 = vpop.f32.mrf.mxu3  ;;  %v199_v26 = vadd.f32 %v2219_v46, %v198_v21 }
  0xcb   :  { %v2267_v22 = vadd.f32 %v375_v63, %v348_v20  ;;  %v502_v25 = vpop.f32.mrf.mxu1  ;;  %v2277_v30 = vadd.f32 %v226_v1, %v199_v26 }
  0xcc   :  { %v503_v27 = vadd.f32 %v2219_v46, %v502_v25 }
  0xcd   :  { %399 = vrot.lane.b32.xlu2 %v2267_v22, %s1924_s0  ;;  %248 = vrot.lane.b32.xlu1 %v2269_v24, %s1924_s0 }
  0xd0   :  { %v349_v28 = vpop.f32.mrf.mxu2  ;;  %v201_v29 = vpop.f32.mrf.mxu0 }
  0xd1   :  { %v530_v31 = vpop.f32.mrf.mxu3  ;;  %v350_v34 = vadd.f32 %v2219_v46, %v349_v28  ;;  %v202_v4 = vadd.f32 %v2219_v46, %v201_v29 }
  0xd2   :  { %v2279_v32 = vadd.f32 %v530_v31, %v503_v27 }
  0xd3   :  { %v504_v33 = vpop.f32.mrf.mxu1  ;;  %v2287_v38 = vadd.f32 %v377_v8, %v350_v34  ;;  %v2323_v12 = vadd.f32 %v2252_v11, %v202_v4 }
  0xd4   :  { %556 = vrot.lane.b32.xlu0 %v2279_v32, %s1924_s0  ;;  %v505_v37 = vadd.f32 %v2219_v46, %v504_v33 }
  0xd5   :  { %250 = vrot.lane.b32.xlu2 %v2277_v30, %s1924_s0 }
  0xd8   :  { %v352_v35 = vpop.f32.mrf.mxu2  ;;  %v203_v36 = vpop.f32.mrf.mxu0 }
  0xd9   :  { %v532_v39 = vpop.f32.mrf.mxu3  ;;  %v353_v27 = vadd.f32 %v2219_v46, %v352_v35 }
  0xda   :  { %v2289_v40 = vadd.f32 %v532_v39, %v505_v37 }
  0xdb   :  { %v507_v41 = vpop.f32.mrf.mxu1  ;;  %v2344_v33 = vadd.f32 %v2259_v15, %v353_v27 }
  0xdc   :  { %558 = vrot.lane.b32.xlu0 %v2289_v40, %s1924_s0  ;;  %v508_v42 = vadd.f32 %v2219_v46, %v507_v41 }
  0xdd   :  { %401 = vrot.lane.b32.xlu2 %v2287_v38, %s1924_s0 }
  0xe0   :  { %v354_v43 = vpop.f32.mrf.mxu2  ;;  %v667_v44 = vpop.f32.mrf.mxu0 }
  0xe1   :  { %v535_v45 = vpop.f32.mrf.mxu3  ;;  %v668_v48 = vadd.f32 %v2219_v46, %v667_v44 }
  0xe2   :  { %v2296_v47 = vadd.f32 %v535_v45, %v508_v42 }
  0xe3   :  { %v509_v49 = vpop.f32.mrf.mxu1 }
  0xe4   :  { %560 = vrot.lane.b32.xlu1 %v2296_v47, %s1924_s0  ;;  %v510_v54 = vadd.f32 %v2219_v46, %v509_v49 }
  0xe8   :  { %v695_v51 = vpop.f32.mrf.mxu2  ;;  %v669_v53 = vpop.f32.mrf.mxu0 }
  0xe9   :  { %v2301_v52 = vadd.f32 %v695_v51, %v668_v48  ;;  %v537_v55 = vpop.f32.mrf.mxu3  ;;  %v670_v60 = vadd.f32 %v2219_v46, %v669_v53 }
  0xea   :  { %v2306_v57 = vadd.f32 %v537_v55, %v510_v54 }
  0xeb   :  { %721 = vrot.lane.b32.xlu0 %v2301_v52, %s1924_s0  ;;  %v512_v59 = vpop.f32.mrf.mxu1 }
  0xec   :  { %562 = vrot.lane.b32.xlu1 %v2306_v57, %s1924_s0  ;;  %v513_v61 = vadd.f32 %v2219_v46, %v512_v59 }
  0xf0   :  { %v697_v62 = vpop.f32.mrf.mxu2  ;;  %v672_v1 = vpop.f32.mrf.mxu0 }
  0xf1   :  { %v2312_v63 = vadd.f32 %v697_v62, %v670_v60  ;;  %v540_v2 = vpop.f32.mrf.mxu3  ;;  %v673_v5 = vadd.f32 %v2219_v46, %v672_v1 }
  0xf2   :  { %v2316_v3 = vadd.f32 %v540_v2, %v513_v61 }
  0xf3   :  { %723 = vrot.lane.b32.xlu0 %v2312_v63, %s1924_s0  ;;  %v514_v6 = vpop.f32.mrf.mxu1 }
  0xf4   :  { %564 = vrot.lane.b32.xlu2 %v2316_v3, %s1924_s0  ;;  %v515_v17 = vadd.f32 %v2219_v46, %v514_v6 }
  0xf8   :  { %v700_v8 = vpop.f32.mrf.mxu2  ;;  %v674_v14 = vpop.f32.mrf.mxu0 }
  0xf9   :  { %v2325_v13 = vadd.f32 %v700_v8, %v673_v5  ;;  %v542_v18 = vpop.f32.mrf.mxu3  ;;  %v675_v11 = vadd.f32 %v2219_v46, %v674_v14 }
  0xfa   :  { %v2332_v19 = vadd.f32 %v542_v18, %v515_v17 }
  0xfb   :  { %725 = vrot.lane.b32.xlu1 %v2325_v13, %s1924_s0  ;;  %252 = vrot.lane.b32.xlu0 %v2323_v12, %s1924_s0  ;;  %v517_v20 = vpop.f32.mrf.mxu1 }
  0xfc   :  { %566 = vrot.lane.b32.xlu2 %v2332_v19, %s1924_s0  ;;  %v518_v15 = vadd.f32 %v2219_v46, %v517_v20 }
 0x100   :  { %v702_v21 = vpop.f32.mrf.mxu2  ;;  %v677_v25 = vpop.f32.mrf.mxu0 }
 0x101   :  { %v2337_v23 = vadd.f32 %v702_v21, %v675_v11  ;;  %v545_v26 = vpop.f32.mrf.mxu3  ;;  %v678_v28 = vadd.f32 %v2219_v46, %v677_v25 }
 0x102   :  { %v2359_v44 = vadd.f32 %v545_v26, %v518_v15 }
 0x103   :  { %727 = vrot.lane.b32.xlu1 %v2337_v23, %s1924_s0  ;;  %v519_v29 = vpop.f32.mrf.mxu1 }
 0x108   :  { %v705_v31 = vpop.f32.mrf.mxu2  ;;  %v679_v36 = vpop.f32.mrf.mxu0 }
 0x109   :  { %v2346_v34 = vadd.f32 %v705_v31, %v678_v28  ;;  %v547_v37 = vpop.f32.mrf.mxu3  ;;  %v680_v39 = vadd.f32 %v2219_v46, %v679_v36 }
 0x10b   :  { %729 = vrot.lane.b32.xlu2 %v2346_v34, %s1924_s0  ;;  %403 = vrot.lane.b32.xlu1 %v2344_v33, %s1924_s0 }
 0x110   :  { %v707_v35 = vpop.f32.mrf.mxu2  ;;  %v682_v42 = vpop.f32.mrf.mxu0 }
 0x111   :  { %v2353_v41 = vadd.f32 %v707_v35, %v680_v39  ;;  %v683_v43 = vadd.f32 %v2219_v46, %v682_v42 }
 0x113   :  { %731 = vrot.lane.b32.xlu2 %v2353_v41, %s1924_s0 }
 0x117   :  { %v241_v53 = vpop.permute.xlu0 %240  ;;  %v2367_v54 = vpop.permute.xlu2 %395 }
 0x118   :  { %v710_v45 = vpop.f32.mrf.mxu2  ;;  %v684_v49 = vpop.f32.mrf.mxu0  ;;  %v261_v20 = vmax.f32 %v2222_v50, %v241_v53  ;;  %v268_v11 = vmin.f32 %v2222_v50, %v241_v53 }
 0x119   :  { %v2361_v48 = vadd.f32 %v710_v45, %v683_v43 }
 0x11b   :  { %733 = vrot.lane.b32.xlu0 %v2361_v48, %s1924_s0  ;;  %568 = vrot.lane.b32.xlu2 %v2359_v44, %s1924_s0 }
 0x11f   :  { %v243_v55 = vpop.permute.xlu0 %242  ;;  %v392_v59 = vpop.permute.xlu1 %391 }
 0x120   :  { %v712_v51 = vpop.f32.mrf.mxu2  ;;  %v412_v17 = vmax.f32 %v2228_v56, %v392_v59  ;;  %v419_v18 = vmin.f32 %v2228_v56, %v392_v59  ;;  %v262_v29 = vmax.f32 %v2230_v58, %v243_v55  ;;  %v269_v31 = vmin.f32 %v2230_v58, %v243_v55 }
 0x122   :  { %v426_v27 = vadd.f32 %v412_v17, %v261_v20  ;;  %v433_v28 = vadd.f32 %v419_v18, %v268_v11 }
 0x127   :  { %v400_v60 = vpop.permute.xlu2 %399  ;;  %v394_v46 = vpop.permute.xlu0 %393 }
 0x128   :  { %v416_v36 = vmax.f32 %v2267_v22, %v400_v60  ;;  %v420_v15 = vmin.f32 %v2237_v0, %v394_v46  ;;  %v423_v58 = vmin.f32 %v2267_v22, %v400_v60  ;;  %v421_v60 = vmin.f32 %v2244_v7, %v2367_v54 }
 0x12f   :  { %v2369_v61 = vpop.permute.xlu1 %246  ;;  %v2371_v62 = vpop.permute.xlu2 %250 }
 0x130   :  { %v2373_v1 = vpop.permute.xlu0 %244  ;;  %v266_v18 = vmax.f32 %v2277_v30, %v2371_v62 }
 0x137   :  { %v2375_v2 = vpop.permute.xlu1 %397  ;;  %v2377_v4 = vpop.permute.xlu2 %401 }
 0x13f   :  { %v249_v6 = vpop.permute.xlu1 %248 }
 0x140   :  { %v265_v43 = vmax.f32 %v2269_v24, %v249_v6  ;;  %v272_v45 = vmin.f32 %v2269_v24, %v249_v6  ;;  %v434_v24 = vadd.f32 %v420_v15, %v269_v31  ;;  %v424_v31 = vmin.f32 %v2287_v38, %v2377_v4 }
 0x142   :  { %v430_v6 = vadd.f32 %v416_v36, %v265_v43  ;;  %v437_v22 = vadd.f32 %v423_v58, %v272_v45 }
 0x146   :  { %v557_v5 = vpop.permute.xlu0 %556 }
 0x147   :  { %v577_v21 = vmax.f32 %v2279_v32, %v557_v5  ;;  %v584_v25 = vmin.f32 %v2279_v32, %v557_v5  ;;  %v413_v32 = vmax.f32 %v2237_v0, %v394_v46  ;;  %v414_v0 = vmax.f32 %v2244_v7, %v2367_v54 }
 0x149   :  { %v591_v39 = vadd.f32 %v577_v21, %v426_v27  ;;  %v598_v35 = vadd.f32 %v584_v25, %v433_v28  ;;  %v427_v17 = vadd.f32 %v413_v32, %v262_v29  ;;  %v270_v28 = vmin.f32 %v2246_v9, %v2373_v1 }
 0x14a   :  { %v417_v29 = vmax.f32 %v2287_v38, %v2377_v4 }
 0x14b   :  { %v435_v15 = vadd.f32 %v421_v60, %v270_v28 }
 0x14c   :  { %v431_v43 = vadd.f32 %v417_v29, %v266_v18 }
 0x14e   :  { %v565_v8 = vpop.permute.xlu2 %564  ;;  %v559_v14 = vpop.permute.xlu0 %558 }
 0x14f   :  { %v581_v53 = vmax.f32 %v2316_v3, %v565_v8  ;;  %v588_v55 = vmin.f32 %v2316_v3, %v565_v8  ;;  %v578_v59 = vmax.f32 %v2289_v40, %v559_v14  ;;  %v273_v3 = vmin.f32 %v2277_v30, %v2371_v62 }
 0x150   :  { %v263_v62 = vmax.f32 %v2246_v9, %v2373_v1 }
 0x151   :  { %v592_v20 = vadd.f32 %v578_v59, %v427_v17  ;;  %v438_v45 = vadd.f32 %v424_v31, %v273_v3 }
 0x152   :  { %v428_v4 = vadd.f32 %v414_v0, %v263_v62  ;;  %v422_v0 = vmin.f32 %v2261_v16, %v2375_v2 }
 0x156   :  { %v2385_v26 = vpop.permute.xlu1 %560  ;;  %v2390_v37 = vpop.permute.xlu2 %566 }
 0x157   :  { %v586_v9 = vmin.f32 %v2296_v47, %v2385_v26 }
 0x15d   :  { %v722_v56 = vpop.permute.xlu0 %721 }
 0x15e   :  { %v742_v50 = vmax.f32 %v2301_v52, %v722_v56  ;;  %v749_v42 = vmin.f32 %v2301_v52, %v722_v56  ;;  %v585_v52 = vmin.f32 %v2289_v40, %v559_v14  ;;  %v2411_v8 = vpop.permute.xlu1 %562  ;;  %v595_v40 = vadd.f32 %v581_v53, %v430_v6 }
 0x15f   :  { %v602_v14 = vadd.f32 %v588_v55, %v437_v22  ;;  %v264_v6 = vmax.f32 %v2248_v10, %v2369_v61  ;;  %v580_v22 = vmax.f32 %v2306_v57, %v2411_v8 }
 0x160   :  { %v756_v49 = vadd.f32 %v742_v50, %v591_v39  ;;  %v763_v51 = vadd.f32 %v749_v42, %v598_v35  ;;  %v599_v11 = vadd.f32 %v585_v52, %v434_v24  ;;  %v582_v35 = vmax.f32 %v2332_v19, %v2390_v37 }
 0x161   :  { %v579_v50 = vmax.f32 %v2296_v47, %v2385_v26  ;;  %v415_v52 = vmax.f32 %v2261_v16, %v2375_v2 }
 0x162   :  { %v770_v46 = vmul.f32 0.25, %v756_v49  ;;  %v786_v5 = vmul.f32 0.25, %v763_v51  ;;  %v600_v49 = vadd.f32 %v586_v9, %v435_v15 }
 0x163   :  { %v593_v58 = vadd.f32 %v579_v50, %v428_v4  ;;  %v429_v2 = vadd.f32 %v415_v52, %v264_v6 }
 0x164   :  { %800 = vrot.lane.b32.xlu1 %v786_v5, %s1925_s2  ;;  %778 = vst.msk [vmem:[#allocation2] sm:$0xff] %vm777_vm2, %v770_v46 }
 0x165   :  { %v730_v21 = vpop.permute.xlu2 %729  ;;  %v724_v25 = vpop.permute.xlu0 %723 }
 0x166   :  { %v746_v7 = vmax.f32 %v2346_v34, %v730_v21  ;;  %v753_v54 = vmin.f32 %v2346_v34, %v730_v21  ;;  %v743_v27 = vmax.f32 %v2312_v63, %v724_v25  ;;  %v750_v30 = vmin.f32 %v2312_v63, %v724_v25 }
 0x167   :  { %v589_v63 = vmin.f32 %v2332_v19, %v2390_v37  ;;  %v596_v19 = vadd.f32 %v582_v35, %v431_v43 }
 0x168   :  { %v760_v36 = vadd.f32 %v746_v7, %v595_v40  ;;  %v767_v56 = vadd.f32 %v753_v54, %v602_v14  ;;  %v757_v39 = vadd.f32 %v743_v27, %v592_v20  ;;  %v764_v34 = vadd.f32 %v750_v30, %v599_v11 }
 0x169   :  { %v603_v37 = vadd.f32 %v589_v63, %v438_v45 }
 0x16a   :  { %v774_v1 = vmul.f32 0.25, %v760_v36  ;;  %v771_v42 = vmul.f32 0.25, %v757_v39  ;;  %v790_v32 = vmul.f32 0.25, %v767_v56  ;;  %v787_v38 = vmul.f32 0.25, %v764_v34 }
 0x16c   :  { %808 = vrot.lane.b32.xlu0 %v790_v32, %s1925_s2  ;;  %802 = vrot.lane.b32.xlu1 %v787_v38, %s1925_s2  ;;  %779 = vst.msk [vmem:[#allocation2 + $0x8] sm:$0xff] %vm777_vm2, %v771_v42 }
 0x16d   :  { %v732_v51 = vpop.permute.xlu2 %731  ;;  %v726_v47 = vpop.permute.xlu1 %725  ;;  %782 = vst.msk [vmem:[#allocation2 + $0x20] sm:$0xff] %vm777_vm2, %v774_v1 }
 0x16e   :  { %v747_v26 = vmax.f32 %v2353_v41, %v732_v51  ;;  %v754_v53 = vmin.f32 %v2353_v41, %v732_v51  ;;  %v744_v55 = vmax.f32 %v2325_v13, %v726_v47  ;;  %v751_v59 = vmin.f32 %v2325_v13, %v726_v47  ;;  %v253_v54 = vpop.permute.xlu0 %252 }
 0x16f   :  { %v271_v41 = vmin.f32 %v2248_v10, %v2369_v61  ;;  %v587_v13 = vmin.f32 %v2306_v57, %v2411_v8  ;;  %v594_v10 = vadd.f32 %v580_v22, %v429_v2  ;;  %v267_v62 = vmax.f32 %v2323_v12, %v253_v54  ;;  %v1850_v2 = vld [vmem:[%s2647_s3 + $0x38] sm:$0xff] }
 0x170   :  { %v761_v46 = vadd.f32 %v747_v26, %v596_v19  ;;  %v768_v5 = vadd.f32 %v754_v53, %v603_v37  ;;  %v758_v17 = vadd.f32 %v744_v55, %v593_v58  ;;  %v765_v24 = vadd.f32 %v751_v59, %v600_v49  ;;  %1195 = vmatpush.bf16.msra.mxu1 %v1850_v2 }
 0x171   :  { %v436_v40 = vadd.f32 %v422_v0, %v271_v41  ;;  %v274_v28 = vmin.f32 %v2323_v12, %v253_v54  ;;  %v1865_v54 = vld [vmem:[%s2647_s3 + $0xb0] sm:$0xff] }
 0x172   :  { %v775_v60 = vmul.f32 0.25, %v761_v46  ;;  %v772_v18 = vmul.f32 0.25, %v758_v17  ;;  %v791_v3 = vmul.f32 0.25, %v768_v5  ;;  %v788_v16 = vmul.f32 0.25, %v765_v24 }
 0x173   :  { %v601_v61 = vadd.f32 %v587_v13, %v436_v40 }
 0x174   :  { %810 = vrot.lane.b32.xlu0 %v791_v3, %s1925_s2  ;;  %804 = vrot.lane.b32.xlu2 %v788_v16, %s1925_s2  ;;  %780 = vst.msk [vmem:[#allocation2 + $0x10] sm:$0xff] %vm777_vm2, %v772_v18 }
 0x175   :  { %v728_v14 = vpop.permute.xlu1 %727  ;;  %783 = vst.msk [vmem:[#allocation2 + $0x28] sm:$0xff] %vm777_vm2, %v775_v60  ;;  %v569_v29 = vpop.permute.xlu2 %568 }
 0x176   :  { %v745_v20 = vmax.f32 %v2337_v23, %v728_v14  ;;  %v752_v57 = vmin.f32 %v2337_v23, %v728_v14  ;;  %v583_v36 = vmax.f32 %v2359_v44, %v569_v29  ;;  %v590_v56 = vmin.f32 %v2359_v44, %v569_v29  ;;  %v1858_v14 = vld [vmem:[%s2647_s3 + $0x78] sm:$0xff]  ;;  %v1855_v29 = vld [vmem:[%s2647_s3 + $0x60] sm:$0xff] }
 0x177   :  { %1208 = vmatpush.bf16.msra.mxu3 %v1858_v14 }
 0x178   :  { %v759_v8 = vadd.f32 %v745_v20, %v594_v10  ;;  %v766_v11 = vadd.f32 %v752_v57, %v601_v61  ;;  %v1849_v10 = vld [vmem:[%s2647_s3 + $0x30] sm:$0xff] }
 0x179   :  { %1196 = vmatpush.bf16.msra.mxu1 %v1849_v10  ;;  %v1857_v57 = vld [vmem:[%s2647_s3 + $0x70] sm:$0xff]  ;;  %v1873_v10 = vld [vmem:[%s2650_s6 + $0x8] sm:$0xff] }
 0x17a   :  { %v773_v21 = vmul.f32 0.25, %v759_v8  ;;  %v789_v25 = vmul.f32 0.25, %v766_v11  ;;  %v1866_v8 = vld [vmem:[%s2647_s3 + $0xb8] sm:$0xff]  ;;  %v1848_v11 = vld [vmem:[%s2647_s3 + $0x28] sm:$0xff] }
 0x17b   :  { %1209 = vmatpush.bf16.msra.mxu3 %v1857_v57  ;;  %1221 = vmatpush.bf16.msra.mxu0 %v1866_v8 }
 0x17c   :  { %806 = vrot.lane.b32.xlu2 %v789_v25, %s1925_s2  ;;  %781 = vst.msk [vmem:[#allocation2 + $0x18] sm:$0xff] %vm777_vm2, %v773_v21  ;;  %vm1399_vm2 = vcmask 343040  }
 0x17d   :  { %v404_v7 = vpop.permute.xlu1 %403  ;;  %1197 = vmatpush.bf16.msra.mxu1 %v1848_v11 }
 0x17e   :  { %v418_v27 = vmax.f32 %v2344_v33, %v404_v7  ;;  %v425_v30 = vmin.f32 %v2344_v33, %v404_v7  ;;  %v1856_v7 = vld [vmem:[%s2647_s3 + $0x68] sm:$0xff] }
 0x17f   :  { %1210 = vmatpush.bf16.msra.mxu3 %v1856_v7  ;;  %1222 = vmatpush.bf16.msra.mxu0 %v1865_v54 }
 0x180   :  { %v432_v23 = vadd.f32 %v418_v27, %v267_v62  ;;  %v439_v31 = vadd.f32 %v425_v30, %v274_v28  ;;  %v1847_v27 = vld [vmem:[%s2647_s3 + $0x20] sm:$0xff] }
 0x181   :  { %1198 = vmatpush.bf16.msra.mxu1 %v1847_v27 }
 0x182   :  { %v597_v34 = vadd.f32 %v583_v36, %v432_v23  ;;  %v604_v35 = vadd.f32 %v590_v56, %v439_v31  ;;  %v1864_v23 = vld [vmem:[%s2647_s3 + $0xa8] sm:$0xff]  ;;  %v1846_v31 = vld [vmem:[%s2647_s3 + $0x18] sm:$0xff] }
 0x183   :  { %1211 = vmatpush.bf16.msra.mxu3 %v1855_v29  ;;  %1223 = vmatpush.bf16.msra.mxu0 %v1864_v23 }
 0x185   :  { %1199 = vmatpush.bf16.msra.mxu1 %v1846_v31 }
 0x18d   :  { %v734_v39 = vpop.permute.xlu0 %733 }
 0x18e   :  { %v748_v63 = vmax.f32 %v2361_v48, %v734_v39  ;;  %v755_v50 = vmin.f32 %v2361_v48, %v734_v39 }
 0x190   :  { %v762_v9 = vadd.f32 %v748_v63, %v597_v34  ;;  %v769_v33 = vadd.f32 %v755_v50, %v604_v35  ;;  %v1854_v34 = vld [vmem:[%s2647_s3 + $0x58] sm:$0xff]  ;;  %v1863_v35 = vld [vmem:[%s2647_s3 + $0xa0] sm:$0xff]  ;;  %v1845_v63 = vld [vmem:[%s2647_s3 + $0x10] sm:$0xff] }
 0x191   :  { %1212 = vmatpush.bf16.msra.mxu3 %v1854_v34  ;;  %1224 = vmatpush.bf16.msra.mxu0 %v1863_v35  ;;  %v1878_v34 = vld [vmem:[%s2652_s8 + $0x10] sm:$0x10] }
 0x192   :  { %v776_v1 = vmul.f32 0.25, %v762_v9  ;;  %v792_v42 = vmul.f32 0.25, %v769_v33  ;;  %1200 = vmatpush.bf16.msra.mxu1 %v1845_v63  ;;  %v1794_v63 = vld [vmem:[%s2653_s9 + $0x10] sm:$0xf] }
 0x194   :  { %812 = vrot.lane.b32.xlu1 %v792_v42, %s1925_s2  ;;  %785 = vst.msk [vmem:[#allocation2 + $0x30] sm:$0x3] %vm784_vm3, %v776_v1  ;;  %v1862_v1 = vld [vmem:[%s2647_s3 + $0x98] sm:$0xff]  ;;  %vm1462_vm3 = vcmask 74752  }
 0x195   :  { %1225 = vmatpush.bf16.msra.mxu0 %v1862_v1 }
 0x1ce   :  { %v805_v12 = vpop.permute.xlu2 %804 }
 0x1cf   :  { %824 = vst.msk [vmem:[#allocation2 + $0x10] sm:$0xff] %vm821_vm4, %v805_v12 }
 0x1d6   :  { %v807_v44 = vpop.permute.xlu2 %806  ;;  %v801_v32 = vpop.permute.xlu1 %800  ;;  %v884_v38 = vld [vmem:[#allocation2 + $0x12] sm:$0x3]  ;;  %v882_v48 = vld [vmem:[#allocation2 + $0x10] sm:$0x3]  ;;  %v890_v43 = vld [vmem:[#allocation2 + $0x14] sm:$0x3] }
 0x1d7   :  { %825 = vst.msk [vmem:[#allocation2 + $0x18] sm:$0xff] %vm821_vm4, %v807_v44  ;;  %886 = vrot.lane.b32.xlu0 %v884_v38, %s1926_s24  ;;  %v896_v58 = vld [vmem:[#allocation2 + $0x16] sm:$0x3]  ;;  %v1853_v44 = vld [vmem:[%s2647_s3 + $0x50] sm:$0xff]  ;;  %v1844_v38 = vld [vmem:[%s2647_s3 + $0x8] sm:$0xff] }
 0x1d8   :  { %822 = vst.msk [vmem:[#allocation2] sm:$0xff] %vm821_vm4, %v801_v32  ;;  %v1861_v32 = vld [vmem:[%s2647_s3 + $0x90] sm:$0xff]  ;;  %1213 = vmatpush.bf16.msra.mxu3 %v1853_v44  ;;  %1201 = vmatpush.bf16.msra.mxu1 %v1844_v38  ;;  %v1876_v44 = vld [vmem:[%s2652_s8] sm:$0xff] }
 0x1d9   :  { %883 = vst.msk [vmem:[#allocation3 + $0x2] sm:$0x3] %vm831_vm5, %v882_v48  ;;  %1226 = vmatpush.bf16.msra.mxu0 %v1861_v32  ;;  %v1852_v48 = vld [vmem:[%s2647_s3 + $0x48] sm:$0xff]  ;;  %v1896_v32 = vld [vmem:[%s2651_s7] ss:$0 sm:$0xff] }
 0x1dc   :  { %1214 = vmatpush.bf16.msra.mxu3 %v1852_v48 }
 0x1de   :  { %v803_v4 = vpop.permute.xlu1 %802  ;;  %v809_v15 = vpop.permute.xlu0 %808  ;;  %v902_v26 = vld [vmem:[#allocation2 + $0x18] sm:$0x3]  ;;  %v908_v59 = vld [vmem:[#allocation2 + $0x1a] sm:$0x3]  ;;  %v914_v46 = vld [vmem:[#allocation2 + $0x1c] sm:$0x3] }
 0x1df   :  { %823 = vst.msk [vmem:[#allocation2 + $0x8] sm:$0xff] %vm821_vm4, %v803_v4  ;;  %892 = vrot.lane.b32.xlu0 %v890_v43, %s1927_s25  ;;  %v833_v45 = vld [vmem:[#allocation2 + $0x2] sm:$0x3]  ;;  %v830_v19 = vld [vmem:[#allocation2] sm:$0x3]  ;;  %v1851_v43 = vld [vmem:[%s2647_s3 + $0x40] sm:$0xff] }
 0x1e0   :  { %826 = vst.msk [vmem:[#allocation2 + $0x20] sm:$0xff] %vm821_vm4, %v809_v15  ;;  %835 = vrot.lane.b32.xlu2 %v833_v45, %s1926_s24  ;;  %v840_v49 = vld [vmem:[#allocation2 + $0x4] sm:$0x3]  ;;  %v847_v53 = vld [vmem:[#allocation2 + $0x6] sm:$0x3]  ;;  %v1843_v15 = vld [vmem:[%s2647_s3] sm:$0xff]  ;;  %1215 = vmatpush.bf16.msra.mxu3 %v1851_v43 }
 0x1e1   :  { %832 = vst.msk [vmem:[#allocation3] sm:$0x3] %vm831_vm5, %v830_v19  ;;  %v920_v6 = vld [vmem:[#allocation2 + $0x1e] sm:$0x3]  ;;  %v1860_v4 = vld [vmem:[%s2647_s3 + $0x88] sm:$0xff]  ;;  %1202 = vmatpush.bf16.msra.mxu1 %v1843_v15 }
 0x1e2   :  { %1227 = vmatpush.bf16.msra.mxu0 %v1860_v4  ;;  %v1859_v45 = vld [vmem:[%s2647_s3 + $0x80] sm:$0xff] }
 0x1e6   :  { %v811_v37 = vpop.permute.xlu0 %810  ;;  %v854_v52 = vld [vmem:[#allocation2 + $0x8] sm:$0x3]  ;;  %v861_v5 = vld [vmem:[#allocation2 + $0xa] sm:$0x3]  ;;  %v868_v41 = vld [vmem:[#allocation2 + $0xc] sm:$0x3]  ;;  %1228 = vmatpush.bf16.msra.mxu0 %v1859_v45 }
 0x1e7   :  { %827 = vst.msk [vmem:[#allocation2 + $0x28] sm:$0xff] %vm821_vm4, %v811_v37  ;;  %898 = vrot.lane.b32.xlu0 %v896_v58, %s1928_s26  ;;  %v928_v51 = vld [vmem:[#allocation2 + $0x22] sm:$0x3]  ;;  %v926_v47 = vld [vmem:[#allocation2 + $0x20] sm:$0x3]  ;;  %v1867_v58 = vld [vmem:[%s2647_s3 + $0xc0] sm:$0xff] }
 0x1e8   :  { %842 = vrot.lane.b32.xlu2 %v840_v49, %s1927_s25  ;;  %930 = vrot.lane.b32.xlu1 %v928_v51, %s1926_s24  ;;  %927 = vst.msk [vmem:[#allocation3 + $0x4] sm:$0x3] %vm831_vm5, %v926_v47  ;;  %v934_v55 = vld [vmem:[#allocation2 + $0x24] sm:$0x3]  ;;  %v940_v0 = vld [vmem:[#allocation2 + $0x26] sm:$0x3] }
 0x1e9   :  { %v875_v60 = vld [vmem:[#allocation2 + $0xe] sm:$0x3]  ;;  %1241 = vmatpush.bf16.msrb.mxu1 %v1867_v58 }
 0x1ee   :  { %v946_v17 = vld [vmem:[#allocation2 + $0x28] sm:$0x3]  ;;  %v952_v22 = vld [vmem:[#allocation2 + $0x2a] sm:$0x3]  ;;  %v958_v18 = vld [vmem:[#allocation2 + $0x2c] sm:$0x3] }
 0x1ef   :  { %904 = vrot.lane.b32.xlu0 %v902_v26, %s1929_s27  ;;  %v964_v3 = vld [vmem:[#allocation2 + $0x2e] sm:$0x3] }
 0x1f0   :  { %849 = vrot.lane.b32.xlu2 %v847_v53, %s1928_s26  ;;  %936 = vrot.lane.b32.xlu1 %v934_v55, %s1927_s25 }
 0x1f7   :  { %910 = vrot.lane.b32.xlu0 %v908_v59, %s1930_s28 }
 0x1f8   :  { %856 = vrot.lane.b32.xlu2 %v854_v52, %s1929_s27  ;;  %942 = vrot.lane.b32.xlu1 %v940_v0, %s1928_s26 }
 0x1ff   :  { %916 = vrot.lane.b32.xlu0 %v914_v46, %s1931_s29 }
 0x200   :  { %863 = vrot.lane.b32.xlu2 %v861_v5, %s1930_s28  ;;  %948 = vrot.lane.b32.xlu1 %v946_v17, %s1929_s27  ;;  %v1781_v17 = vld [vmem:[%s2649_s5 + $0x18] sm:$0xf]  ;;  %s1934_s27 = smov 86  }
 0x206   :  { %v813_v24 = vpop.permute.xlu1 %812 }
 0x207   :  { %829 = vst.msk [vmem:[#allocation2 + $0x30] sm:$0x3] %vm828_vm6, %v813_v24  ;;  %922 = vrot.lane.b32.xlu0 %v920_v6, %s1932_s30  ;;  %v1871_v24 = vld [vmem:[%s2649_s5 + $0x18] sm:$0x30] }
 0x208   :  { %870 = vrot.lane.b32.xlu2 %v868_v41, %s1931_s29  ;;  %954 = vrot.lane.b32.xlu1 %v952_v22, %s1930_s28  ;;  %v1782_v6 = vor.u32 %v1871_v24, %v1781_v17  ;;  %v1764_v41 = vld [vmem:[%s2650_s6 + $0x18] sm:$0xf]  ;;  %v1875_v22 = vld [vmem:[%s2650_s6 + $0x18] sm:$0x30] }
 0x20e   :  { %v970_v13 = vld [vmem:[#allocation2 + $0x30] sm:$0x3] }
 0x20f   :  { %971 = vst.msk [vmem:[#allocation3 + $0x6] sm:$0x3] %vm831_vm5, %v970_v13  ;;  %v1765_v13 = vor.u32 %v1875_v22, %v1764_v41 }
 0x210   :  { %877 = vrot.lane.b32.xlu2 %v875_v60, %s1932_s30  ;;  %960 = vrot.lane.b32.xlu1 %v958_v18, %s1931_s29  ;;  %v1342_v60 = vsel %vm1298_vm15, %v1782_v6, 0  ;;  %v1870_v18 = vld [vmem:[%s2649_s5 + $0x10] sm:$0xff] }
 0x211   :  { %1348 = vmatpush.bf16.msra.mxu2 %v1342_v60 }
 0x215   :  { %1349 = vmatpush.bf16.msra.mxu2 %v1870_v18 }
 0x218   :  { %966 = vrot.lane.b32.xlu1 %v964_v3, %s1932_s30  ;;  %v1300_v3 = vsel %vm1298_vm15, %v1765_v13, 0  ;;  %s1935_s30 = smov [#allocation4]  }
 0x219   :  { %1306 = vmatpush.bf16.msrb.mxu3 %v1300_v3  ;;  %s1469_s12 = sshll.u32 %s1935_s30, 4  ;;  %s1470_s12 = int_to_ptr.vmem [resolvable:$true] %s1469_s12 }
 0x23a   :  { %v836_v16 = vpop.permute.xlu2 %835 }
 0x23b   :  { %839 = vst.msk [vmem:[#allocation3] sm:$0x3] %vm838_vm7, %v836_v16  ;;  %v1874_v16 = vld [vmem:[%s2650_s6 + $0x10] sm:$0xff] }
 0x23c   :  { %1307 = vmatpush.bf16.msrb.mxu3 %v1874_v16 }
 0x240   :  { %1308 = vmatpush.bf16.msrb.mxu3 %v1873_v10 }
 0x242   :  { %v843_v40 = vpop.permute.xlu2 %842 }
 0x243   :  { %846 = vst.msk [vmem:[#allocation3] sm:$0x3] %vm845_vm8, %v843_v40  ;;  %v1869_v40 = vld [vmem:[%s2649_s5 + $0x8] sm:$0xff] }
 0x244   :  { %1350 = vmatpush.bf16.msra.mxu2 %v1869_v40 }
 0x249   :  { %v887_v61 = vpop.permute.xlu0 %886 }
 0x24a   :  { %v850_v20 = vpop.permute.xlu2 %849  ;;  %889 = vst.msk [vmem:[#allocation3 + $0x2] sm:$0x3] %vm838_vm7, %v887_v61  ;;  %v1868_v61 = vld [vmem:[%s2649_s5] sm:$0xff] }
 0x24b   :  { %853 = vst.msk [vmem:[#allocation3] sm:$0x3] %vm852_vm9, %v850_v20  ;;  %v1895_v20 = vld [vmem:[%s2648_s4] ss:$0 sm:$0xff]  ;;  %1351 = vmatpush.bf16.msra.mxu2 %v1868_v61 }
 0x251   :  { %v893_v21 = vpop.permute.xlu0 %892 }
 0x252   :  { %v857_v25 = vpop.permute.xlu2 %856  ;;  %895 = vst.msk [vmem:[#allocation3 + $0x2] sm:$0x3] %vm845_vm8, %v893_v21 }
 0x253   :  { %860 = vst.msk [vmem:[#allocation3] sm:$0x3] %vm859_vm10, %v857_v25 }
 0x259   :  { %v899_v30 = vpop.permute.xlu0 %898 }
 0x25a   :  { %v864_v62 = vpop.permute.xlu2 %863  ;;  %v931_v28 = vpop.permute.xlu1 %930  ;;  %901 = vst.msk [vmem:[#allocation3 + $0x2] sm:$0x3] %vm852_vm9, %v899_v30 }
 0x25b   :  { %867 = vst.msk [vmem:[#allocation3] sm:$0x3] %vm866_vm11, %v864_v62 }
 0x25c   :  { %933 = vst.msk [vmem:[#allocation3 + $0x4] sm:$0x3] %vm838_vm7, %v931_v28  ;;  %v1872_v28 = vld [vmem:[%s2650_s6] sm:$0xff] }
 0x25d   :  { %1309 = vmatpush.bf16.msrb.mxu3 %v1872_v28 }
 0x261   :  { %v905_v36 = vpop.permute.xlu0 %904 }
 0x262   :  { %v871_v56 = vpop.permute.xlu2 %870  ;;  %v937_v39 = vpop.permute.xlu1 %936  ;;  %907 = vst.msk [vmem:[#allocation3 + $0x2] sm:$0x3] %vm859_vm10, %v905_v36 }
 0x263   :  { %874 = vst.msk [vmem:[#allocation3] sm:$0x3] %vm873_vm12, %v871_v56 }
 0x264   :  { %939 = vst.msk [vmem:[#allocation3 + $0x4] sm:$0x3] %vm845_vm8, %v937_v39  ;;  %v1807_v39 = vld [vmem:[%s2652_s8 + $0x10] sm:$0xf] }
 0x265   :  { %v1808_v35 = vor.u32 %v1878_v34, %v1807_v39 }
 0x269   :  { %v911_v50 = vpop.permute.xlu0 %910 }
 0x26a   :  { %v878_v9 = vpop.permute.xlu2 %877  ;;  %v943_v33 = vpop.permute.xlu1 %942  ;;  %913 = vst.msk [vmem:[#allocation3 + $0x2] sm:$0x3] %vm866_vm11, %v911_v50  ;;  %v1881_v50 = vld [vmem:[%s2653_s9 + $0x10] sm:$0x10] }
 0x26b   :  { %881 = vst.msk [vmem:[#allocation3] sm:$0x3] %vm880_vm13, %v878_v9  ;;  %v1795_v9 = vor.u32 %v1881_v50, %v1794_v63 }
 0x26c   :  { %945 = vst.msk [vmem:[#allocation3 + $0x4] sm:$0x3] %vm852_vm9, %v943_v33  ;;  %v1441_v33 = vsel %vm1403_vm1, %v1808_v35, 0 }
 0x26d   :  { %v1405_v1 = vsel %vm1403_vm1, %v1795_v9, 0 }
 0x271   :  { %v917_v42 = vpop.permute.xlu0 %916 }
 0x272   :  { %v949_v12 = vpop.permute.xlu1 %948  ;;  %919 = vst.msk [vmem:[#allocation3 + $0x2] sm:$0x3] %vm873_vm12, %v917_v42  ;;  %v1877_v42 = vld [vmem:[%s2652_s8 + $0x8] sm:$0xff] }
 0x273   :  { %951 = vst.msk [vmem:[#allocation3 + $0x4] sm:$0x3] %vm859_vm10, %v949_v12  ;;  %v1880_v12 = vld [vmem:[%s2653_s9 + $0x8] sm:$0xff] }
 0x279   :  { %v923_v19 = vpop.permute.xlu0 %922 }
 0x27a   :  { %v955_v37 = vpop.permute.xlu1 %954  ;;  %925 = vst.msk [vmem:[#allocation3 + $0x2] sm:$0x3] %vm880_vm13, %v923_v19  ;;  %v1879_v19 = vld [vmem:[%s2653_s9] sm:$0xff] }
 0x27b   :  { %957 = vst.msk [vmem:[#allocation3 + $0x4] sm:$0x3] %vm866_vm11, %v955_v37 }
 0x282   :  { %v961_v49 = vpop.permute.xlu1 %960 }
 0x283   :  { %963 = vst.msk [vmem:[#allocation3 + $0x4] sm:$0x3] %vm873_vm12, %v961_v49 }
 0x28a   :  { %v967_v51 = vpop.permute.xlu1 %966 }
 0x28b   :  { %969 = vst.msk [vmem:[#allocation3 + $0x4] sm:$0x3] %vm880_vm13, %v967_v51 }
 0x292   :  { %v972_v47 = vld [vmem:[#allocation3] sm:$0xff] }
 0x293   :  { %974 = vst [vmem:[#allocation1] ss:$4 sm:$0xff] %v972_v47 }
 0x29a   :  { %v975_v26 = vld.sshfl [vmem:[#allocation1] sm:$0xff pattern:$0x73625140]  ;;  %v976_v53 = vld.sshfl [vmem:[#allocation1 + $0x8] sm:$0xff pattern:$0x73625140] }
 0x29b   :  { %v983_v55 = vpack.c.bf16 %v975_v26, %v975_v26  ;;  %v984_v59 = vpack.c.bf16 %v976_v53, %v976_v53  ;;  %v977_v52 = vld.sshfl [vmem:[#allocation1 + $0x10] sm:$0xff pattern:$0x73625140]  ;;  %v978_v46 = vld.sshfl [vmem:[#allocation1 + $0x18] sm:$0xff pattern:$0x73625140] }
 0x29c   :  { %v985_v0 = vpack.c.bf16 %v977_v52, %v977_v52  ;;  %v986_v5 = vpack.c.bf16 %v978_v46, %v978_v46  ;;  %v1897_v53 = vld [vmem:[%s2654_s10] ss:$0 sm:$0xff] }
 0x29d   :  { %1203 = vmatmul.bf16.vlgmr.msra.gmra.mxu1 %v983_v55  ;;  %1216 = vmatmul.bf16.vlgmr.msra.gmra.mxu3 %v984_v59 }
 0x29e   :  { %1229 = vmatmul.bf16.vlgmr.msra.gmra.mxu0 %v985_v0  ;;  %1448 = vmatpush.bf16.msra.mxu3 %v1441_v33 }
 0x29f   :  { %1412 = vmatpush.bf16.msra.mxu1 %v1405_v1 }
 0x2a2   :  { %1449 = vmatpush.bf16.msra.mxu3 %v1877_v42 }
 0x2a3   :  { %1413 = vmatpush.bf16.msra.mxu1 %v1880_v12 }
 0x2a6   :  { %1450 = vmatpush.bf16.msra.mxu3 %v1876_v44 }
 0x2a7   :  { %1414 = vmatpush.bf16.msra.mxu1 %v1879_v19 }
 0x2ad   :  { %1749 = vmatmul.msk.bf16.vlgmr.msrb.gmra.mxu1 %vm1191_vm14, %v986_v5 }
 0x31a   :  { %v1204_v2 = vpop.f32.mrf.mxu1 }
 0x31b   :  { %v1230_v14 = vpop.f32.mrf.mxu0  ;;  %v1205_v11 = vadd.f32 %v1895_v20, %v1204_v2 }
 0x320   :  { %v1217_v57 = vpop.f32.mrf.mxu3 }
 0x321   :  { %v1218_v25 = vadd.f32 %v1217_v57, %v1205_v11 }
 0x322   :  { %v1206_v8 = vpop.f32.mrf.mxu1 }
 0x323   :  { %v1232_v21 = vpop.f32.mrf.mxu0  ;;  %v1231_v54 = vadd.f32 %v1230_v14, %v1218_v25 }
 0x328   :  { %v1219_v7 = vpop.f32.mrf.mxu3 }
 0x32a   :  { %v1243_v27 = vpop.f32.mrf.mxu1 }
 0x32b   :  { %v1244_v30 = vadd.f32 %v1243_v27, %v1231_v54 }
 0x32d   :  { %1248 = vrot.lane.b32.xlu2 %v1244_v30, %s1933_s15 }
 0x332   :  { %v1245_v62 = vpop.f32.mrf.mxu1 }
 0x387   :  { %v1249_v29 = vpop.permute.xlu2 %1248 }
 0x388   :  { %v1251_v23 = vmax.f32 %v1244_v30, %v1249_v29  ;;  %v1253_v31 = vmin.f32 %v1244_v30, %v1249_v29 }
 0x38a   :  { %v1252_v36 = vpack.c.bf16 %v1251_v23, %v1251_v23  ;;  %v1254_v56 = vpack.c.bf16 %v1253_v31, %v1253_v31 }
 0x38c   :  { %1766 = vmatmul.msk.bf16.vlgmr.msrb.gmra.mxu3 %vm1294_vm0, %v1254_v56  ;;  %1783 = vmatmul.msk.bf16.vlgmr.msra.gmra.mxu2 %vm1294_vm0, %v1252_v36 }
 0x40f   :  { %v1311_v38 = vpop.f32.mrf.mxu3  ;;  %v1353_v48 = vpop.f32.mrf.mxu2 }
 0x410   :  { %v1354_v4 = vadd.f32 %v1353_v48, %v1311_v38 }
 0x412   :  { %v1361_v15 = vadd.f32 %v1896_v32, %v1354_v4 }
 0x414   :  { %1363 = vrot.lane.b32.xlu0 %v1361_v15, %s1934_s27 }
 0x417   :  { %v1313_v43 = vpop.f32.mrf.mxu3  ;;  %v1355_v45 = vpop.f32.mrf.mxu2 }
 0x486   :  { %v1364_v37 = vpop.permute.xlu0 %1363 }
 0x487   :  { %v1366_v58 = vmax.f32 %v1361_v15, %v1364_v37  ;;  %v1368_v49 = vmin.f32 %v1361_v15, %v1364_v37 }
 0x489   :  { %v1367_v51 = vpack.c.bf16 %v1366_v58, %v1366_v58  ;;  %v1369_v47 = vpack.c.bf16 %v1368_v49, %v1368_v49 }
 0x48b   :  { %1796 = vmatmul.msk.bf16.vlgmr.msra.gmra.mxu1 %vm1399_vm2, %v1369_v47  ;;  %1809 = vmatmul.msk.bf16.vlgmr.msra.gmra.mxu3 %vm1399_vm2, %v1367_v51 }
 0x508   :  { %v1416_v26 = vpop.f32.mrf.mxu1 }
 0x50e   :  { %v1452_v55 = vpop.f32.mrf.mxu3 }
 0x50f   :  { %v1453_v59 = vadd.f32 %v1452_v55, %v1416_v26 }
 0x510   :  { %v1418_v52 = vpop.f32.mrf.mxu1 }
 0x511   :  { %v1460_v0 = vadd.f32 %v1897_v53, %v1453_v59 }
 0x513   :  { %v1461_v46 = vmul.f32 1.4142135, %v1460_v0 }
 0x515   :  { %1463 = vst.msk [vmem:[#allocation4] sm:$0x3] %vm1462_vm3, %v1461_v46 }
 0x516   :  { %v1454_v5 = vpop.f32.mrf.mxu3  ;;  %1474 = dma.vmem_to_hbm [thread:$0]  %s1470_s12, 32, %s1472_s14, [#allocation5]  }
 0x517   :  { %1922 = dma.done.wait [#allocation5], 32  }
 0x518   :  { %1923 = vsyncadd [#allocation5], 4294967264 }
 0x519   :  { %1479 = vsyncpa [#allocation5], 1 }

</bundles_post_ra>
